<compile_context>
chip_gen: v5e
topology: v5e:2x2
jax: 0.10.0
libtpu: 0.0.40
codegen_flags: <defaults>
</compile_context>

<pallas_src>
import functools

import jax
import jax.numpy as jnp
from jax import lax
from jax.experimental import pallas as pl
from jax.experimental.pallas import tpu as pltpu


def _round_up(x, m):
    return ((x + m - 1) // m) * m


# ---------------------------------------------------------------------------
# Kernel 1: conv-as-matmul (bf16 MXU, f32 accum) + fused per-tile BN stats
# ---------------------------------------------------------------------------
def _conv_stats_kernel(p_ref, w_ref, o_ref, stats_ref, acc_ref):
    # p_ref: (tile_m, tile_k)  w_ref: (tile_k, C)  o_ref: (tile_m, C)
    # stats_ref: (1, 2, C)  -> [sum, sum_of_squares] over the M tile
    k = pl.program_id(1)

    @pl.when(k == 0)
    def _():
        acc_ref[...] = jnp.zeros_like(acc_ref)

    acc_ref[...] += jnp.dot(p_ref[...], w_ref[...],
                            preferred_element_type=jnp.float32)

    @pl.when(k == pl.num_programs(1) - 1)
    def _():
        acc = acc_ref[...]
        o_ref[...] = acc
        s = jnp.sum(acc, axis=0, keepdims=True)          # (1, C)
        sq = jnp.sum(acc * acc, axis=0, keepdims=True)   # (1, C)
        stats_ref[...] = jnp.concatenate([s, sq], axis=0)[None, :, :]


# ---------------------------------------------------------------------------
# Kernel 2: BN affine apply + ReLU   y = relu(x * scale + shift)   (f32 VPU)
# ---------------------------------------------------------------------------
def _bn_relu_kernel(x_ref, scale_ref, shift_ref, o_ref):
    o_ref[...] = jnp.maximum(x_ref[...] * scale_ref[...] + shift_ref[...], 0.0)


# ---------------------------------------------------------------------------
# Glue: SAME padding + channel-last im2col (plain JAX), then Pallas calls
# ---------------------------------------------------------------------------
def _compute_pad(k, s, size):
    if size % s == 0:
        return max(k - s, 0)
    return max(k - size % s, 0)


def _im2col_channels_last(xp, kernel_shape, stride):
    """xp: (N, Tp, Hp, Wp, C) padded, channel-last.  Returns (M, K), K ordered
    (dt, dh, dw, c) which matches weight.transpose(2,3,4,1,0).reshape(K, C_out).
    The reshape to (M, K) collapses leading dims only -> no big transpose."""
    n, tp, hp, wp, c = xp.shape
    kt, kh, kw = kernel_shape
    st, sh, sw = stride
    to = (tp - kt) // st + 1
    ho = (hp - kh) // sh + 1
    wo = (wp - kw) // sw + 1
    cols = []
    for dt in range(kt):
        for dh in range(kh):
            for dw in range(kw):
                cols.append(xp[:,
                               dt:dt + (to - 1) * st + 1:st,
                               dh:dh + (ho - 1) * sh + 1:sh,
                               dw:dw + (wo - 1) * sw + 1:sw,
                               :])                       # (N, To, Ho, Wo, C)
    patches = jnp.concatenate(cols, axis=-1)              # (N, To, Ho, Wo, K)
    return patches.reshape(n * to * ho * wo, kt * kh * kw * c), (to, ho, wo)


# Conservative budget: fits v7x (64 MiB physical / 32 MiB default scoped VMEM).
_VMEM_BUDGET = 20 * 1024 * 1024


def _pick_tile_m(tile_k, c_pad, mxu_bytes):
    for tm in (2048, 1024, 512, 256, 128):   # multiples of 256 preferred (2x256 MXU)
        need = (2 * tm * tile_k * mxu_bytes       # patch tile, double-buffered
                + 2 * tile_k * c_pad * mxu_bytes  # weight tile, double-buffered
                + 2 * tm * c_pad * 4              # conv-out tile, double-buffered
                + tm * c_pad * 4                  # f32 accumulator scratch
                + 4 * 2 * c_pad * 4)              # stats tiles (tiny)
        if need <= _VMEM_BUDGET:
            return tm
    return 128


@functools.partial(jax.jit,
                   static_argnames=("kernel_shape", "stride", "eps", "mxu_dtype"))
def unit3d_forward(x, weight, gamma, beta,
                   kernel_shape=(3, 3, 3), stride=(1, 1, 1),
                   eps=1e-3, mxu_dtype=jnp.bfloat16):
    """Unit3D forward (BN + ReLU, no bias).  x: (N, C_in, T, H, W) f32.
    Returns (N, C_out, To, Ho, Wo) f32.  Conv runs on the MXU in `mxu_dtype`
    (bf16 by default) with f32 accumulation; BN uses batch stats in f32."""
    n, c_in, t, h, w = x.shape
    c_out = weight.shape[0]
    kt, kh, kw = kernel_shape
    k_dim = c_in * kt * kh * kw

    # ---- dynamic SAME padding (static shapes, mirrors F.pad in the module) -
    pad_t = _compute_pad(kt, stride[0], t)
    pad_h = _compute_pad(kh, stride[1], h)
    pad_w = _compute_pad(kw, stride[2], w)
    x_cl = jnp.transpose(x, (0, 2, 3, 4, 1)).astype(mxu_dtype)   # NTHWC
    xp = jnp.pad(x_cl, ((0, 0),
                        (pad_t // 2, pad_t - pad_t // 2),
                        (pad_h // 2, pad_h - pad_h // 2),
                        (pad_w // 2, pad_w - pad_w // 2),
                        (0, 0)))

    # ---- im2col, channel-last ----------------------------------------------
    patches, (to, ho, wo) = _im2col_channels_last(xp, kernel_shape, stride)
    m = n * to * ho * wo

    # ---- lane/sublane-dense, tile-aligned padded shapes ---------------------
    c_pad = _round_up(c_out, 128)
    tile_k = min(_round_up(k_dim, 128), 1024)
    k_pad = _round_up(k_dim, tile_k)
    mxu_bytes = jnp.dtype(mxu_dtype).itemsize
    tile_m = _pick_tile_m(tile_k, c_pad, mxu_bytes)
    tile_m = min(tile_m, _round_up(m, 256))
    m_pad = _round_up(m, tile_m)
    m_tiles = m_pad // tile_m
    k_tiles = k_pad // tile_k

    # zero padding: padded rows/cols contribute nothing to the matmul or stats
    patches = jnp.pad(patches, ((0, m_pad - m), (0, k_pad - k_dim)))

    # weight (C_out, C_in, kt, kh, kw) -> (K, C_out), K ordered (dt, dh, dw, c)
    w_mat = jnp.transpose(weight, (2, 3, 4, 1, 0)).reshape(k_dim, c_out)
    w_mat = jnp.pad(w_mat.astype(mxu_dtype),
                    ((0, k_pad - k_dim), (0, c_pad - c_out)))

    # ---- Pallas kernel 1: conv matmul + fused per-tile BN stats -------------
    conv_flat, stats = pl.pallas_call(
        _conv_stats_kernel,
        out_shape=(jax.ShapeDtypeStruct((m_pad, c_pad), jnp.float32),
                   jax.ShapeDtypeStruct((m_tiles, 2, c_pad), jnp.float32)),
        grid_spec=pltpu.PrefetchScalarGridSpec(
            num_scalar_prefetch=0,
            grid=(m_tiles, k_tiles),
            in_specs=[
                pl.BlockSpec((tile_m, tile_k), lambda i, kk: (i, kk)),
                pl.BlockSpec((tile_k, c_pad), lambda i, kk: (kk, 0)),
            ],
            out_specs=[
                pl.BlockSpec((tile_m, c_pad), lambda i, kk: (i, 0)),
                pl.BlockSpec((1, 2, c_pad), lambda i, kk: (i, 0, 0)),
            ],
            scratch_shapes=[pltpu.VMEM((tile_m, c_pad), jnp.float32)],
        ),
        compiler_params=pltpu.CompilerParams(
            dimension_semantics=("parallel", "arbitrary"),
            vmem_limit_bytes=32 * 1024 * 1024),
    )(patches, w_mat)

    # ---- tiny reduction of per-tile stats -> per-channel scale/shift --------
    # BatchNorm3d training-mode: biased variance over (N, T, H, W); divide by
    # the true M (padded rows are exact zeros -> contribute nothing).
    ssum = jnp.sum(stats[:, 0, :], axis=0)                       # (c_pad,)
    ssq = jnp.sum(stats[:, 1, :], axis=0)                        # (c_pad,)
    inv_m = 1.0 / float(m)
    mean = ssum * inv_m
    var = jnp.maximum(ssq * inv_m - mean * mean, 0.0)            # E[x^2]-mean^2
    inv_std = lax.rsqrt(var + eps)
    gamma_p = jnp.pad(gamma.astype(jnp.float32), (0, c_pad - c_out))
    beta_p = jnp.pad(beta.astype(jnp.float32), (0, c_pad - c_out))
    scale = (gamma_p * inv_std).reshape(1, c_pad)
    shift = (beta_p - mean * gamma_p * inv_std).reshape(1, c_pad)

    # ---- Pallas kernel 2: BN affine apply + ReLU, tiled over M --------------
    out_flat = pl.pallas_call(
        _bn_relu_kernel,
        out_shape=jax.ShapeDtypeStruct((m_pad, c_pad), jnp.float32),
        grid_spec=pltpu.PrefetchScalarGridSpec(
            num_scalar_prefetch=0,
            grid=(m_tiles,),
            in_specs=[
                pl.BlockSpec((tile_m, c_pad), lambda i: (i, 0)),
                pl.BlockSpec((1, c_pad), lambda i: (0, 0)),
                pl.BlockSpec((1, c_pad), lambda i: (0, 0)),
            ],
            out_specs=pl.BlockSpec((tile_m, c_pad), lambda i: (i, 0)),
        ),
        compiler_params=pltpu.CompilerParams(
            dimension_semantics=("parallel",),
            vmem_limit_bytes=32 * 1024 * 1024),
    )(conv_flat, scale, shift)

    # drop M / channel padding only at the very end, then back to NCTHW
    out = out_flat[:m, :c_out].reshape(n, to, ho, wo, c_out)
    return jnp.transpose(out, (0, 4, 1, 2, 3))


# ---------------------------------------------------------------------------
# Pure-JAX reference (conv operands rounded the same way as the kernel's MXU
# inputs, so the check isolates structural / indexing errors).
# ---------------------------------------------------------------------------
def _reference(x, weight, gamma, beta, kernel_shape, stride, eps, mxu_dtype):
    xr = x.astype(mxu_dtype).astype(jnp.float32)
    wr = weight.astype(mxu_dtype).astype(jnp.float32)
    kt, kh, kw = kernel_shape
    _, _, t, h, w = x.shape
    pad_t = _compute_pad(kt, stride[0], t)
    pad_h = _compute_pad(kh, stride[1], h)
    pad_w = _compute_pad(kw, stride[2], w)
    xp = jnp.pad(xr, ((0, 0), (0, 0),
                      (pad_t // 2, pad_t - pad_t // 2),
                      (pad_h // 2, pad_h - pad_h // 2),
                      (pad_w // 2, pad_w - pad_w // 2)))
    conv = lax.conv_general_dilated(
        xp, wr, window_strides=stride, padding='VALID',
        dimension_numbers=('NCDHW', 'OIDHW', 'NCDHW'))
    mean = conv.mean(axis=(0, 2, 3, 4), keepdims=True)
    var = ((conv - mean) ** 2).mean(axis=(0, 2, 3, 4), keepdims=True)
    g = gamma.reshape(1, -1, 1, 1, 1)
    b = beta.reshape(1, -1, 1, 1, 1)
    return jnp.maximum((conv - mean) * lax.rsqrt(var + eps) * g + b, 0.0)


# ---------------------------------------------------------------------------
# Main
# ---------------------------------------------------------------------------
if __name__ == "__main__":
    # Unit3D(in_channels=4, output_channels=8, kernel_shape=(3,3,3), stride=(1,1,1))
    N, C_IN, T, H, W = 2, 4, 8, 16, 16
    C_OUT = 8
    KSHAPE = (3, 3, 3)
    STRIDE = (1, 1, 1)
    EPS = 1e-3

    key = jax.random.PRNGKey(0)
    kx, kw_, kg, kb = jax.random.split(key, 4)
    x = jax.random.normal(kx, (N, C_IN, T, H, W), dtype=jnp.float32)
    weight = jax.random.normal(kw_, (C_OUT, C_IN) + KSHAPE, dtype=jnp.float32) * 0.1
    gamma = jax.random.uniform(kg, (C_OUT,), dtype=jnp.float32, minval=0.5, maxval=1.5)
    beta = jax.random.normal(kb, (C_OUT,), dtype=jnp.float32) * 0.1

    out = unit3d_forward(x, weight, gamma, beta,
                         kernel_shape=KSHAPE, stride=STRIDE, eps=EPS)
    out = jax.block_until_ready(out)

    ref = _reference(x, weight, gamma, beta, KSHAPE, STRIDE, EPS, jnp.bfloat16)
    assert out.shape == ref.shape, (out.shape, ref.shape)
    max_err = float(jnp.max(jnp.abs(out - ref)))
    assert max_err < 1e-2, f"max abs err too large: {max_err}"

    print("KERNEL_OK")
</pallas_src>

<mosaic_0001>
module attributes {stable_mosaic.version = 11 : i64} {
  func.func @_conv_stats_kernel(%arg0: i32, %arg1: i32, %arg2: memref<2048x128xbf16, #tpu.memory_space<vmem>>, %arg3: memref<128x128xbf16, #tpu.memory_space<vmem>>, %arg4: memref<2048x128xf32, #tpu.memory_space<vmem>>, %arg5: memref<1x2x128xf32, #tpu.memory_space<vmem>>, %arg6: memref<2048x128xf32, #tpu.memory_space<vmem>>) attributes {dimension_semantics = [#tpu.dimension_semantics<parallel>, #tpu.dimension_semantics<arbitrary>], iteration_bounds = array<i64: 2, 1>, scalar_prefetch = 0 : i64, scratch_operands = 1 : i64, tpu.core_type = #tpu.core_type<tc>, window_params = [{transform_indices = @transform_0, window_bounds = array<i64: 2048, 128>}, {transform_indices = @transform_1, window_bounds = array<i64: 128, 128>}, {transform_indices = @transform_2, window_bounds = array<i64: 2048, 128>}, {transform_indices = @transform_3, window_bounds = array<i64: 1, 2, 128>}]} {
    %c0_i32 = arith.constant 0 : i32
    %0 = arith.cmpi eq, %arg1, %c0_i32 : i32
    %1 = arith.extui %0 : i1 to i32
    %c0_i32_0 = arith.constant 0 : i32
    %2 = arith.cmpi ne, %1, %c0_i32_0 : i32
    scf.if %2 {
      %cst_10 = arith.constant 0.000000e+00 : f32
      %12 = vector.broadcast %cst_10 : f32 to vector<2048x128xf32>
      %c0_11 = arith.constant 0 : index
      %c0_12 = arith.constant 0 : index
      %13 = vector.load %arg6[%c0_11, %c0_12] : memref<2048x128xf32, #tpu.memory_space<vmem>>, vector<2048x128xf32>
      tpu.vector_store %arg6[%c0_11, %c0_12], %12 {strides = array<i32>} : memref<2048x128xf32, #tpu.memory_space<vmem>>, vector<2048x128xf32>,
    } else {
    }
    %c0 = arith.constant 0 : index
    %c0_1 = arith.constant 0 : index
    %3 = vector.load %arg6[%c0, %c0_1] : memref<2048x128xf32, #tpu.memory_space<vmem>>, vector<2048x128xf32>
    %c0_2 = arith.constant 0 : index
    %c0_3 = arith.constant 0 : index
    %4 = vector.load %arg2[%c0_2, %c0_3] : memref<2048x128xbf16, #tpu.memory_space<vmem>>, vector<2048x128xbf16>
    %c0_4 = arith.constant 0 : index
    %c0_5 = arith.constant 0 : index
    %5 = vector.load %arg3[%c0_4, %c0_5] : memref<128x128xbf16, #tpu.memory_space<vmem>>, vector<128x128xbf16>
    %cst = arith.constant dense<0.000000e+00> : vector<2048x128xf32>
    %6 = tpu.matmul %4, %5, %cst {dimension_numbers = #tpu.dot_dimension_numbers<[1], [0], [0], [1], [0, 0, 1, 1], [], []>} : vector<2048x128xbf16>, vector<128x128xbf16>, vector<2048x128xf32> -> vector<2048x128xf32>
    %7 = arith.addf %3, %6 : vector<2048x128xf32>
    %c0_6 = arith.constant 0 : index
    %c0_7 = arith.constant 0 : index
    %8 = vector.load %arg6[%c0_6, %c0_7] : memref<2048x128xf32, #tpu.memory_space<vmem>>, vector<2048x128xf32>
    tpu.vector_store %arg6[%c0_6, %c0_7], %7 {strides = array<i32>} : memref<2048x128xf32, #tpu.memory_space<vmem>>, vector<2048x128xf32>,
    %c0_i32_8 = arith.constant 0 : i32
    %9 = arith.cmpi eq, %arg1, %c0_i32_8 : i32
    %10 = arith.extui %9 : i1 to i32
    %c0_i32_9 = arith.constant 0 : i32
    %11 = arith.cmpi ne, %10, %c0_i32_9 : i32
    scf.if %11 {
      %c0_10 = arith.constant 0 : index
      %c0_11 = arith.constant 0 : index
      %12 = vector.load %arg6[%c0_10, %c0_11] : memref<2048x128xf32, #tpu.memory_space<vmem>>, vector<2048x128xf32>
      %c0_12 = arith.constant 0 : index
      %c0_13 = arith.constant 0 : index
      %13 = vector.load %arg4[%c0_12, %c0_13] : memref<2048x128xf32, #tpu.memory_space<vmem>>, vector<2048x128xf32>
      tpu.vector_store %arg4[%c0_12, %c0_13], %12 {strides = array<i32>} : memref<2048x128xf32, #tpu.memory_space<vmem>>, vector<2048x128xf32>,
      %cst_14 = arith.constant dense<0.000000e+00> : vector<128xf32>
      %14 = vector.multi_reduction <add>, %12, %cst_14 [0] : vector<2048x128xf32> to vector<128xf32>
      %15 = vector.shape_cast %14 : vector<128xf32> to vector<1x128xf32>
      %16 = arith.mulf %12, %12 : vector<2048x128xf32>
      %cst_15 = arith.constant dense<0.000000e+00> : vector<128xf32>
      %17 = vector.multi_reduction <add>, %16, %cst_15 [0] : vector<2048x128xf32> to vector<128xf32>
      %18 = vector.shape_cast %17 : vector<128xf32> to vector<1x128xf32>
      %19 = tpu.concatenate %15, %18 in 0 : vector<1x128xf32>, vector<1x128xf32> -> vector<2x128xf32>
      %20 = vector.shape_cast %19 : vector<2x128xf32> to vector<1x2x128xf32>
      %c0_16 = arith.constant 0 : index
      %c0_17 = arith.constant 0 : index
      %c0_18 = arith.constant 0 : index
      %21 = vector.load %arg5[%c0_16, %c0_17, %c0_18] : memref<1x2x128xf32, #tpu.memory_space<vmem>>, vector<1x2x128xf32>
      tpu.vector_store %arg5[%c0_16, %c0_17, %c0_18], %20 {strides = array<i32>} : memref<1x2x128xf32, #tpu.memory_space<vmem>>, vector<1x2x128xf32>,
    } else {
    }
    return
  }
  func.func @transform_0(%arg0: i32, %arg1: i32) -> (i32, i32) {
    %c0_i32 = arith.constant 0 : i32
    return %arg0, %arg1 : i32, i32
  }
  func.func @transform_1(%arg0: i32, %arg1: i32) -> (i32, i32) {
    %c0_i32 = arith.constant 0 : i32
    %c0_i32_0 = arith.constant 0 : i32
    return %arg1, %c0_i32 : i32, i32
  }
  func.func @transform_2(%arg0: i32, %arg1: i32) -> (i32, i32) {
    %c0_i32 = arith.constant 0 : i32
    %c0_i32_0 = arith.constant 0 : i32
    return %arg0, %c0_i32 : i32, i32
  }
  func.func @transform_3(%arg0: i32, %arg1: i32) -> (i32, i32, i32) {
    %c0_i32 = arith.constant 0 : i32
    %c0_i32_0 = arith.constant 0 : i32
    %c0_i32_1 = arith.constant 0 : i32
    return %arg0, %c0_i32, %c0_i32_0 : i32, i32, i32
  }
}

module attributes {stable_mosaic.version = 11 : i64} {
  func.func @_bn_relu_kernel(%arg0: i32, %arg1: memref<2048x128xf32, #tpu.memory_space<vmem>>, %arg2: memref<1x128xf32, #tpu.memory_space<vmem>>, %arg3: memref<1x128xf32, #tpu.memory_space<vmem>>, %arg4: memref<2048x128xf32, #tpu.memory_space<vmem>>) attributes {dimension_semantics = [#tpu.dimension_semantics<parallel>], iteration_bounds = array<i64: 2>, scalar_prefetch = 0 : i64, scratch_operands = 0 : i64, tpu.core_type = #tpu.core_type<tc>, window_params = [{transform_indices = @transform_0, window_bounds = array<i64: 2048, 128>}, {pipeline_mode = #tpu.pipeline_mode<synchronous>, transform_indices = @transform_1, window_bounds = array<i64: 1, 128>}, {pipeline_mode = #tpu.pipeline_mode<synchronous>, transform_indices = @transform_2, window_bounds = array<i64: 1, 128>}, {transform_indices = @transform_3, window_bounds = array<i64: 2048, 128>}]} {
    %c0 = arith.constant 0 : index
    %c0_0 = arith.constant 0 : index
    %0 = vector.load %arg1[%c0, %c0_0] : memref<2048x128xf32, #tpu.memory_space<vmem>>, vector<2048x128xf32>
    %c0_1 = arith.constant 0 : index
    %c0_2 = arith.constant 0 : index
    %1 = vector.load %arg2[%c0_1, %c0_2] : memref<1x128xf32, #tpu.memory_space<vmem>>, vector<1x128xf32>
    %2 = vector.broadcast %1 : vector<1x128xf32> to vector<2048x128xf32>
    %3 = arith.mulf %0, %2 : vector<2048x128xf32>
    %c0_3 = arith.constant 0 : index
    %c0_4 = arith.constant 0 : index
    %4 = vector.load %arg3[%c0_3, %c0_4] : memref<1x128xf32, #tpu.memory_space<vmem>>, vector<1x128xf32>
    %5 = vector.broadcast %4 : vector<1x128xf32> to vector<2048x128xf32>
    %6 = arith.addf %3, %5 : vector<2048x128xf32>
    %cst = arith.constant 0.000000e+00 : f32
    %7 = vector.broadcast %cst : f32 to vector<2048x128xf32>
    %8 = arith.maximumf %6, %7 : vector<2048x128xf32>
    %c0_5 = arith.constant 0 : index
    %c0_6 = arith.constant 0 : index
    %9 = vector.load %arg4[%c0_5, %c0_6] : memref<2048x128xf32, #tpu.memory_space<vmem>>, vector<2048x128xf32>
    tpu.vector_store %arg4[%c0_5, %c0_6], %8 {strides = array<i32>} : memref<2048x128xf32, #tpu.memory_space<vmem>>, vector<2048x128xf32>,
    return
  }
  func.func @transform_0(%arg0: i32) -> (i32, i32) {
    %c0_i32 = arith.constant 0 : i32
    %c0_i32_0 = arith.constant 0 : i32
    return %arg0, %c0_i32 : i32, i32
  }
  func.func @transform_1(%arg0: i32) -> (i32, i32) {
    %c0_i32 = arith.constant 0 : i32
    %c0_i32_0 = arith.constant 0 : i32
    %c0_i32_1 = arith.constant 0 : i32
    return %c0_i32, %c0_i32_0 : i32, i32
  }
  func.func @transform_2(%arg0: i32) -> (i32, i32) {
    %c0_i32 = arith.constant 0 : i32
    %c0_i32_0 = arith.constant 0 : i32
    %c0_i32_1 = arith.constant 0 : i32
    return %c0_i32, %c0_i32_0 : i32, i32
  }
  func.func @transform_3(%arg0: i32) -> (i32, i32) {
    %c0_i32 = arith.constant 0 : i32
    %c0_i32_0 = arith.constant 0 : i32
    return %arg0, %c0_i32 : i32, i32
  }
}

</mosaic_0001>

<bundles_post_ra>
// kernel: unit3d_forward.3
= control target key start
LH: loop header
LB: loop body
LE: loop exit
PB: predicated region body
PF: predicated region fallthrough
CT: control target
= control target key end

     0   :  { %s1571_s12 = smov 0   ;;  %s2646_s0 = inlined_call_operand.vmem [shape: f32[4096,128], index: 0, kind: input, shape index: {}]   ;;  %s2647_s1 = inlined_call_operand.vmem [shape: f32[1,128], index: 1, kind: input, shape index: {}]   ;;  %s2648_s2 = inlined_call_operand.vmem [shape: f32[1,128], index: 2, kind: input, shape index: {}]   ;;  %s2649_s3 = inlined_call_operand.vmem [shape: f32[4096,128], index: 3, kind: output, shape index: {}]  }
   0x1 LB: > { %s1518_s13 = sadd.s32 4294967295, %s1549_s12   ;;  %p1522_p0 = scmp.ge.s32.totalorder %s1549_s12, 1  ;;  %s1549_s12 = sphi %s1571_s12, %s13_s12  }
   0x2   : > { %p138_p1 = scmp.lt.s32.totalorder %s1549_s12, 3 }
   0x4   : > { %p139_p2 = pnand %p1522_p0, %p138_p1 }
   0x5   : > { %s1523_s14 = sshll.u32 (!%p139_p2), %s1518_s13, 8 }
   0x6   : > { %142 = sbr.rel (%p139_p2) target bundleno = 277 (0x115), region = 32  ;;  %p163_p3 = scmp.lt.s32.totalorder (!%p139_p2), %s1523_s14, 511 }
   0xb   : > { %s2651_s14 = smov (!%p163_p3, %s1523_s14), 511  ;;  %v1582_v0 = vld [vmem:[%s2647_s1] ss:$0 sm:$0xff] }
   0xc   : > { %s1524_s17 = sshll.u32 %s2651_s14, 3  ;;  %v1592_v1 = vld [vmem:[%s2648_s2] ss:$0 sm:$0xff] }
   0xd   : > { %s1587_s20 = scalar_lea.vmem %s2646_s0, %s1524_s17  ;;  %s1615_s25 = scalar_lea.vmem %s2649_s3, %s1524_s17 }
   0xe   : > { %v174_v2 = vld [vmem:[%s1587_s20] sm:$0xff]  ;;  %v175_v3 = vld [vmem:[%s1587_s20 + $0x8] sm:$0xff]  ;;  %v176_v4 = vld [vmem:[%s1587_s20 + $0x10] sm:$0xff] }
   0xf   : > { %v434_v5 = vmul.f32 %v1582_v0, %v174_v2  ;;  %v435_v6 = vmul.f32 %v1582_v0, %v175_v3  ;;  %v436_v7 = vmul.f32 %v1582_v0, %v176_v4  ;;  %v177_v8 = vld [vmem:[%s1587_s20 + $0x18] sm:$0xff]  ;;  %v178_v9 = vld [vmem:[%s1587_s20 + $0x20] sm:$0xff]  ;;  %v179_v10 = vld [vmem:[%s1587_s20 + $0x28] sm:$0xff] }
  0x10   : > { %v437_v11 = vmul.f32 %v1582_v0, %v177_v8  ;;  %v438_v12 = vmul.f32 %v1582_v0, %v178_v9  ;;  %v439_v13 = vmul.f32 %v1582_v0, %v179_v10  ;;  %v180_v14 = vld [vmem:[%s1587_s20 + $0x30] sm:$0xff]  ;;  %v181_v15 = vld [vmem:[%s1587_s20 + $0x38] sm:$0xff]  ;;  %v182_v24 = vld [vmem:[%s1587_s20 + $0x40] sm:$0xff] }
  0x11   : > { %v694_v16 = vadd.f32 %v1592_v1, %v434_v5  ;;  %v695_v17 = vadd.f32 %v1592_v1, %v435_v6  ;;  %v696_v18 = vadd.f32 %v1592_v1, %v436_v7  ;;  %v440_v19 = vmul.f32 %v1582_v0, %v180_v14  ;;  %v183_v25 = vld [vmem:[%s1587_s20 + $0x48] sm:$0xff]  ;;  %v184_v26 = vld [vmem:[%s1587_s20 + $0x50] sm:$0xff]  ;;  %v185_v31 = vld [vmem:[%s1587_s20 + $0x58] sm:$0xff] }
  0x12   : > { %v697_v20 = vadd.f32 %v1592_v1, %v437_v11  ;;  %v698_v21 = vadd.f32 %v1592_v1, %v438_v12  ;;  %v699_v22 = vadd.f32 %v1592_v1, %v439_v13  ;;  %v441_v23 = vmul.f32 %v1582_v0, %v181_v15  ;;  %v186_v32 = vld [vmem:[%s1587_s20 + $0x60] sm:$0xff]  ;;  %v187_v33 = vld [vmem:[%s1587_s20 + $0x68] sm:$0xff]  ;;  %v188_v37 = vld [vmem:[%s1587_s20 + $0x70] sm:$0xff] }
  0x13   : > { %v950_v27 = vmax.f32 %v694_v16, 0.0  ;;  %v951_v28 = vmax.f32 %v695_v17, 0.0  ;;  %v952_v29 = vmax.f32 %v696_v18, 0.0  ;;  %v700_v30 = vadd.f32 %v1592_v1, %v440_v19  ;;  %v189_v42 = vld [vmem:[%s1587_s20 + $0x78] sm:$0xff]  ;;  %v190_v54 = vld [vmem:[%s1587_s20 + $0x80] sm:$0xff]  ;;  %v191_v55 = vld [vmem:[%s1587_s20 + $0x88] sm:$0xff] }
  0x14   : > { %v953_v34 = vmax.f32 %v697_v20, 0.0  ;;  %v954_v35 = vmax.f32 %v698_v21, 0.0  ;;  %v701_v36 = vadd.f32 %v1592_v1, %v441_v23  ;;  %v955_v38 = vmax.f32 %v699_v22, 0.0  ;;  %v192_v56 = vld [vmem:[%s1587_s20 + $0x90] sm:$0xff]  ;;  %v193_v59 = vld [vmem:[%s1587_s20 + $0x98] sm:$0xff]  ;;  %v194_v63 = vld [vmem:[%s1587_s20 + $0xa0] sm:$0xff] }
  0x15   : > { %1206 = vst [vmem:[%s1615_s25] sm:$0xff] %v950_v27  ;;  %v442_v39 = vmul.f32 %v1582_v0, %v182_v24  ;;  %v443_v40 = vmul.f32 %v1582_v0, %v183_v25  ;;  %v444_v41 = vmul.f32 %v1582_v0, %v184_v26  ;;  %v956_v43 = vmax.f32 %v700_v30, 0.0  ;;  %v195_v6 = vld [vmem:[%s1587_s20 + $0xa8] sm:$0xff]  ;;  %v196_v10 = vld [vmem:[%s1587_s20 + $0xb0] sm:$0xff]  ;;  %v197_v14 = vld [vmem:[%s1587_s20 + $0xb8] sm:$0xff] }
  0x16   : > { %1207 = vst [vmem:[%s1615_s25 + $0x8] sm:$0xff] %v951_v28  ;;  %v445_v44 = vmul.f32 %v1582_v0, %v185_v31  ;;  %v446_v45 = vmul.f32 %v1582_v0, %v186_v32  ;;  %v447_v46 = vmul.f32 %v1582_v0, %v187_v33  ;;  %v448_v50 = vmul.f32 %v1582_v0, %v188_v37  ;;  %v198_v18 = vld [vmem:[%s1587_s20 + $0xc0] sm:$0xff]  ;;  %v199_v22 = vld [vmem:[%s1587_s20 + $0xc8] sm:$0xff]  ;;  %v200_v26 = vld [vmem:[%s1587_s20 + $0xd0] sm:$0xff] }
  0x17   : > { %1208 = vst [vmem:[%s1615_s25 + $0x10] sm:$0xff] %v952_v29  ;;  %v702_v47 = vadd.f32 %v1592_v1, %v442_v39  ;;  %v703_v48 = vadd.f32 %v1592_v1, %v443_v40  ;;  %v704_v49 = vadd.f32 %v1592_v1, %v444_v41  ;;  %v957_v51 = vmax.f32 %v701_v36, 0.0  ;;  %v201_v30 = vld [vmem:[%s1587_s20 + $0xd8] sm:$0xff] }
  0x18   : > { %1209 = vst [vmem:[%s1615_s25 + $0x18] sm:$0xff] %v953_v34  ;;  %v705_v52 = vadd.f32 %v1592_v1, %v445_v44  ;;  %v449_v53 = vmul.f32 %v1582_v0, %v189_v42  ;;  %v706_v58 = vadd.f32 %v1592_v1, %v446_v45  ;;  %v707_v62 = vadd.f32 %v1592_v1, %v447_v46  ;;  %v202_v34 = vld [vmem:[%s1587_s20 + $0xe0] sm:$0xff]  ;;  %v204_v42 = vld [vmem:[%s1587_s20 + $0xf0] sm:$0xff]  ;;  %v205_v46 = vld [vmem:[%s1587_s20 + $0xf8] sm:$0xff] }
  0x19   : > { %1210 = vst [vmem:[%s1615_s25 + $0x20] sm:$0xff] %v954_v35  ;;  %v958_v57 = vmax.f32 %v702_v47, 0.0  ;;  %v959_v60 = vmax.f32 %v703_v48, 0.0  ;;  %v960_v61 = vmax.f32 %v704_v49, 0.0  ;;  %v708_v2 = vadd.f32 %v1592_v1, %v448_v50  ;;  %v206_v50 = vld [vmem:[%s1587_s20 + $0x100] sm:$0xff] }
  0x1a   : > { %1211 = vst [vmem:[%s1615_s25 + $0x28] sm:$0xff] %v955_v38  ;;  %v450_v3 = vmul.f32 %v1582_v0, %v190_v54  ;;  %v451_v4 = vmul.f32 %v1582_v0, %v191_v55  ;;  %v452_v5 = vmul.f32 %v1582_v0, %v192_v56  ;;  %v961_v7 = vmax.f32 %v705_v52, 0.0  ;;  %v203_v38 = vld [vmem:[%s1587_s20 + $0xe8] sm:$0xff] }
  0x1b   : > { %1212 = vst [vmem:[%s1615_s25 + $0x30] sm:$0xff] %v956_v43  ;;  %v709_v8 = vadd.f32 %v1592_v1, %v449_v53  ;;  %v453_v9 = vmul.f32 %v1582_v0, %v193_v59  ;;  %v962_v11 = vmax.f32 %v706_v58, 0.0  ;;  %v454_v13 = vmul.f32 %v1582_v0, %v194_v63  ;;  %v207_v54 = vld [vmem:[%s1587_s20 + $0x108] sm:$0xff]  ;;  %v208_v58 = vld [vmem:[%s1587_s20 + $0x110] sm:$0xff] }
  0x1c   : > { %1213 = vst [vmem:[%s1615_s25 + $0x38] sm:$0xff] %v957_v51  ;;  %v710_v12 = vadd.f32 %v1592_v1, %v450_v3  ;;  %v963_v15 = vmax.f32 %v707_v62, 0.0  ;;  %v711_v16 = vadd.f32 %v1592_v1, %v451_v4  ;;  %v455_v17 = vmul.f32 %v1582_v0, %v195_v6  ;;  %v209_v62 = vld [vmem:[%s1587_s20 + $0x118] sm:$0xff]  ;;  %v210_v4 = vld [vmem:[%s1587_s20 + $0x120] sm:$0xff] }
  0x1d   : > { %1214 = vst [vmem:[%s1615_s25 + $0x40] sm:$0xff] %v958_v57  ;;  %v964_v19 = vmax.f32 %v708_v2, 0.0  ;;  %v712_v20 = vadd.f32 %v1592_v1, %v452_v5  ;;  %v456_v21 = vmul.f32 %v1582_v0, %v196_v10  ;;  %v965_v23 = vmax.f32 %v709_v8, 0.0  ;;  %v211_v8 = vld [vmem:[%s1587_s20 + $0x128] sm:$0xff] }
  0x1e   : > { %1215 = vst [vmem:[%s1615_s25 + $0x48] sm:$0xff] %v959_v60  ;;  %v713_v24 = vadd.f32 %v1592_v1, %v453_v9  ;;  %v457_v25 = vmul.f32 %v1582_v0, %v197_v14  ;;  %v966_v27 = vmax.f32 %v710_v12, 0.0  ;;  %v714_v28 = vadd.f32 %v1592_v1, %v454_v13  ;;  %v212_v12 = vld [vmem:[%s1587_s20 + $0x130] sm:$0xff] }
  0x1f   : > { %1216 = vst [vmem:[%s1615_s25 + $0x50] sm:$0xff] %v960_v61  ;;  %v458_v29 = vmul.f32 %v1582_v0, %v198_v18  ;;  %v967_v31 = vmax.f32 %v711_v16, 0.0  ;;  %v715_v32 = vadd.f32 %v1592_v1, %v455_v17  ;;  %v459_v33 = vmul.f32 %v1582_v0, %v199_v22  ;;  %v213_v16 = vld [vmem:[%s1587_s20 + $0x138] sm:$0xff] }
  0x20   : > { %1217 = vst [vmem:[%s1615_s25 + $0x58] sm:$0xff] %v961_v7  ;;  %v968_v35 = vmax.f32 %v712_v20, 0.0  ;;  %v716_v36 = vadd.f32 %v1592_v1, %v456_v21  ;;  %v460_v37 = vmul.f32 %v1582_v0, %v200_v26  ;;  %v969_v39 = vmax.f32 %v713_v24, 0.0  ;;  %v214_v20 = vld [vmem:[%s1587_s20 + $0x140] sm:$0xff]  ;;  %v215_v24 = vld [vmem:[%s1587_s20 + $0x148] sm:$0xff] }
  0x21   : > { %1218 = vst [vmem:[%s1615_s25 + $0x60] sm:$0xff] %v962_v11  ;;  %v717_v40 = vadd.f32 %v1592_v1, %v457_v25  ;;  %v461_v41 = vmul.f32 %v1582_v0, %v201_v30  ;;  %v970_v43 = vmax.f32 %v714_v28, 0.0  ;;  %v718_v44 = vadd.f32 %v1592_v1, %v458_v29  ;;  %v216_v28 = vld [vmem:[%s1587_s20 + $0x150] sm:$0xff] }
  0x22   : > { %1219 = vst [vmem:[%s1615_s25 + $0x68] sm:$0xff] %v963_v15  ;;  %v462_v45 = vmul.f32 %v1582_v0, %v202_v34  ;;  %v971_v47 = vmax.f32 %v715_v32, 0.0  ;;  %v719_v48 = vadd.f32 %v1592_v1, %v459_v33  ;;  %v463_v49 = vmul.f32 %v1582_v0, %v203_v38  ;;  %v217_v32 = vld [vmem:[%s1587_s20 + $0x158] sm:$0xff] }
  0x23   : > { %1220 = vst [vmem:[%s1615_s25 + $0x70] sm:$0xff] %v964_v19  ;;  %v972_v51 = vmax.f32 %v716_v36, 0.0  ;;  %v720_v52 = vadd.f32 %v1592_v1, %v460_v37  ;;  %v464_v53 = vmul.f32 %v1582_v0, %v204_v42  ;;  %v973_v55 = vmax.f32 %v717_v40, 0.0  ;;  %v218_v36 = vld [vmem:[%s1587_s20 + $0x160] sm:$0xff]  ;;  %v219_v40 = vld [vmem:[%s1587_s20 + $0x168] sm:$0xff] }
  0x24   : > { %1221 = vst [vmem:[%s1615_s25 + $0x78] sm:$0xff] %v965_v23  ;;  %v721_v56 = vadd.f32 %v1592_v1, %v461_v41  ;;  %v465_v57 = vmul.f32 %v1582_v0, %v205_v46  ;;  %v974_v59 = vmax.f32 %v718_v44, 0.0  ;;  %v722_v60 = vadd.f32 %v1592_v1, %v462_v45  ;;  %v220_v44 = vld [vmem:[%s1587_s20 + $0x170] sm:$0xff] }
  0x25   : > { %1222 = vst [vmem:[%s1615_s25 + $0x80] sm:$0xff] %v966_v27  ;;  %v466_v61 = vmul.f32 %v1582_v0, %v206_v50  ;;  %v975_v63 = vmax.f32 %v719_v48, 0.0  ;;  %v723_v2 = vadd.f32 %v1592_v1, %v463_v49  ;;  %v467_v3 = vmul.f32 %v1582_v0, %v207_v54  ;;  %v221_v48 = vld [vmem:[%s1587_s20 + $0x178] sm:$0xff] }
  0x26   : > { %1223 = vst [vmem:[%s1615_s25 + $0x88] sm:$0xff] %v967_v31  ;;  %v976_v5 = vmax.f32 %v720_v52, 0.0  ;;  %v724_v6 = vadd.f32 %v1592_v1, %v464_v53  ;;  %v468_v7 = vmul.f32 %v1582_v0, %v208_v58  ;;  %v977_v9 = vmax.f32 %v721_v56, 0.0  ;;  %v222_v52 = vld [vmem:[%s1587_s20 + $0x180] sm:$0xff]  ;;  %v223_v56 = vld [vmem:[%s1587_s20 + $0x188] sm:$0xff] }
  0x27   : > { %1224 = vst [vmem:[%s1615_s25 + $0x90] sm:$0xff] %v968_v35  ;;  %v725_v10 = vadd.f32 %v1592_v1, %v465_v57  ;;  %v469_v11 = vmul.f32 %v1582_v0, %v209_v62  ;;  %v978_v13 = vmax.f32 %v722_v60, 0.0  ;;  %v726_v14 = vadd.f32 %v1592_v1, %v466_v61  ;;  %v224_v60 = vld [vmem:[%s1587_s20 + $0x190] sm:$0xff] }
  0x28   : > { %1225 = vst [vmem:[%s1615_s25 + $0x98] sm:$0xff] %v969_v39  ;;  %v470_v15 = vmul.f32 %v1582_v0, %v210_v4  ;;  %v979_v17 = vmax.f32 %v723_v2, 0.0  ;;  %v727_v18 = vadd.f32 %v1592_v1, %v467_v3  ;;  %v471_v19 = vmul.f32 %v1582_v0, %v211_v8  ;;  %v225_v2 = vld [vmem:[%s1587_s20 + $0x198] sm:$0xff] }
  0x29   : > { %1226 = vst [vmem:[%s1615_s25 + $0xa0] sm:$0xff] %v970_v43  ;;  %v980_v21 = vmax.f32 %v724_v6, 0.0  ;;  %v728_v22 = vadd.f32 %v1592_v1, %v468_v7  ;;  %v472_v23 = vmul.f32 %v1582_v0, %v212_v12  ;;  %v981_v25 = vmax.f32 %v725_v10, 0.0  ;;  %v226_v6 = vld [vmem:[%s1587_s20 + $0x1a0] sm:$0xff]  ;;  %v227_v10 = vld [vmem:[%s1587_s20 + $0x1a8] sm:$0xff] }
  0x2a   : > { %1227 = vst [vmem:[%s1615_s25 + $0xa8] sm:$0xff] %v971_v47  ;;  %v729_v26 = vadd.f32 %v1592_v1, %v469_v11  ;;  %v473_v27 = vmul.f32 %v1582_v0, %v213_v16  ;;  %v982_v29 = vmax.f32 %v726_v14, 0.0  ;;  %v730_v30 = vadd.f32 %v1592_v1, %v470_v15  ;;  %v228_v14 = vld [vmem:[%s1587_s20 + $0x1b0] sm:$0xff] }
  0x2b   : > { %1228 = vst [vmem:[%s1615_s25 + $0xb0] sm:$0xff] %v972_v51  ;;  %v474_v31 = vmul.f32 %v1582_v0, %v214_v20  ;;  %v983_v33 = vmax.f32 %v727_v18, 0.0  ;;  %v731_v34 = vadd.f32 %v1592_v1, %v471_v19  ;;  %v475_v35 = vmul.f32 %v1582_v0, %v215_v24  ;;  %v229_v18 = vld [vmem:[%s1587_s20 + $0x1b8] sm:$0xff] }
  0x2c   : > { %1229 = vst [vmem:[%s1615_s25 + $0xb8] sm:$0xff] %v973_v55  ;;  %v984_v37 = vmax.f32 %v728_v22, 0.0  ;;  %v732_v38 = vadd.f32 %v1592_v1, %v472_v23  ;;  %v476_v39 = vmul.f32 %v1582_v0, %v216_v28  ;;  %v985_v41 = vmax.f32 %v729_v26, 0.0  ;;  %v230_v22 = vld [vmem:[%s1587_s20 + $0x1c0] sm:$0xff]  ;;  %v231_v26 = vld [vmem:[%s1587_s20 + $0x1c8] sm:$0xff] }
  0x2d   : > { %1230 = vst [vmem:[%s1615_s25 + $0xc0] sm:$0xff] %v974_v59  ;;  %v733_v42 = vadd.f32 %v1592_v1, %v473_v27  ;;  %v477_v43 = vmul.f32 %v1582_v0, %v217_v32  ;;  %v986_v45 = vmax.f32 %v730_v30, 0.0  ;;  %v734_v46 = vadd.f32 %v1592_v1, %v474_v31  ;;  %v232_v30 = vld [vmem:[%s1587_s20 + $0x1d0] sm:$0xff] }
  0x2e   : > { %1231 = vst [vmem:[%s1615_s25 + $0xc8] sm:$0xff] %v975_v63  ;;  %v478_v47 = vmul.f32 %v1582_v0, %v218_v36  ;;  %v987_v49 = vmax.f32 %v731_v34, 0.0  ;;  %v735_v50 = vadd.f32 %v1592_v1, %v475_v35  ;;  %v479_v51 = vmul.f32 %v1582_v0, %v219_v40  ;;  %v233_v34 = vld [vmem:[%s1587_s20 + $0x1d8] sm:$0xff] }
  0x2f   : > { %1232 = vst [vmem:[%s1615_s25 + $0xd0] sm:$0xff] %v976_v5  ;;  %v988_v53 = vmax.f32 %v732_v38, 0.0  ;;  %v736_v54 = vadd.f32 %v1592_v1, %v476_v39  ;;  %v480_v55 = vmul.f32 %v1582_v0, %v220_v44  ;;  %v989_v57 = vmax.f32 %v733_v42, 0.0  ;;  %v234_v38 = vld [vmem:[%s1587_s20 + $0x1e0] sm:$0xff]  ;;  %v235_v42 = vld [vmem:[%s1587_s20 + $0x1e8] sm:$0xff] }
  0x30   : > { %1233 = vst [vmem:[%s1615_s25 + $0xd8] sm:$0xff] %v977_v9  ;;  %v737_v58 = vadd.f32 %v1592_v1, %v477_v43  ;;  %v481_v59 = vmul.f32 %v1582_v0, %v221_v48  ;;  %v990_v61 = vmax.f32 %v734_v46, 0.0  ;;  %v738_v62 = vadd.f32 %v1592_v1, %v478_v47  ;;  %v236_v46 = vld [vmem:[%s1587_s20 + $0x1f0] sm:$0xff] }
  0x31   : > { %1234 = vst [vmem:[%s1615_s25 + $0xe0] sm:$0xff] %v978_v13  ;;  %v482_v63 = vmul.f32 %v1582_v0, %v222_v52  ;;  %v991_v3 = vmax.f32 %v735_v50, 0.0  ;;  %v739_v4 = vadd.f32 %v1592_v1, %v479_v51  ;;  %v483_v5 = vmul.f32 %v1582_v0, %v223_v56  ;;  %v237_v50 = vld [vmem:[%s1587_s20 + $0x1f8] sm:$0xff] }
  0x32   : > { %1235 = vst [vmem:[%s1615_s25 + $0xe8] sm:$0xff] %v979_v17  ;;  %v992_v7 = vmax.f32 %v736_v54, 0.0  ;;  %v740_v8 = vadd.f32 %v1592_v1, %v480_v55  ;;  %v484_v9 = vmul.f32 %v1582_v0, %v224_v60  ;;  %v993_v11 = vmax.f32 %v737_v58, 0.0  ;;  %v238_v54 = vld [vmem:[%s1587_s20 + $0x200] sm:$0xff]  ;;  %v239_v58 = vld [vmem:[%s1587_s20 + $0x208] sm:$0xff] }
  0x33   : > { %1236 = vst [vmem:[%s1615_s25 + $0xf0] sm:$0xff] %v980_v21  ;;  %v741_v12 = vadd.f32 %v1592_v1, %v481_v59  ;;  %v485_v13 = vmul.f32 %v1582_v0, %v225_v2  ;;  %v994_v15 = vmax.f32 %v738_v62, 0.0  ;;  %v742_v16 = vadd.f32 %v1592_v1, %v482_v63  ;;  %v240_v62 = vld [vmem:[%s1587_s20 + $0x210] sm:$0xff] }
  0x34   : > { %1237 = vst [vmem:[%s1615_s25 + $0xf8] sm:$0xff] %v981_v25  ;;  %v486_v17 = vmul.f32 %v1582_v0, %v226_v6  ;;  %v995_v19 = vmax.f32 %v739_v4, 0.0  ;;  %v743_v20 = vadd.f32 %v1592_v1, %v483_v5  ;;  %v487_v21 = vmul.f32 %v1582_v0, %v227_v10  ;;  %v241_v4 = vld [vmem:[%s1587_s20 + $0x218] sm:$0xff] }
  0x35   : > { %1238 = vst [vmem:[%s1615_s25 + $0x100] sm:$0xff] %v982_v29  ;;  %v996_v23 = vmax.f32 %v740_v8, 0.0  ;;  %v744_v24 = vadd.f32 %v1592_v1, %v484_v9  ;;  %v488_v25 = vmul.f32 %v1582_v0, %v228_v14  ;;  %v997_v27 = vmax.f32 %v741_v12, 0.0  ;;  %v242_v8 = vld [vmem:[%s1587_s20 + $0x220] sm:$0xff]  ;;  %v243_v12 = vld [vmem:[%s1587_s20 + $0x228] sm:$0xff] }
  0x36   : > { %1239 = vst [vmem:[%s1615_s25 + $0x108] sm:$0xff] %v983_v33  ;;  %v745_v28 = vadd.f32 %v1592_v1, %v485_v13  ;;  %v489_v29 = vmul.f32 %v1582_v0, %v229_v18  ;;  %v998_v31 = vmax.f32 %v742_v16, 0.0  ;;  %v746_v32 = vadd.f32 %v1592_v1, %v486_v17  ;;  %v244_v16 = vld [vmem:[%s1587_s20 + $0x230] sm:$0xff] }
  0x37   : > { %1240 = vst [vmem:[%s1615_s25 + $0x110] sm:$0xff] %v984_v37  ;;  %v490_v33 = vmul.f32 %v1582_v0, %v230_v22  ;;  %v999_v35 = vmax.f32 %v743_v20, 0.0  ;;  %v747_v36 = vadd.f32 %v1592_v1, %v487_v21  ;;  %v491_v37 = vmul.f32 %v1582_v0, %v231_v26  ;;  %v245_v20 = vld [vmem:[%s1587_s20 + $0x238] sm:$0xff] }
  0x38   : > { %1241 = vst [vmem:[%s1615_s25 + $0x118] sm:$0xff] %v985_v41  ;;  %v1000_v39 = vmax.f32 %v744_v24, 0.0  ;;  %v748_v40 = vadd.f32 %v1592_v1, %v488_v25  ;;  %v492_v41 = vmul.f32 %v1582_v0, %v232_v30  ;;  %v1001_v43 = vmax.f32 %v745_v28, 0.0  ;;  %v246_v24 = vld [vmem:[%s1587_s20 + $0x240] sm:$0xff]  ;;  %v247_v28 = vld [vmem:[%s1587_s20 + $0x248] sm:$0xff] }
  0x39   : > { %1242 = vst [vmem:[%s1615_s25 + $0x120] sm:$0xff] %v986_v45  ;;  %v749_v44 = vadd.f32 %v1592_v1, %v489_v29  ;;  %v493_v45 = vmul.f32 %v1582_v0, %v233_v34  ;;  %v1002_v47 = vmax.f32 %v746_v32, 0.0  ;;  %v750_v48 = vadd.f32 %v1592_v1, %v490_v33  ;;  %v248_v32 = vld [vmem:[%s1587_s20 + $0x250] sm:$0xff] }
  0x3a   : > { %1243 = vst [vmem:[%s1615_s25 + $0x128] sm:$0xff] %v987_v49  ;;  %v494_v49 = vmul.f32 %v1582_v0, %v234_v38  ;;  %v1003_v51 = vmax.f32 %v747_v36, 0.0  ;;  %v751_v52 = vadd.f32 %v1592_v1, %v491_v37  ;;  %v1004_v55 = vmax.f32 %v748_v40, 0.0  ;;  %v249_v36 = vld [vmem:[%s1587_s20 + $0x258] sm:$0xff]  ;;  %v250_v40 = vld [vmem:[%s1587_s20 + $0x260] sm:$0xff] }
  0x3b   : > { %1244 = vst [vmem:[%s1615_s25 + $0x130] sm:$0xff] %v988_v53  ;;  %v495_v53 = vmul.f32 %v1582_v0, %v235_v42  ;;  %v752_v56 = vadd.f32 %v1592_v1, %v492_v41  ;;  %v1005_v59 = vmax.f32 %v749_v44, 0.0  ;;  %v753_v60 = vadd.f32 %v1592_v1, %v493_v45  ;;  %v251_v44 = vld [vmem:[%s1587_s20 + $0x268] sm:$0xff] }
  0x3c   : > { %1245 = vst [vmem:[%s1615_s25 + $0x138] sm:$0xff] %v989_v57  ;;  %v496_v57 = vmul.f32 %v1582_v0, %v236_v46  ;;  %v1006_v63 = vmax.f32 %v750_v48, 0.0  ;;  %v754_v2 = vadd.f32 %v1592_v1, %v494_v49  ;;  %v1007_v5 = vmax.f32 %v751_v52, 0.0  ;;  %v252_v48 = vld [vmem:[%s1587_s20 + $0x270] sm:$0xff]  ;;  %v253_v52 = vld [vmem:[%s1587_s20 + $0x278] sm:$0xff] }
  0x3d   : > { %1246 = vst [vmem:[%s1615_s25 + $0x140] sm:$0xff] %v990_v61  ;;  %v497_v61 = vmul.f32 %v1582_v0, %v237_v50  ;;  %v755_v6 = vadd.f32 %v1592_v1, %v495_v53  ;;  %v1008_v9 = vmax.f32 %v752_v56, 0.0  ;;  %v1009_v13 = vmax.f32 %v753_v60, 0.0  ;;  %v254_v56 = vld [vmem:[%s1587_s20 + $0x280] sm:$0xff]  ;;  %v255_v60 = vld [vmem:[%s1587_s20 + $0x288] sm:$0xff] }
  0x3e   : > { %1247 = vst [vmem:[%s1615_s25 + $0x148] sm:$0xff] %v991_v3  ;;  %v498_v3 = vmul.f32 %v1582_v0, %v238_v54  ;;  %v756_v10 = vadd.f32 %v1592_v1, %v496_v57  ;;  %v1010_v17 = vmax.f32 %v754_v2, 0.0  ;;  %v256_v2 = vld [vmem:[%s1587_s20 + $0x290] sm:$0xff] }
  0x3f   : > { %1248 = vst [vmem:[%s1615_s25 + $0x150] sm:$0xff] %v992_v7  ;;  %v499_v7 = vmul.f32 %v1582_v0, %v239_v58  ;;  %v757_v14 = vadd.f32 %v1592_v1, %v497_v61  ;;  %v1011_v21 = vmax.f32 %v755_v6, 0.0  ;;  %v257_v6 = vld [vmem:[%s1587_s20 + $0x298] sm:$0xff] }
  0x40   : > { %1249 = vst [vmem:[%s1615_s25 + $0x158] sm:$0xff] %v993_v11  ;;  %v500_v11 = vmul.f32 %v1582_v0, %v240_v62  ;;  %v758_v18 = vadd.f32 %v1592_v1, %v498_v3  ;;  %v1012_v25 = vmax.f32 %v756_v10, 0.0  ;;  %v258_v10 = vld [vmem:[%s1587_s20 + $0x2a0] sm:$0xff] }
  0x41   : > { %1250 = vst [vmem:[%s1615_s25 + $0x160] sm:$0xff] %v994_v15  ;;  %v501_v15 = vmul.f32 %v1582_v0, %v241_v4  ;;  %v759_v22 = vadd.f32 %v1592_v1, %v499_v7  ;;  %v1013_v29 = vmax.f32 %v757_v14, 0.0  ;;  %v259_v14 = vld [vmem:[%s1587_s20 + $0x2a8] sm:$0xff] }
  0x42   : > { %1251 = vst [vmem:[%s1615_s25 + $0x168] sm:$0xff] %v995_v19  ;;  %v502_v19 = vmul.f32 %v1582_v0, %v242_v8  ;;  %v760_v26 = vadd.f32 %v1592_v1, %v500_v11  ;;  %v1014_v33 = vmax.f32 %v758_v18, 0.0  ;;  %v260_v18 = vld [vmem:[%s1587_s20 + $0x2b0] sm:$0xff] }
  0x43   : > { %1252 = vst [vmem:[%s1615_s25 + $0x170] sm:$0xff] %v996_v23  ;;  %v503_v23 = vmul.f32 %v1582_v0, %v243_v12  ;;  %v761_v30 = vadd.f32 %v1592_v1, %v501_v15  ;;  %v1015_v37 = vmax.f32 %v759_v22, 0.0  ;;  %v261_v22 = vld [vmem:[%s1587_s20 + $0x2b8] sm:$0xff] }
  0x44   : > { %1253 = vst [vmem:[%s1615_s25 + $0x178] sm:$0xff] %v997_v27  ;;  %v504_v27 = vmul.f32 %v1582_v0, %v244_v16  ;;  %v762_v34 = vadd.f32 %v1592_v1, %v502_v19  ;;  %v1016_v41 = vmax.f32 %v760_v26, 0.0  ;;  %v262_v26 = vld [vmem:[%s1587_s20 + $0x2c0] sm:$0xff] }
  0x45   : > { %1254 = vst [vmem:[%s1615_s25 + $0x180] sm:$0xff] %v998_v31  ;;  %v505_v31 = vmul.f32 %v1582_v0, %v245_v20  ;;  %v763_v38 = vadd.f32 %v1592_v1, %v503_v23  ;;  %v1017_v45 = vmax.f32 %v761_v30, 0.0  ;;  %v263_v30 = vld [vmem:[%s1587_s20 + $0x2c8] sm:$0xff] }
  0x46   : > { %1255 = vst [vmem:[%s1615_s25 + $0x188] sm:$0xff] %v999_v35  ;;  %v506_v35 = vmul.f32 %v1582_v0, %v246_v24  ;;  %v764_v42 = vadd.f32 %v1592_v1, %v504_v27  ;;  %v1018_v49 = vmax.f32 %v762_v34, 0.0  ;;  %v264_v34 = vld [vmem:[%s1587_s20 + $0x2d0] sm:$0xff] }
  0x47   : > { %1256 = vst [vmem:[%s1615_s25 + $0x190] sm:$0xff] %v1000_v39  ;;  %v507_v39 = vmul.f32 %v1582_v0, %v247_v28  ;;  %v765_v46 = vadd.f32 %v1592_v1, %v505_v31  ;;  %v1019_v53 = vmax.f32 %v763_v38, 0.0  ;;  %v265_v38 = vld [vmem:[%s1587_s20 + $0x2d8] sm:$0xff] }
  0x48   : > { %1257 = vst [vmem:[%s1615_s25 + $0x198] sm:$0xff] %v1001_v43  ;;  %v508_v43 = vmul.f32 %v1582_v0, %v248_v32  ;;  %v766_v50 = vadd.f32 %v1592_v1, %v506_v35  ;;  %v1020_v57 = vmax.f32 %v764_v42, 0.0  ;;  %v266_v42 = vld [vmem:[%s1587_s20 + $0x2e0] sm:$0xff] }
  0x49   : > { %1258 = vst [vmem:[%s1615_s25 + $0x1a0] sm:$0xff] %v1002_v47  ;;  %v509_v47 = vmul.f32 %v1582_v0, %v249_v36  ;;  %v767_v54 = vadd.f32 %v1592_v1, %v507_v39  ;;  %v1021_v61 = vmax.f32 %v765_v46, 0.0  ;;  %v267_v46 = vld [vmem:[%s1587_s20 + $0x2e8] sm:$0xff] }
  0x4a   : > { %1259 = vst [vmem:[%s1615_s25 + $0x1a8] sm:$0xff] %v1003_v51  ;;  %v510_v51 = vmul.f32 %v1582_v0, %v250_v40  ;;  %v768_v58 = vadd.f32 %v1592_v1, %v508_v43  ;;  %v1022_v3 = vmax.f32 %v766_v50, 0.0  ;;  %v268_v50 = vld [vmem:[%s1587_s20 + $0x2f0] sm:$0xff] }
  0x4b   : > { %1260 = vst [vmem:[%s1615_s25 + $0x1b0] sm:$0xff] %v1004_v55  ;;  %v511_v55 = vmul.f32 %v1582_v0, %v251_v44  ;;  %v769_v62 = vadd.f32 %v1592_v1, %v509_v47  ;;  %v1023_v7 = vmax.f32 %v767_v54, 0.0  ;;  %v269_v54 = vld [vmem:[%s1587_s20 + $0x2f8] sm:$0xff] }
  0x4c   : > { %1261 = vst [vmem:[%s1615_s25 + $0x1b8] sm:$0xff] %v1005_v59  ;;  %v512_v59 = vmul.f32 %v1582_v0, %v252_v48  ;;  %v770_v4 = vadd.f32 %v1592_v1, %v510_v51  ;;  %v1024_v11 = vmax.f32 %v768_v58, 0.0  ;;  %v270_v58 = vld [vmem:[%s1587_s20 + $0x300] sm:$0xff] }
  0x4d   : > { %1262 = vst [vmem:[%s1615_s25 + $0x1c0] sm:$0xff] %v1006_v63  ;;  %v513_v63 = vmul.f32 %v1582_v0, %v253_v52  ;;  %v771_v8 = vadd.f32 %v1592_v1, %v511_v55  ;;  %v1025_v15 = vmax.f32 %v769_v62, 0.0  ;;  %v271_v62 = vld [vmem:[%s1587_s20 + $0x308] sm:$0xff] }
  0x4e   : > { %1263 = vst [vmem:[%s1615_s25 + $0x1c8] sm:$0xff] %v1007_v5  ;;  %v514_v5 = vmul.f32 %v1582_v0, %v254_v56  ;;  %v772_v12 = vadd.f32 %v1592_v1, %v512_v59  ;;  %v1026_v19 = vmax.f32 %v770_v4, 0.0  ;;  %v272_v4 = vld [vmem:[%s1587_s20 + $0x310] sm:$0xff] }
  0x4f   : > { %1264 = vst [vmem:[%s1615_s25 + $0x1d0] sm:$0xff] %v1008_v9  ;;  %v515_v9 = vmul.f32 %v1582_v0, %v255_v60  ;;  %v773_v16 = vadd.f32 %v1592_v1, %v513_v63  ;;  %v1027_v23 = vmax.f32 %v771_v8, 0.0  ;;  %v273_v8 = vld [vmem:[%s1587_s20 + $0x318] sm:$0xff] }
  0x50   : > { %1265 = vst [vmem:[%s1615_s25 + $0x1d8] sm:$0xff] %v1009_v13  ;;  %v516_v13 = vmul.f32 %v1582_v0, %v256_v2  ;;  %v774_v20 = vadd.f32 %v1592_v1, %v514_v5  ;;  %v1028_v27 = vmax.f32 %v772_v12, 0.0  ;;  %v274_v12 = vld [vmem:[%s1587_s20 + $0x320] sm:$0xff] }
  0x51   : > { %1266 = vst [vmem:[%s1615_s25 + $0x1e0] sm:$0xff] %v1010_v17  ;;  %v517_v17 = vmul.f32 %v1582_v0, %v257_v6  ;;  %v775_v24 = vadd.f32 %v1592_v1, %v515_v9  ;;  %v1029_v31 = vmax.f32 %v773_v16, 0.0  ;;  %v275_v16 = vld [vmem:[%s1587_s20 + $0x328] sm:$0xff] }
  0x52   : > { %1267 = vst [vmem:[%s1615_s25 + $0x1e8] sm:$0xff] %v1011_v21  ;;  %v518_v21 = vmul.f32 %v1582_v0, %v258_v10  ;;  %v776_v28 = vadd.f32 %v1592_v1, %v516_v13  ;;  %v1030_v35 = vmax.f32 %v774_v20, 0.0  ;;  %v276_v20 = vld [vmem:[%s1587_s20 + $0x330] sm:$0xff] }
  0x53   : > { %1268 = vst [vmem:[%s1615_s25 + $0x1f0] sm:$0xff] %v1012_v25  ;;  %v519_v25 = vmul.f32 %v1582_v0, %v259_v14  ;;  %v777_v32 = vadd.f32 %v1592_v1, %v517_v17  ;;  %v1031_v39 = vmax.f32 %v775_v24, 0.0  ;;  %v277_v24 = vld [vmem:[%s1587_s20 + $0x338] sm:$0xff] }
  0x54   : > { %1269 = vst [vmem:[%s1615_s25 + $0x1f8] sm:$0xff] %v1013_v29  ;;  %v520_v29 = vmul.f32 %v1582_v0, %v260_v18  ;;  %v778_v36 = vadd.f32 %v1592_v1, %v518_v21  ;;  %v1032_v43 = vmax.f32 %v776_v28, 0.0  ;;  %v278_v28 = vld [vmem:[%s1587_s20 + $0x340] sm:$0xff] }
  0x55   : > { %1270 = vst [vmem:[%s1615_s25 + $0x200] sm:$0xff] %v1014_v33  ;;  %v521_v33 = vmul.f32 %v1582_v0, %v261_v22  ;;  %v779_v40 = vadd.f32 %v1592_v1, %v519_v25  ;;  %v1033_v47 = vmax.f32 %v777_v32, 0.0  ;;  %v279_v32 = vld [vmem:[%s1587_s20 + $0x348] sm:$0xff] }
  0x56   : > { %1271 = vst [vmem:[%s1615_s25 + $0x208] sm:$0xff] %v1015_v37  ;;  %v522_v37 = vmul.f32 %v1582_v0, %v262_v26  ;;  %v780_v44 = vadd.f32 %v1592_v1, %v520_v29  ;;  %v1034_v51 = vmax.f32 %v778_v36, 0.0  ;;  %v280_v36 = vld [vmem:[%s1587_s20 + $0x350] sm:$0xff] }
  0x57   : > { %1272 = vst [vmem:[%s1615_s25 + $0x210] sm:$0xff] %v1016_v41  ;;  %v523_v41 = vmul.f32 %v1582_v0, %v263_v30  ;;  %v781_v48 = vadd.f32 %v1592_v1, %v521_v33  ;;  %v1035_v55 = vmax.f32 %v779_v40, 0.0  ;;  %v281_v40 = vld [vmem:[%s1587_s20 + $0x358] sm:$0xff] }
  0x58   : > { %1273 = vst [vmem:[%s1615_s25 + $0x218] sm:$0xff] %v1017_v45  ;;  %v524_v45 = vmul.f32 %v1582_v0, %v264_v34  ;;  %v782_v52 = vadd.f32 %v1592_v1, %v522_v37  ;;  %v1036_v59 = vmax.f32 %v780_v44, 0.0 }
  0x59   : > { %1274 = vst [vmem:[%s1615_s25 + $0x220] sm:$0xff] %v1018_v49  ;;  %v525_v49 = vmul.f32 %v1582_v0, %v265_v38  ;;  %v783_v56 = vadd.f32 %v1592_v1, %v523_v41  ;;  %v1037_v63 = vmax.f32 %v781_v48, 0.0  ;;  %v283_v48 = vld [vmem:[%s1587_s20 + $0x368] sm:$0xff] }
  0x5a   : > { %1275 = vst [vmem:[%s1615_s25 + $0x228] sm:$0xff] %v1019_v53  ;;  %v526_v53 = vmul.f32 %v1582_v0, %v266_v42  ;;  %v784_v60 = vadd.f32 %v1592_v1, %v524_v45  ;;  %v1038_v5 = vmax.f32 %v782_v52, 0.0  ;;  %v282_v45 = vld [vmem:[%s1587_s20 + $0x360] sm:$0xff]  ;;  %v284_v52 = vld [vmem:[%s1587_s20 + $0x370] sm:$0xff] }
  0x5b   : > { %1276 = vst [vmem:[%s1615_s25 + $0x230] sm:$0xff] %v1020_v57  ;;  %v527_v57 = vmul.f32 %v1582_v0, %v267_v46  ;;  %v785_v2 = vadd.f32 %v1592_v1, %v525_v49  ;;  %v1039_v9 = vmax.f32 %v783_v56, 0.0  ;;  %v285_v56 = vld [vmem:[%s1587_s20 + $0x378] sm:$0xff] }
  0x5c   : > { %1277 = vst [vmem:[%s1615_s25 + $0x238] sm:$0xff] %v1021_v61  ;;  %v528_v61 = vmul.f32 %v1582_v0, %v268_v50  ;;  %v786_v6 = vadd.f32 %v1592_v1, %v526_v53  ;;  %v1040_v13 = vmax.f32 %v784_v60, 0.0  ;;  %v286_v60 = vld [vmem:[%s1587_s20 + $0x380] sm:$0xff] }
  0x5d   : > { %1278 = vst [vmem:[%s1615_s25 + $0x240] sm:$0xff] %v1022_v3  ;;  %v529_v3 = vmul.f32 %v1582_v0, %v269_v54  ;;  %v787_v10 = vadd.f32 %v1592_v1, %v527_v57  ;;  %v1041_v17 = vmax.f32 %v785_v2, 0.0  ;;  %v287_v2 = vld [vmem:[%s1587_s20 + $0x388] sm:$0xff] }
  0x5e   : > { %1279 = vst [vmem:[%s1615_s25 + $0x248] sm:$0xff] %v1023_v7  ;;  %v530_v7 = vmul.f32 %v1582_v0, %v270_v58  ;;  %v788_v14 = vadd.f32 %v1592_v1, %v528_v61  ;;  %v1042_v21 = vmax.f32 %v786_v6, 0.0  ;;  %v288_v6 = vld [vmem:[%s1587_s20 + $0x390] sm:$0xff] }
  0x5f   : > { %1280 = vst [vmem:[%s1615_s25 + $0x250] sm:$0xff] %v1024_v11  ;;  %v531_v11 = vmul.f32 %v1582_v0, %v271_v62  ;;  %v789_v18 = vadd.f32 %v1592_v1, %v529_v3  ;;  %v1043_v25 = vmax.f32 %v787_v10, 0.0  ;;  %v289_v10 = vld [vmem:[%s1587_s20 + $0x398] sm:$0xff] }
  0x60   : > { %1281 = vst [vmem:[%s1615_s25 + $0x258] sm:$0xff] %v1025_v15  ;;  %v532_v15 = vmul.f32 %v1582_v0, %v272_v4  ;;  %v790_v22 = vadd.f32 %v1592_v1, %v530_v7  ;;  %v1044_v29 = vmax.f32 %v788_v14, 0.0  ;;  %v290_v14 = vld [vmem:[%s1587_s20 + $0x3a0] sm:$0xff] }
  0x61   : > { %1282 = vst [vmem:[%s1615_s25 + $0x260] sm:$0xff] %v1026_v19  ;;  %v533_v19 = vmul.f32 %v1582_v0, %v273_v8  ;;  %v791_v26 = vadd.f32 %v1592_v1, %v531_v11  ;;  %v1045_v33 = vmax.f32 %v789_v18, 0.0  ;;  %v291_v18 = vld [vmem:[%s1587_s20 + $0x3a8] sm:$0xff] }
  0x62   : > { %1283 = vst [vmem:[%s1615_s25 + $0x268] sm:$0xff] %v1027_v23  ;;  %v534_v23 = vmul.f32 %v1582_v0, %v274_v12  ;;  %v792_v30 = vadd.f32 %v1592_v1, %v532_v15  ;;  %v1046_v37 = vmax.f32 %v790_v22, 0.0  ;;  %v292_v22 = vld [vmem:[%s1587_s20 + $0x3b0] sm:$0xff] }
  0x63   : > { %1284 = vst [vmem:[%s1615_s25 + $0x270] sm:$0xff] %v1028_v27  ;;  %v535_v27 = vmul.f32 %v1582_v0, %v275_v16  ;;  %v793_v34 = vadd.f32 %v1592_v1, %v533_v19  ;;  %v1047_v41 = vmax.f32 %v791_v26, 0.0  ;;  %v293_v26 = vld [vmem:[%s1587_s20 + $0x3b8] sm:$0xff] }
  0x64   : > { %1285 = vst [vmem:[%s1615_s25 + $0x278] sm:$0xff] %v1029_v31  ;;  %v536_v31 = vmul.f32 %v1582_v0, %v276_v20  ;;  %v794_v38 = vadd.f32 %v1592_v1, %v534_v23  ;;  %v1048_v46 = vmax.f32 %v792_v30, 0.0  ;;  %v294_v30 = vld [vmem:[%s1587_s20 + $0x3c0] sm:$0xff] }
  0x65   : > { %1286 = vst [vmem:[%s1615_s25 + $0x280] sm:$0xff] %v1030_v35  ;;  %v537_v35 = vmul.f32 %v1582_v0, %v277_v24  ;;  %v795_v42 = vadd.f32 %v1592_v1, %v535_v27  ;;  %v1049_v49 = vmax.f32 %v793_v34, 0.0  ;;  %v295_v34 = vld [vmem:[%s1587_s20 + $0x3c8] sm:$0xff] }
  0x66   : > { %1287 = vst [vmem:[%s1615_s25 + $0x288] sm:$0xff] %v1031_v39  ;;  %v538_v39 = vmul.f32 %v1582_v0, %v278_v28  ;;  %v2019_v0 = vld [vmem:[%s2648_s2] ss:$0 sm:$0xff]  ;;  %v1050_v53 = vmax.f32 %v794_v38, 0.0  ;;  %v296_v38 = vld [vmem:[%s1587_s20 + $0x3d0] sm:$0xff] }
  0x67   : > { %1288 = vst [vmem:[%s1615_s25 + $0x290] sm:$0xff] %v1032_v43  ;;  %v2011_v43 = vld [vmem:[%s2647_s1] ss:$0 sm:$0xff]  ;;  %v797_v50 = vadd.f32 %v2019_v0, %v537_v35  ;;  %v1051_v57 = vmax.f32 %v795_v42, 0.0  ;;  %v297_v42 = vld [vmem:[%s1587_s20 + $0x3d8] sm:$0xff] }
  0x68   : > { %1289 = vst [vmem:[%s1615_s25 + $0x298] sm:$0xff] %v1033_v47  ;;  %v539_v44 = vmul.f32 %v2011_v43, %v279_v32  ;;  %v796_v47 = vadd.f32 %v2019_v0, %v536_v31  ;;  %v540_v1 = vmul.f32 %v2011_v43, %v280_v36  ;;  %v798_v54 = vadd.f32 %v2019_v0, %v538_v39 }
  0x69   : > { %1290 = vst [vmem:[%s1615_s25 + $0x2a0] sm:$0xff] %v1034_v51  ;;  %v541_v51 = vmul.f32 %v2011_v43, %v281_v40  ;;  %v1053_v3 = vmax.f32 %v797_v50, 0.0  ;;  %v299_v50 = vld [vmem:[%s1587_s20 + $0x3e8] sm:$0xff] }
  0x6a   : > { %1291 = vst [vmem:[%s1615_s25 + $0x2a8] sm:$0xff] %v1035_v55  ;;  %v542_v55 = vmul.f32 %v2011_v43, %v282_v45  ;;  %v799_v58 = vadd.f32 %v2019_v0, %v539_v44  ;;  %v1052_v61 = vmax.f32 %v796_v47, 0.0  ;;  %v800_v62 = vadd.f32 %v2019_v0, %v540_v1  ;;  %v298_v47 = vld [vmem:[%s1587_s20 + $0x3e0] sm:$0xff] }
  0x6b   : > { %1292 = vst [vmem:[%s1615_s25 + $0x2b0] sm:$0xff] %v1036_v59  ;;  %v543_v59 = vmul.f32 %v2011_v43, %v283_v48  ;;  %v801_v4 = vadd.f32 %v2019_v0, %v541_v51  ;;  %v1054_v7 = vmax.f32 %v798_v54, 0.0  ;;  %v300_v54 = vld [vmem:[%s1587_s20 + $0x3f0] sm:$0xff] }
  0x6c   : > { %1293 = vst [vmem:[%s1615_s25 + $0x2b8] sm:$0xff] %v1037_v63  ;;  %v544_v63 = vmul.f32 %v2011_v43, %v284_v52  ;;  %v802_v8 = vadd.f32 %v2019_v0, %v542_v55  ;;  %v1055_v11 = vmax.f32 %v799_v58, 0.0  ;;  %v1056_v15 = vmax.f32 %v800_v62, 0.0  ;;  %v301_v58 = vld [vmem:[%s1587_s20 + $0x3f8] sm:$0xff]  ;;  %v302_v62 = vld [vmem:[%s1587_s20 + $0x400] sm:$0xff] }
  0x6d   : > { %1294 = vst [vmem:[%s1615_s25 + $0x2c0] sm:$0xff] %v1038_v5  ;;  %v545_v5 = vmul.f32 %v2011_v43, %v285_v56  ;;  %v803_v12 = vadd.f32 %v2019_v0, %v543_v59  ;;  %v1057_v19 = vmax.f32 %v801_v4, 0.0  ;;  %v303_v4 = vld [vmem:[%s1587_s20 + $0x408] sm:$0xff] }
  0x6e   : > { %1295 = vst [vmem:[%s1615_s25 + $0x2c8] sm:$0xff] %v1039_v9  ;;  %v546_v9 = vmul.f32 %v2011_v43, %v286_v60  ;;  %v804_v16 = vadd.f32 %v2019_v0, %v544_v63  ;;  %v1058_v23 = vmax.f32 %v802_v8, 0.0  ;;  %v304_v8 = vld [vmem:[%s1587_s20 + $0x410] sm:$0xff] }
  0x6f   : > { %1296 = vst [vmem:[%s1615_s25 + $0x2d0] sm:$0xff] %v1040_v13  ;;  %v547_v13 = vmul.f32 %v2011_v43, %v287_v2  ;;  %v805_v20 = vadd.f32 %v2019_v0, %v545_v5  ;;  %v1059_v27 = vmax.f32 %v803_v12, 0.0  ;;  %v305_v12 = vld [vmem:[%s1587_s20 + $0x418] sm:$0xff] }
  0x70   : > { %1297 = vst [vmem:[%s1615_s25 + $0x2d8] sm:$0xff] %v1041_v17  ;;  %v548_v17 = vmul.f32 %v2011_v43, %v288_v6  ;;  %v806_v24 = vadd.f32 %v2019_v0, %v546_v9  ;;  %v1060_v31 = vmax.f32 %v804_v16, 0.0  ;;  %v306_v16 = vld [vmem:[%s1587_s20 + $0x420] sm:$0xff] }
  0x71   : > { %1298 = vst [vmem:[%s1615_s25 + $0x2e0] sm:$0xff] %v1042_v21  ;;  %v549_v21 = vmul.f32 %v2011_v43, %v289_v10  ;;  %v807_v28 = vadd.f32 %v2019_v0, %v547_v13  ;;  %v1061_v35 = vmax.f32 %v805_v20, 0.0  ;;  %v307_v20 = vld [vmem:[%s1587_s20 + $0x428] sm:$0xff] }
  0x72   : > { %1299 = vst [vmem:[%s1615_s25 + $0x2e8] sm:$0xff] %v1043_v25  ;;  %v550_v25 = vmul.f32 %v2011_v43, %v290_v14  ;;  %v808_v32 = vadd.f32 %v2019_v0, %v548_v17  ;;  %v1062_v39 = vmax.f32 %v806_v24, 0.0  ;;  %v308_v24 = vld [vmem:[%s1587_s20 + $0x430] sm:$0xff] }
  0x73   : > { %1300 = vst [vmem:[%s1615_s25 + $0x2f0] sm:$0xff] %v1044_v29  ;;  %v551_v29 = vmul.f32 %v2011_v43, %v291_v18  ;;  %v809_v36 = vadd.f32 %v2019_v0, %v549_v21  ;;  %v1063_v44 = vmax.f32 %v807_v28, 0.0  ;;  %v309_v28 = vld [vmem:[%s1587_s20 + $0x438] sm:$0xff] }
  0x74   : > { %1301 = vst [vmem:[%s1615_s25 + $0x2f8] sm:$0xff] %v1045_v33  ;;  %v552_v33 = vmul.f32 %v2011_v43, %v292_v22  ;;  %v810_v40 = vadd.f32 %v2019_v0, %v550_v25  ;;  %v1064_v1 = vmax.f32 %v808_v32, 0.0  ;;  %v310_v32 = vld [vmem:[%s1587_s20 + $0x440] sm:$0xff] }
  0x75   : > { %1302 = vst [vmem:[%s1615_s25 + $0x300] sm:$0xff] %v1046_v37  ;;  %v553_v37 = vmul.f32 %v2011_v43, %v293_v26  ;;  %v811_v45 = vadd.f32 %v2019_v0, %v551_v29  ;;  %v1065_v51 = vmax.f32 %v809_v36, 0.0  ;;  %v311_v36 = vld [vmem:[%s1587_s20 + $0x448] sm:$0xff] }
  0x76   : > { %1303 = vst [vmem:[%s1615_s25 + $0x308] sm:$0xff] %v1047_v41  ;;  %v554_v41 = vmul.f32 %v2011_v43, %v294_v30  ;;  %v812_v48 = vadd.f32 %v2019_v0, %v552_v33  ;;  %v1066_v55 = vmax.f32 %v810_v40, 0.0  ;;  %v312_v40 = vld [vmem:[%s1587_s20 + $0x450] sm:$0xff] }
  0x77   : > { %1304 = vst [vmem:[%s1615_s25 + $0x310] sm:$0xff] %v1048_v46  ;;  %v555_v46 = vmul.f32 %v2011_v43, %v295_v34  ;;  %v813_v52 = vadd.f32 %v2019_v0, %v553_v37  ;;  %v1067_v59 = vmax.f32 %v811_v45, 0.0  ;;  %v313_v45 = vld [vmem:[%s1587_s20 + $0x458] sm:$0xff] }
  0x78   : > { %1305 = vst [vmem:[%s1615_s25 + $0x318] sm:$0xff] %v1049_v49  ;;  %v556_v49 = vmul.f32 %v2011_v43, %v296_v38  ;;  %v814_v56 = vadd.f32 %v2019_v0, %v554_v41  ;;  %v1068_v63 = vmax.f32 %v812_v48, 0.0  ;;  %v314_v48 = vld [vmem:[%s1587_s20 + $0x460] sm:$0xff] }
  0x79   : > { %1306 = vst [vmem:[%s1615_s25 + $0x320] sm:$0xff] %v1050_v53  ;;  %v557_v53 = vmul.f32 %v2011_v43, %v297_v42  ;;  %v815_v60 = vadd.f32 %v2019_v0, %v555_v46  ;;  %v1069_v5 = vmax.f32 %v813_v52, 0.0  ;;  %v315_v52 = vld [vmem:[%s1587_s20 + $0x468] sm:$0xff] }
  0x7a   : > { %1307 = vst [vmem:[%s1615_s25 + $0x328] sm:$0xff] %v1051_v57  ;;  %v558_v57 = vmul.f32 %v2011_v43, %v298_v47  ;;  %v816_v2 = vadd.f32 %v2019_v0, %v556_v49  ;;  %v1070_v9 = vmax.f32 %v814_v56, 0.0  ;;  %v316_v56 = vld [vmem:[%s1587_s20 + $0x470] sm:$0xff] }
  0x7b   : > { %1308 = vst [vmem:[%s1615_s25 + $0x330] sm:$0xff] %v1052_v61  ;;  %v559_v61 = vmul.f32 %v2011_v43, %v299_v50  ;;  %v817_v6 = vadd.f32 %v2019_v0, %v557_v53  ;;  %v1071_v13 = vmax.f32 %v815_v60, 0.0  ;;  %v317_v60 = vld [vmem:[%s1587_s20 + $0x478] sm:$0xff] }
  0x7c   : > { %1309 = vst [vmem:[%s1615_s25 + $0x338] sm:$0xff] %v1053_v3  ;;  %v560_v3 = vmul.f32 %v2011_v43, %v300_v54  ;;  %v818_v10 = vadd.f32 %v2019_v0, %v558_v57  ;;  %v1072_v17 = vmax.f32 %v816_v2, 0.0  ;;  %v318_v2 = vld [vmem:[%s1587_s20 + $0x480] sm:$0xff] }
  0x7d   : > { %1310 = vst [vmem:[%s1615_s25 + $0x340] sm:$0xff] %v1054_v7  ;;  %v561_v7 = vmul.f32 %v2011_v43, %v301_v58  ;;  %v819_v14 = vadd.f32 %v2019_v0, %v559_v61  ;;  %v1073_v21 = vmax.f32 %v817_v6, 0.0  ;;  %v319_v6 = vld [vmem:[%s1587_s20 + $0x488] sm:$0xff] }
  0x7e   : > { %1311 = vst [vmem:[%s1615_s25 + $0x348] sm:$0xff] %v1055_v11  ;;  %v562_v11 = vmul.f32 %v2011_v43, %v302_v62  ;;  %v820_v18 = vadd.f32 %v2019_v0, %v560_v3  ;;  %v1074_v25 = vmax.f32 %v818_v10, 0.0  ;;  %v320_v10 = vld [vmem:[%s1587_s20 + $0x490] sm:$0xff] }
  0x7f   : > { %1312 = vst [vmem:[%s1615_s25 + $0x350] sm:$0xff] %v1056_v15  ;;  %v563_v15 = vmul.f32 %v2011_v43, %v303_v4  ;;  %v821_v22 = vadd.f32 %v2019_v0, %v561_v7  ;;  %v1075_v29 = vmax.f32 %v819_v14, 0.0  ;;  %v321_v14 = vld [vmem:[%s1587_s20 + $0x498] sm:$0xff] }
  0x80   : > { %1313 = vst [vmem:[%s1615_s25 + $0x358] sm:$0xff] %v1057_v19  ;;  %v564_v19 = vmul.f32 %v2011_v43, %v304_v8  ;;  %v822_v26 = vadd.f32 %v2019_v0, %v562_v11  ;;  %v1076_v33 = vmax.f32 %v820_v18, 0.0  ;;  %v322_v18 = vld [vmem:[%s1587_s20 + $0x4a0] sm:$0xff] }
  0x81   : > { %1314 = vst [vmem:[%s1615_s25 + $0x360] sm:$0xff] %v1058_v23  ;;  %v565_v23 = vmul.f32 %v2011_v43, %v305_v12  ;;  %v823_v30 = vadd.f32 %v2019_v0, %v563_v15  ;;  %v1077_v37 = vmax.f32 %v821_v22, 0.0  ;;  %v323_v22 = vld [vmem:[%s1587_s20 + $0x4a8] sm:$0xff] }
  0x82   : > { %1315 = vst [vmem:[%s1615_s25 + $0x368] sm:$0xff] %v1059_v27  ;;  %v566_v27 = vmul.f32 %v2011_v43, %v306_v16  ;;  %v824_v34 = vadd.f32 %v2019_v0, %v564_v19  ;;  %v1078_v41 = vmax.f32 %v822_v26, 0.0  ;;  %v324_v26 = vld [vmem:[%s1587_s20 + $0x4b0] sm:$0xff] }
  0x83   : > { %1316 = vst [vmem:[%s1615_s25 + $0x370] sm:$0xff] %v1060_v31  ;;  %v567_v31 = vmul.f32 %v2011_v43, %v307_v20  ;;  %v825_v38 = vadd.f32 %v2019_v0, %v565_v23  ;;  %v1079_v46 = vmax.f32 %v823_v30, 0.0  ;;  %v325_v30 = vld [vmem:[%s1587_s20 + $0x4b8] sm:$0xff] }
  0x84   : > { %1317 = vst [vmem:[%s1615_s25 + $0x378] sm:$0xff] %v1061_v35  ;;  %v568_v35 = vmul.f32 %v2011_v43, %v308_v24  ;;  %v826_v42 = vadd.f32 %v2019_v0, %v566_v27  ;;  %v1080_v49 = vmax.f32 %v824_v34, 0.0  ;;  %v326_v34 = vld [vmem:[%s1587_s20 + $0x4c0] sm:$0xff] }
  0x85   : > { %1318 = vst [vmem:[%s1615_s25 + $0x380] sm:$0xff] %v1062_v39  ;;  %v569_v39 = vmul.f32 %v2011_v43, %v309_v28  ;;  %v827_v47 = vadd.f32 %v2019_v0, %v567_v31  ;;  %v1081_v53 = vmax.f32 %v825_v38, 0.0  ;;  %v327_v38 = vld [vmem:[%s1587_s20 + $0x4c8] sm:$0xff] }
  0x86   : > { %1319 = vst [vmem:[%s1615_s25 + $0x388] sm:$0xff] %v1063_v44  ;;  %v570_v44 = vmul.f32 %v2011_v43, %v310_v32  ;;  %v828_v50 = vadd.f32 %v2019_v0, %v568_v35  ;;  %v1082_v57 = vmax.f32 %v826_v42, 0.0  ;;  %v328_v42 = vld [vmem:[%s1587_s20 + $0x4d0] sm:$0xff] }
  0x87   : > { %1320 = vst [vmem:[%s1615_s25 + $0x390] sm:$0xff] %v1064_v1  ;;  %v571_v1 = vmul.f32 %v2011_v43, %v311_v36  ;;  %v829_v54 = vadd.f32 %v2019_v0, %v569_v39  ;;  %v1083_v61 = vmax.f32 %v827_v47, 0.0  ;;  %v329_v47 = vld [vmem:[%s1587_s20 + $0x4d8] sm:$0xff] }
  0x88   : > { %1321 = vst [vmem:[%s1615_s25 + $0x398] sm:$0xff] %v1065_v51  ;;  %v572_v51 = vmul.f32 %v2011_v43, %v312_v40  ;;  %v830_v58 = vadd.f32 %v2019_v0, %v570_v44  ;;  %v1084_v3 = vmax.f32 %v828_v50, 0.0  ;;  %v330_v50 = vld [vmem:[%s1587_s20 + $0x4e0] sm:$0xff] }
  0x89   : > { %1322 = vst [vmem:[%s1615_s25 + $0x3a0] sm:$0xff] %v1066_v55  ;;  %v573_v55 = vmul.f32 %v2011_v43, %v313_v45  ;;  %v831_v62 = vadd.f32 %v2019_v0, %v571_v1  ;;  %v1085_v7 = vmax.f32 %v829_v54, 0.0  ;;  %v331_v54 = vld [vmem:[%s1587_s20 + $0x4e8] sm:$0xff] }
  0x8a   : > { %1323 = vst [vmem:[%s1615_s25 + $0x3a8] sm:$0xff] %v1067_v59  ;;  %v574_v59 = vmul.f32 %v2011_v43, %v314_v48  ;;  %v832_v4 = vadd.f32 %v2019_v0, %v572_v51  ;;  %v1086_v11 = vmax.f32 %v830_v58, 0.0  ;;  %v332_v58 = vld [vmem:[%s1587_s20 + $0x4f0] sm:$0xff] }
  0x8b   : > { %1324 = vst [vmem:[%s1615_s25 + $0x3b0] sm:$0xff] %v1068_v63  ;;  %v575_v63 = vmul.f32 %v2011_v43, %v315_v52  ;;  %v833_v8 = vadd.f32 %v2019_v0, %v573_v55  ;;  %v1087_v15 = vmax.f32 %v831_v62, 0.0  ;;  %v333_v62 = vld [vmem:[%s1587_s20 + $0x4f8] sm:$0xff] }
  0x8c   : > { %1325 = vst [vmem:[%s1615_s25 + $0x3b8] sm:$0xff] %v1069_v5  ;;  %v576_v5 = vmul.f32 %v2011_v43, %v316_v56  ;;  %v834_v12 = vadd.f32 %v2019_v0, %v574_v59  ;;  %v1088_v19 = vmax.f32 %v832_v4, 0.0  ;;  %v334_v4 = vld [vmem:[%s1587_s20 + $0x500] sm:$0xff] }
  0x8d   : > { %1326 = vst [vmem:[%s1615_s25 + $0x3c0] sm:$0xff] %v1070_v9  ;;  %v577_v9 = vmul.f32 %v2011_v43, %v317_v60  ;;  %v835_v16 = vadd.f32 %v2019_v0, %v575_v63  ;;  %v1089_v23 = vmax.f32 %v833_v8, 0.0  ;;  %v335_v8 = vld [vmem:[%s1587_s20 + $0x508] sm:$0xff] }
  0x8e   : > { %1327 = vst [vmem:[%s1615_s25 + $0x3c8] sm:$0xff] %v1071_v13  ;;  %v578_v13 = vmul.f32 %v2011_v43, %v318_v2  ;;  %v836_v20 = vadd.f32 %v2019_v0, %v576_v5  ;;  %v1090_v27 = vmax.f32 %v834_v12, 0.0  ;;  %v336_v12 = vld [vmem:[%s1587_s20 + $0x510] sm:$0xff] }
  0x8f   : > { %1328 = vst [vmem:[%s1615_s25 + $0x3d0] sm:$0xff] %v1072_v17  ;;  %v579_v17 = vmul.f32 %v2011_v43, %v319_v6  ;;  %v837_v24 = vadd.f32 %v2019_v0, %v577_v9  ;;  %v1091_v31 = vmax.f32 %v835_v16, 0.0  ;;  %v337_v16 = vld [vmem:[%s1587_s20 + $0x518] sm:$0xff] }
  0x90   : > { %1329 = vst [vmem:[%s1615_s25 + $0x3d8] sm:$0xff] %v1073_v21  ;;  %v580_v21 = vmul.f32 %v2011_v43, %v320_v10  ;;  %v838_v28 = vadd.f32 %v2019_v0, %v578_v13  ;;  %v1092_v35 = vmax.f32 %v836_v20, 0.0  ;;  %v338_v20 = vld [vmem:[%s1587_s20 + $0x520] sm:$0xff] }
  0x91   : > { %1330 = vst [vmem:[%s1615_s25 + $0x3e0] sm:$0xff] %v1074_v25  ;;  %v581_v25 = vmul.f32 %v2011_v43, %v321_v14  ;;  %v839_v32 = vadd.f32 %v2019_v0, %v579_v17  ;;  %v1093_v39 = vmax.f32 %v837_v24, 0.0  ;;  %v339_v24 = vld [vmem:[%s1587_s20 + $0x528] sm:$0xff] }
  0x92   : > { %1331 = vst [vmem:[%s1615_s25 + $0x3e8] sm:$0xff] %v1075_v29  ;;  %v582_v29 = vmul.f32 %v2011_v43, %v322_v18  ;;  %v840_v36 = vadd.f32 %v2019_v0, %v580_v21  ;;  %v1094_v44 = vmax.f32 %v838_v28, 0.0  ;;  %v340_v28 = vld [vmem:[%s1587_s20 + $0x530] sm:$0xff] }
  0x93   : > { %1332 = vst [vmem:[%s1615_s25 + $0x3f0] sm:$0xff] %v1076_v33  ;;  %v583_v33 = vmul.f32 %v2011_v43, %v323_v22  ;;  %v841_v40 = vadd.f32 %v2019_v0, %v581_v25  ;;  %v1095_v1 = vmax.f32 %v839_v32, 0.0  ;;  %v341_v32 = vld [vmem:[%s1587_s20 + $0x538] sm:$0xff] }
  0x94   : > { %1333 = vst [vmem:[%s1615_s25 + $0x3f8] sm:$0xff] %v1077_v37  ;;  %v584_v37 = vmul.f32 %v2011_v43, %v324_v26  ;;  %v842_v45 = vadd.f32 %v2019_v0, %v582_v29  ;;  %v1096_v51 = vmax.f32 %v840_v36, 0.0  ;;  %v342_v36 = vld [vmem:[%s1587_s20 + $0x540] sm:$0xff] }
  0x95   : > { %1334 = vst [vmem:[%s1615_s25 + $0x400] sm:$0xff] %v1078_v41  ;;  %v585_v41 = vmul.f32 %v2011_v43, %v325_v30  ;;  %v843_v48 = vadd.f32 %v2019_v0, %v583_v33  ;;  %v1097_v55 = vmax.f32 %v841_v40, 0.0  ;;  %v343_v40 = vld [vmem:[%s1587_s20 + $0x548] sm:$0xff] }
  0x96   : > { %1335 = vst [vmem:[%s1615_s25 + $0x408] sm:$0xff] %v1079_v46  ;;  %v586_v46 = vmul.f32 %v2011_v43, %v326_v34  ;;  %v844_v52 = vadd.f32 %v2019_v0, %v584_v37  ;;  %v1098_v59 = vmax.f32 %v842_v45, 0.0  ;;  %v344_v45 = vld [vmem:[%s1587_s20 + $0x550] sm:$0xff] }
  0x97   : > { %1336 = vst [vmem:[%s1615_s25 + $0x410] sm:$0xff] %v1080_v49  ;;  %v587_v49 = vmul.f32 %v2011_v43, %v327_v38  ;;  %v845_v56 = vadd.f32 %v2019_v0, %v585_v41  ;;  %v1099_v63 = vmax.f32 %v843_v48, 0.0  ;;  %v345_v48 = vld [vmem:[%s1587_s20 + $0x558] sm:$0xff] }
  0x98   : > { %1337 = vst [vmem:[%s1615_s25 + $0x418] sm:$0xff] %v1081_v53  ;;  %v588_v53 = vmul.f32 %v2011_v43, %v328_v42  ;;  %v846_v60 = vadd.f32 %v2019_v0, %v586_v46  ;;  %v1100_v5 = vmax.f32 %v844_v52, 0.0  ;;  %v346_v52 = vld [vmem:[%s1587_s20 + $0x560] sm:$0xff] }
  0x99   : > { %1338 = vst [vmem:[%s1615_s25 + $0x420] sm:$0xff] %v1082_v57  ;;  %v589_v57 = vmul.f32 %v2011_v43, %v329_v47  ;;  %v847_v2 = vadd.f32 %v2019_v0, %v587_v49  ;;  %v1101_v9 = vmax.f32 %v845_v56, 0.0  ;;  %v347_v56 = vld [vmem:[%s1587_s20 + $0x568] sm:$0xff] }
  0x9a   : > { %1339 = vst [vmem:[%s1615_s25 + $0x428] sm:$0xff] %v1083_v61  ;;  %v590_v61 = vmul.f32 %v2011_v43, %v330_v50  ;;  %v848_v6 = vadd.f32 %v2019_v0, %v588_v53  ;;  %v1102_v13 = vmax.f32 %v846_v60, 0.0  ;;  %v348_v60 = vld [vmem:[%s1587_s20 + $0x570] sm:$0xff] }
  0x9b   : > { %1340 = vst [vmem:[%s1615_s25 + $0x430] sm:$0xff] %v1084_v3  ;;  %v591_v3 = vmul.f32 %v2011_v43, %v331_v54  ;;  %v849_v10 = vadd.f32 %v2019_v0, %v589_v57  ;;  %v1103_v17 = vmax.f32 %v847_v2, 0.0  ;;  %v349_v2 = vld [vmem:[%s1587_s20 + $0x578] sm:$0xff] }
  0x9c   : > { %1341 = vst [vmem:[%s1615_s25 + $0x438] sm:$0xff] %v1085_v7  ;;  %v592_v7 = vmul.f32 %v2011_v43, %v332_v58  ;;  %v850_v14 = vadd.f32 %v2019_v0, %v590_v61  ;;  %v1104_v21 = vmax.f32 %v848_v6, 0.0  ;;  %v350_v6 = vld [vmem:[%s1587_s20 + $0x580] sm:$0xff] }
  0x9d   : > { %1342 = vst [vmem:[%s1615_s25 + $0x440] sm:$0xff] %v1086_v11  ;;  %v593_v11 = vmul.f32 %v2011_v43, %v333_v62  ;;  %v851_v18 = vadd.f32 %v2019_v0, %v591_v3  ;;  %v1105_v25 = vmax.f32 %v849_v10, 0.0  ;;  %v351_v10 = vld [vmem:[%s1587_s20 + $0x588] sm:$0xff] }
  0x9e   : > { %1343 = vst [vmem:[%s1615_s25 + $0x448] sm:$0xff] %v1087_v15  ;;  %v594_v15 = vmul.f32 %v2011_v43, %v334_v4  ;;  %v852_v22 = vadd.f32 %v2019_v0, %v592_v7  ;;  %v1106_v29 = vmax.f32 %v850_v14, 0.0  ;;  %v352_v14 = vld [vmem:[%s1587_s20 + $0x590] sm:$0xff] }
  0x9f   : > { %1344 = vst [vmem:[%s1615_s25 + $0x450] sm:$0xff] %v1088_v19  ;;  %v595_v19 = vmul.f32 %v2011_v43, %v335_v8  ;;  %v853_v26 = vadd.f32 %v2019_v0, %v593_v11  ;;  %v1107_v33 = vmax.f32 %v851_v18, 0.0  ;;  %v353_v18 = vld [vmem:[%s1587_s20 + $0x598] sm:$0xff] }
  0xa0   : > { %1345 = vst [vmem:[%s1615_s25 + $0x458] sm:$0xff] %v1089_v23  ;;  %v596_v23 = vmul.f32 %v2011_v43, %v336_v12  ;;  %v854_v30 = vadd.f32 %v2019_v0, %v594_v15  ;;  %v1108_v37 = vmax.f32 %v852_v22, 0.0  ;;  %v354_v22 = vld [vmem:[%s1587_s20 + $0x5a0] sm:$0xff] }
  0xa1   : > { %1346 = vst [vmem:[%s1615_s25 + $0x460] sm:$0xff] %v1090_v27  ;;  %v597_v27 = vmul.f32 %v2011_v43, %v337_v16  ;;  %v855_v34 = vadd.f32 %v2019_v0, %v595_v19  ;;  %v1109_v41 = vmax.f32 %v853_v26, 0.0  ;;  %v355_v26 = vld [vmem:[%s1587_s20 + $0x5a8] sm:$0xff] }
  0xa2   : > { %1347 = vst [vmem:[%s1615_s25 + $0x468] sm:$0xff] %v1091_v31  ;;  %v598_v31 = vmul.f32 %v2011_v43, %v338_v20  ;;  %v856_v38 = vadd.f32 %v2019_v0, %v596_v23  ;;  %v1110_v46 = vmax.f32 %v854_v30, 0.0  ;;  %v356_v30 = vld [vmem:[%s1587_s20 + $0x5b0] sm:$0xff] }
  0xa3   : > { %1348 = vst [vmem:[%s1615_s25 + $0x470] sm:$0xff] %v1092_v35  ;;  %v599_v35 = vmul.f32 %v2011_v43, %v339_v24  ;;  %v857_v42 = vadd.f32 %v2019_v0, %v597_v27  ;;  %v1111_v49 = vmax.f32 %v855_v34, 0.0  ;;  %v357_v34 = vld [vmem:[%s1587_s20 + $0x5b8] sm:$0xff] }
  0xa4   : > { %1349 = vst [vmem:[%s1615_s25 + $0x478] sm:$0xff] %v1093_v39  ;;  %v600_v39 = vmul.f32 %v2011_v43, %v340_v28  ;;  %v858_v47 = vadd.f32 %v2019_v0, %v598_v31  ;;  %v1112_v53 = vmax.f32 %v856_v38, 0.0  ;;  %v358_v38 = vld [vmem:[%s1587_s20 + $0x5c0] sm:$0xff] }
  0xa5   : > { %1350 = vst [vmem:[%s1615_s25 + $0x480] sm:$0xff] %v1094_v44  ;;  %v601_v44 = vmul.f32 %v2011_v43, %v341_v32  ;;  %v859_v50 = vadd.f32 %v2019_v0, %v599_v35  ;;  %v1113_v57 = vmax.f32 %v857_v42, 0.0  ;;  %v359_v42 = vld [vmem:[%s1587_s20 + $0x5c8] sm:$0xff] }
  0xa6   : > { %1351 = vst [vmem:[%s1615_s25 + $0x488] sm:$0xff] %v1095_v1  ;;  %v602_v1 = vmul.f32 %v2011_v43, %v342_v36  ;;  %v860_v54 = vadd.f32 %v2019_v0, %v600_v39  ;;  %v1114_v61 = vmax.f32 %v858_v47, 0.0  ;;  %v360_v47 = vld [vmem:[%s1587_s20 + $0x5d0] sm:$0xff] }
  0xa7   : > { %1352 = vst [vmem:[%s1615_s25 + $0x490] sm:$0xff] %v1096_v51  ;;  %v603_v51 = vmul.f32 %v2011_v43, %v343_v40  ;;  %v861_v58 = vadd.f32 %v2019_v0, %v601_v44  ;;  %v1115_v3 = vmax.f32 %v859_v50, 0.0  ;;  %v361_v50 = vld [vmem:[%s1587_s20 + $0x5d8] sm:$0xff] }
  0xa8   : > { %1353 = vst [vmem:[%s1615_s25 + $0x498] sm:$0xff] %v1097_v55  ;;  %v604_v55 = vmul.f32 %v2011_v43, %v344_v45  ;;  %v862_v62 = vadd.f32 %v2019_v0, %v602_v1  ;;  %v1116_v7 = vmax.f32 %v860_v54, 0.0  ;;  %v362_v54 = vld [vmem:[%s1587_s20 + $0x5e0] sm:$0xff] }
  0xa9   : > { %1354 = vst [vmem:[%s1615_s25 + $0x4a0] sm:$0xff] %v1098_v59  ;;  %v605_v59 = vmul.f32 %v2011_v43, %v345_v48  ;;  %v863_v4 = vadd.f32 %v2019_v0, %v603_v51  ;;  %v1117_v11 = vmax.f32 %v861_v58, 0.0  ;;  %v363_v58 = vld [vmem:[%s1587_s20 + $0x5e8] sm:$0xff] }
  0xaa   : > { %1355 = vst [vmem:[%s1615_s25 + $0x4a8] sm:$0xff] %v1099_v63  ;;  %v606_v63 = vmul.f32 %v2011_v43, %v346_v52  ;;  %v864_v8 = vadd.f32 %v2019_v0, %v604_v55  ;;  %v1118_v15 = vmax.f32 %v862_v62, 0.0  ;;  %v364_v62 = vld [vmem:[%s1587_s20 + $0x5f0] sm:$0xff] }
  0xab   : > { %1356 = vst [vmem:[%s1615_s25 + $0x4b0] sm:$0xff] %v1100_v5  ;;  %v607_v5 = vmul.f32 %v2011_v43, %v347_v56  ;;  %v865_v12 = vadd.f32 %v2019_v0, %v605_v59  ;;  %v1119_v19 = vmax.f32 %v863_v4, 0.0  ;;  %v365_v4 = vld [vmem:[%s1587_s20 + $0x5f8] sm:$0xff] }
  0xac   : > { %1357 = vst [vmem:[%s1615_s25 + $0x4b8] sm:$0xff] %v1101_v9  ;;  %v608_v9 = vmul.f32 %v2011_v43, %v348_v60  ;;  %v866_v16 = vadd.f32 %v2019_v0, %v606_v63  ;;  %v1120_v23 = vmax.f32 %v864_v8, 0.0  ;;  %v366_v8 = vld [vmem:[%s1587_s20 + $0x600] sm:$0xff] }
  0xad   : > { %1358 = vst [vmem:[%s1615_s25 + $0x4c0] sm:$0xff] %v1102_v13  ;;  %v609_v13 = vmul.f32 %v2011_v43, %v349_v2  ;;  %v867_v20 = vadd.f32 %v2019_v0, %v607_v5  ;;  %v1121_v27 = vmax.f32 %v865_v12, 0.0  ;;  %v367_v12 = vld [vmem:[%s1587_s20 + $0x608] sm:$0xff] }
  0xae   : > { %1359 = vst [vmem:[%s1615_s25 + $0x4c8] sm:$0xff] %v1103_v17  ;;  %v610_v17 = vmul.f32 %v2011_v43, %v350_v6  ;;  %v868_v24 = vadd.f32 %v2019_v0, %v608_v9  ;;  %v1122_v31 = vmax.f32 %v866_v16, 0.0  ;;  %v368_v16 = vld [vmem:[%s1587_s20 + $0x610] sm:$0xff] }
  0xaf   : > { %1360 = vst [vmem:[%s1615_s25 + $0x4d0] sm:$0xff] %v1104_v21  ;;  %v611_v21 = vmul.f32 %v2011_v43, %v351_v10  ;;  %v869_v28 = vadd.f32 %v2019_v0, %v609_v13  ;;  %v1123_v35 = vmax.f32 %v867_v20, 0.0  ;;  %v369_v20 = vld [vmem:[%s1587_s20 + $0x618] sm:$0xff] }
  0xb0   : > { %1361 = vst [vmem:[%s1615_s25 + $0x4d8] sm:$0xff] %v1105_v25  ;;  %v612_v25 = vmul.f32 %v2011_v43, %v352_v14  ;;  %v870_v32 = vadd.f32 %v2019_v0, %v610_v17  ;;  %v1124_v39 = vmax.f32 %v868_v24, 0.0  ;;  %v370_v24 = vld [vmem:[%s1587_s20 + $0x620] sm:$0xff] }
  0xb1   : > { %1362 = vst [vmem:[%s1615_s25 + $0x4e0] sm:$0xff] %v1106_v29  ;;  %v613_v29 = vmul.f32 %v2011_v43, %v353_v18  ;;  %v871_v36 = vadd.f32 %v2019_v0, %v611_v21  ;;  %v1125_v44 = vmax.f32 %v869_v28, 0.0  ;;  %v371_v28 = vld [vmem:[%s1587_s20 + $0x628] sm:$0xff] }
  0xb2   : > { %1363 = vst [vmem:[%s1615_s25 + $0x4e8] sm:$0xff] %v1107_v33  ;;  %v614_v33 = vmul.f32 %v2011_v43, %v354_v22  ;;  %v872_v40 = vadd.f32 %v2019_v0, %v612_v25  ;;  %v1126_v1 = vmax.f32 %v870_v32, 0.0  ;;  %v372_v32 = vld [vmem:[%s1587_s20 + $0x630] sm:$0xff] }
  0xb3   : > { %1364 = vst [vmem:[%s1615_s25 + $0x4f0] sm:$0xff] %v1108_v37  ;;  %v615_v37 = vmul.f32 %v2011_v43, %v355_v26  ;;  %v873_v45 = vadd.f32 %v2019_v0, %v613_v29  ;;  %v1127_v51 = vmax.f32 %v871_v36, 0.0  ;;  %v373_v36 = vld [vmem:[%s1587_s20 + $0x638] sm:$0xff] }
  0xb4   : > { %1365 = vst [vmem:[%s1615_s25 + $0x4f8] sm:$0xff] %v1109_v41  ;;  %v616_v41 = vmul.f32 %v2011_v43, %v356_v30  ;;  %v874_v48 = vadd.f32 %v2019_v0, %v614_v33  ;;  %v1128_v55 = vmax.f32 %v872_v40, 0.0  ;;  %v374_v40 = vld [vmem:[%s1587_s20 + $0x640] sm:$0xff] }
  0xb5   : > { %1366 = vst [vmem:[%s1615_s25 + $0x500] sm:$0xff] %v1110_v46  ;;  %v617_v46 = vmul.f32 %v2011_v43, %v357_v34  ;;  %v875_v52 = vadd.f32 %v2019_v0, %v615_v37  ;;  %v1129_v59 = vmax.f32 %v873_v45, 0.0  ;;  %v375_v45 = vld [vmem:[%s1587_s20 + $0x648] sm:$0xff] }
  0xb6   : > { %1367 = vst [vmem:[%s1615_s25 + $0x508] sm:$0xff] %v1111_v49  ;;  %v618_v49 = vmul.f32 %v2011_v43, %v358_v38  ;;  %v876_v56 = vadd.f32 %v2019_v0, %v616_v41  ;;  %v1130_v63 = vmax.f32 %v874_v48, 0.0  ;;  %v376_v48 = vld [vmem:[%s1587_s20 + $0x650] sm:$0xff] }
  0xb7   : > { %1368 = vst [vmem:[%s1615_s25 + $0x510] sm:$0xff] %v1112_v53  ;;  %v619_v53 = vmul.f32 %v2011_v43, %v359_v42  ;;  %v877_v60 = vadd.f32 %v2019_v0, %v617_v46  ;;  %v1131_v5 = vmax.f32 %v875_v52, 0.0  ;;  %v377_v52 = vld [vmem:[%s1587_s20 + $0x658] sm:$0xff] }
  0xb8   : > { %1369 = vst [vmem:[%s1615_s25 + $0x518] sm:$0xff] %v1113_v57  ;;  %v620_v57 = vmul.f32 %v2011_v43, %v360_v47  ;;  %v878_v2 = vadd.f32 %v2019_v0, %v618_v49  ;;  %v1132_v9 = vmax.f32 %v876_v56, 0.0  ;;  %v378_v56 = vld [vmem:[%s1587_s20 + $0x660] sm:$0xff] }
  0xb9   : > { %1370 = vst [vmem:[%s1615_s25 + $0x520] sm:$0xff] %v1114_v61  ;;  %v621_v61 = vmul.f32 %v2011_v43, %v361_v50  ;;  %v879_v6 = vadd.f32 %v2019_v0, %v619_v53  ;;  %v1133_v13 = vmax.f32 %v877_v60, 0.0  ;;  %v379_v60 = vld [vmem:[%s1587_s20 + $0x668] sm:$0xff] }
  0xba   : > { %1371 = vst [vmem:[%s1615_s25 + $0x528] sm:$0xff] %v1115_v3  ;;  %v622_v3 = vmul.f32 %v2011_v43, %v362_v54  ;;  %v880_v10 = vadd.f32 %v2019_v0, %v620_v57  ;;  %v1134_v17 = vmax.f32 %v878_v2, 0.0  ;;  %v380_v2 = vld [vmem:[%s1587_s20 + $0x670] sm:$0xff] }
  0xbb   : > { %1372 = vst [vmem:[%s1615_s25 + $0x530] sm:$0xff] %v1116_v7  ;;  %v623_v7 = vmul.f32 %v2011_v43, %v363_v58  ;;  %v881_v14 = vadd.f32 %v2019_v0, %v621_v61  ;;  %v1135_v21 = vmax.f32 %v879_v6, 0.0  ;;  %v381_v6 = vld [vmem:[%s1587_s20 + $0x678] sm:$0xff] }
  0xbc   : > { %1373 = vst [vmem:[%s1615_s25 + $0x538] sm:$0xff] %v1117_v11  ;;  %v624_v11 = vmul.f32 %v2011_v43, %v364_v62  ;;  %v882_v18 = vadd.f32 %v2019_v0, %v622_v3  ;;  %v1136_v25 = vmax.f32 %v880_v10, 0.0  ;;  %v382_v10 = vld [vmem:[%s1587_s20 + $0x680] sm:$0xff] }
  0xbd   : > { %1374 = vst [vmem:[%s1615_s25 + $0x540] sm:$0xff] %v1118_v15  ;;  %v625_v15 = vmul.f32 %v2011_v43, %v365_v4  ;;  %v883_v22 = vadd.f32 %v2019_v0, %v623_v7  ;;  %v1137_v29 = vmax.f32 %v881_v14, 0.0  ;;  %v383_v14 = vld [vmem:[%s1587_s20 + $0x688] sm:$0xff] }
  0xbe   : > { %1375 = vst [vmem:[%s1615_s25 + $0x548] sm:$0xff] %v1119_v19  ;;  %v626_v19 = vmul.f32 %v2011_v43, %v366_v8  ;;  %v884_v26 = vadd.f32 %v2019_v0, %v624_v11  ;;  %v1138_v33 = vmax.f32 %v882_v18, 0.0  ;;  %v384_v18 = vld [vmem:[%s1587_s20 + $0x690] sm:$0xff] }
  0xbf   : > { %1376 = vst [vmem:[%s1615_s25 + $0x550] sm:$0xff] %v1120_v23  ;;  %v627_v23 = vmul.f32 %v2011_v43, %v367_v12  ;;  %v885_v30 = vadd.f32 %v2019_v0, %v625_v15  ;;  %v1139_v37 = vmax.f32 %v883_v22, 0.0 }
  0xc0   : > { %1377 = vst [vmem:[%s1615_s25 + $0x558] sm:$0xff] %v1121_v27  ;;  %v628_v27 = vmul.f32 %v2011_v43, %v368_v16  ;;  %v886_v34 = vadd.f32 %v2019_v0, %v626_v19  ;;  %v1140_v41 = vmax.f32 %v884_v26, 0.0  ;;  %v386_v26 = vld [vmem:[%s1587_s20 + $0x6a0] sm:$0xff] }
  0xc1   : > { %1378 = vst [vmem:[%s1615_s25 + $0x560] sm:$0xff] %v1122_v31  ;;  %v629_v31 = vmul.f32 %v2011_v43, %v369_v20  ;;  %v887_v38 = vadd.f32 %v2019_v0, %v627_v23  ;;  %v1141_v46 = vmax.f32 %v885_v30, 0.0  ;;  %v385_v23 = vld [vmem:[%s1587_s20 + $0x698] sm:$0xff]  ;;  %v387_v30 = vld [vmem:[%s1587_s20 + $0x6a8] sm:$0xff] }
  0xc2   : > { %1379 = vst [vmem:[%s1615_s25 + $0x568] sm:$0xff] %v1123_v35  ;;  %v630_v35 = vmul.f32 %v2011_v43, %v370_v24  ;;  %v888_v42 = vadd.f32 %v2019_v0, %v628_v27  ;;  %v1142_v49 = vmax.f32 %v886_v34, 0.0  ;;  %v388_v34 = vld [vmem:[%s1587_s20 + $0x6b0] sm:$0xff] }
  0xc3   : > { %1380 = vst [vmem:[%s1615_s25 + $0x570] sm:$0xff] %v1124_v39  ;;  %v631_v39 = vmul.f32 %v2011_v43, %v371_v28  ;;  %v889_v47 = vadd.f32 %v2019_v0, %v629_v31  ;;  %v1143_v53 = vmax.f32 %v887_v38, 0.0  ;;  %v389_v38 = vld [vmem:[%s1587_s20 + $0x6b8] sm:$0xff] }
  0xc4   : > { %1381 = vst [vmem:[%s1615_s25 + $0x578] sm:$0xff] %v1125_v44  ;;  %v632_v44 = vmul.f32 %v2011_v43, %v372_v32  ;;  %v890_v50 = vadd.f32 %v2019_v0, %v630_v35  ;;  %v1144_v57 = vmax.f32 %v888_v42, 0.0  ;;  %v390_v42 = vld [vmem:[%s1587_s20 + $0x6c0] sm:$0xff] }
  0xc5   : > { %1382 = vst [vmem:[%s1615_s25 + $0x580] sm:$0xff] %v1126_v1  ;;  %v633_v1 = vmul.f32 %v2011_v43, %v373_v36  ;;  %v891_v54 = vadd.f32 %v2019_v0, %v631_v39  ;;  %v1145_v61 = vmax.f32 %v889_v47, 0.0  ;;  %v391_v47 = vld [vmem:[%s1587_s20 + $0x6c8] sm:$0xff] }
  0xc6   : > { %1383 = vst [vmem:[%s1615_s25 + $0x588] sm:$0xff] %v1127_v51  ;;  %v634_v51 = vmul.f32 %v2011_v43, %v374_v40  ;;  %v892_v58 = vadd.f32 %v2019_v0, %v632_v44  ;;  %v1146_v3 = vmax.f32 %v890_v50, 0.0  ;;  %v392_v50 = vld [vmem:[%s1587_s20 + $0x6d0] sm:$0xff] }
  0xc7   : > { %1384 = vst [vmem:[%s1615_s25 + $0x590] sm:$0xff] %v1128_v55  ;;  %v635_v55 = vmul.f32 %v2011_v43, %v375_v45  ;;  %v893_v62 = vadd.f32 %v2019_v0, %v633_v1  ;;  %v1147_v7 = vmax.f32 %v891_v54, 0.0  ;;  %v393_v54 = vld [vmem:[%s1587_s20 + $0x6d8] sm:$0xff] }
  0xc8   : > { %1385 = vst [vmem:[%s1615_s25 + $0x598] sm:$0xff] %v1129_v59  ;;  %v636_v59 = vmul.f32 %v2011_v43, %v376_v48  ;;  %v894_v4 = vadd.f32 %v2019_v0, %v634_v51  ;;  %v1148_v11 = vmax.f32 %v892_v58, 0.0  ;;  %v394_v58 = vld [vmem:[%s1587_s20 + $0x6e0] sm:$0xff] }
  0xc9   : > { %1386 = vst [vmem:[%s1615_s25 + $0x5a0] sm:$0xff] %v1130_v63  ;;  %v637_v63 = vmul.f32 %v2011_v43, %v377_v52  ;;  %v895_v8 = vadd.f32 %v2019_v0, %v635_v55  ;;  %v1149_v15 = vmax.f32 %v893_v62, 0.0  ;;  %v395_v62 = vld [vmem:[%s1587_s20 + $0x6e8] sm:$0xff] }
  0xca   : > { %1387 = vst [vmem:[%s1615_s25 + $0x5a8] sm:$0xff] %v1131_v5  ;;  %v638_v5 = vmul.f32 %v2011_v43, %v378_v56  ;;  %v896_v12 = vadd.f32 %v2019_v0, %v636_v59  ;;  %v1150_v19 = vmax.f32 %v894_v4, 0.0  ;;  %v396_v4 = vld [vmem:[%s1587_s20 + $0x6f0] sm:$0xff] }
  0xcb   : > { %1388 = vst [vmem:[%s1615_s25 + $0x5b0] sm:$0xff] %v1132_v9  ;;  %v639_v9 = vmul.f32 %v2011_v43, %v379_v60  ;;  %v897_v16 = vadd.f32 %v2019_v0, %v637_v63  ;;  %v1151_v24 = vmax.f32 %v895_v8, 0.0  ;;  %v397_v8 = vld [vmem:[%s1587_s20 + $0x6f8] sm:$0xff] }
  0xcc   : > { %1389 = vst [vmem:[%s1615_s25 + $0x5b8] sm:$0xff] %v1133_v13  ;;  %v640_v13 = vmul.f32 %v2011_v43, %v380_v2  ;;  %v898_v20 = vadd.f32 %v2019_v0, %v638_v5  ;;  %v1152_v27 = vmax.f32 %v896_v12, 0.0  ;;  %v398_v12 = vld [vmem:[%s1587_s20 + $0x700] sm:$0xff] }
  0xcd   : > { %1390 = vst [vmem:[%s1615_s25 + $0x5c0] sm:$0xff] %v1134_v17  ;;  %v641_v17 = vmul.f32 %v2011_v43, %v381_v6  ;;  %v2441_v43 = vld [vmem:[%s2648_s2] ss:$0 sm:$0xff]  ;;  %v1153_v31 = vmax.f32 %v897_v16, 0.0  ;;  %v399_v16 = vld [vmem:[%s1587_s20 + $0x708] sm:$0xff] }
  0xce   : > { %1391 = vst [vmem:[%s1615_s25 + $0x5c8] sm:$0xff] %v1135_v21  ;;  %v2433_v21 = vld [vmem:[%s2647_s1] ss:$0 sm:$0xff]  ;;  %v900_v28 = vadd.f32 %v2441_v43, %v640_v13  ;;  %v1154_v35 = vmax.f32 %v898_v20, 0.0  ;;  %v400_v20 = vld [vmem:[%s1587_s20 + $0x710] sm:$0xff] }
  0xcf   : > { %1392 = vst [vmem:[%s1615_s25 + $0x5d0] sm:$0xff] %v1136_v25  ;;  %v642_v22 = vmul.f32 %v2433_v21, %v382_v10  ;;  %v899_v25 = vadd.f32 %v2441_v43, %v639_v9  ;;  %v643_v0 = vmul.f32 %v2433_v21, %v383_v14  ;;  %v901_v32 = vadd.f32 %v2441_v43, %v641_v17 }
  0xd0   : > { %1393 = vst [vmem:[%s1615_s25 + $0x5d8] sm:$0xff] %v1137_v29  ;;  %v644_v29 = vmul.f32 %v2433_v21, %v384_v18  ;;  %v1156_v44 = vmax.f32 %v900_v28, 0.0  ;;  %v402_v28 = vld [vmem:[%s1587_s20 + $0x720] sm:$0xff] }
  0xd1   : > { %1394 = vst [vmem:[%s1615_s25 + $0x5e0] sm:$0xff] %v1138_v33  ;;  %v645_v33 = vmul.f32 %v2433_v21, %v385_v23  ;;  %v902_v36 = vadd.f32 %v2441_v43, %v642_v22  ;;  %v1155_v39 = vmax.f32 %v899_v25, 0.0  ;;  %v903_v40 = vadd.f32 %v2441_v43, %v643_v0  ;;  %v401_v25 = vld [vmem:[%s1587_s20 + $0x718] sm:$0xff] }
  0xd2   : > { %1395 = vst [vmem:[%s1615_s25 + $0x5e8] sm:$0xff] %v1139_v37  ;;  %v646_v37 = vmul.f32 %v2433_v21, %v386_v26  ;;  %v904_v45 = vadd.f32 %v2441_v43, %v644_v29  ;;  %v1157_v1 = vmax.f32 %v901_v32, 0.0  ;;  %v403_v32 = vld [vmem:[%s1587_s20 + $0x728] sm:$0xff] }
  0xd3   : > { %1396 = vst [vmem:[%s1615_s25 + $0x5f0] sm:$0xff] %v1140_v41  ;;  %v647_v41 = vmul.f32 %v2433_v21, %v387_v30  ;;  %v905_v48 = vadd.f32 %v2441_v43, %v645_v33  ;;  %v1158_v51 = vmax.f32 %v902_v36, 0.0  ;;  %v1159_v55 = vmax.f32 %v903_v40, 0.0  ;;  %v404_v36 = vld [vmem:[%s1587_s20 + $0x730] sm:$0xff]  ;;  %v405_v40 = vld [vmem:[%s1587_s20 + $0x738] sm:$0xff] }
  0xd4   : > { %1397 = vst [vmem:[%s1615_s25 + $0x5f8] sm:$0xff] %v1141_v46  ;;  %v648_v46 = vmul.f32 %v2433_v21, %v388_v34  ;;  %v906_v52 = vadd.f32 %v2441_v43, %v646_v37  ;;  %v1160_v59 = vmax.f32 %v904_v45, 0.0  ;;  %v406_v45 = vld [vmem:[%s1587_s20 + $0x740] sm:$0xff] }
  0xd5   : > { %1398 = vst [vmem:[%s1615_s25 + $0x600] sm:$0xff] %v1142_v49  ;;  %v649_v49 = vmul.f32 %v2433_v21, %v389_v38  ;;  %v907_v56 = vadd.f32 %v2441_v43, %v647_v41  ;;  %v1161_v63 = vmax.f32 %v905_v48, 0.0  ;;  %v407_v48 = vld [vmem:[%s1587_s20 + $0x748] sm:$0xff] }
  0xd6   : > { %1399 = vst [vmem:[%s1615_s25 + $0x608] sm:$0xff] %v1143_v53  ;;  %v650_v53 = vmul.f32 %v2433_v21, %v390_v42  ;;  %v908_v60 = vadd.f32 %v2441_v43, %v648_v46  ;;  %v1162_v5 = vmax.f32 %v906_v52, 0.0  ;;  %v408_v52 = vld [vmem:[%s1587_s20 + $0x750] sm:$0xff] }
  0xd7   : > { %1400 = vst [vmem:[%s1615_s25 + $0x610] sm:$0xff] %v1144_v57  ;;  %v651_v57 = vmul.f32 %v2433_v21, %v391_v47  ;;  %v909_v2 = vadd.f32 %v2441_v43, %v649_v49  ;;  %v1163_v9 = vmax.f32 %v907_v56, 0.0  ;;  %v409_v56 = vld [vmem:[%s1587_s20 + $0x758] sm:$0xff] }
  0xd8   : > { %1401 = vst [vmem:[%s1615_s25 + $0x618] sm:$0xff] %v1145_v61  ;;  %v652_v61 = vmul.f32 %v2433_v21, %v392_v50  ;;  %v910_v6 = vadd.f32 %v2441_v43, %v650_v53  ;;  %v1164_v13 = vmax.f32 %v908_v60, 0.0  ;;  %v410_v60 = vld [vmem:[%s1587_s20 + $0x760] sm:$0xff] }
  0xd9   : > { %1402 = vst [vmem:[%s1615_s25 + $0x620] sm:$0xff] %v1146_v3  ;;  %v653_v3 = vmul.f32 %v2433_v21, %v393_v54  ;;  %v911_v10 = vadd.f32 %v2441_v43, %v651_v57  ;;  %v1165_v17 = vmax.f32 %v909_v2, 0.0  ;;  %v411_v2 = vld [vmem:[%s1587_s20 + $0x768] sm:$0xff] }
  0xda   : > { %1403 = vst [vmem:[%s1615_s25 + $0x628] sm:$0xff] %v1147_v7  ;;  %v654_v7 = vmul.f32 %v2433_v21, %v394_v58  ;;  %v912_v14 = vadd.f32 %v2441_v43, %v652_v61  ;;  %v1166_v22 = vmax.f32 %v910_v6, 0.0  ;;  %v412_v6 = vld [vmem:[%s1587_s20 + $0x770] sm:$0xff] }
  0xdb   : > { %1404 = vst [vmem:[%s1615_s25 + $0x630] sm:$0xff] %v1148_v11  ;;  %v655_v11 = vmul.f32 %v2433_v21, %v395_v62  ;;  %v913_v18 = vadd.f32 %v2441_v43, %v653_v3  ;;  %v1167_v0 = vmax.f32 %v911_v10, 0.0  ;;  %v413_v10 = vld [vmem:[%s1587_s20 + $0x778] sm:$0xff] }
  0xdc   : > { %1405 = vst [vmem:[%s1615_s25 + $0x638] sm:$0xff] %v1149_v15  ;;  %v656_v15 = vmul.f32 %v2433_v21, %v396_v4  ;;  %v914_v23 = vadd.f32 %v2441_v43, %v654_v7  ;;  %v1168_v29 = vmax.f32 %v912_v14, 0.0  ;;  %v414_v14 = vld [vmem:[%s1587_s20 + $0x780] sm:$0xff] }
  0xdd   : > { %1406 = vst [vmem:[%s1615_s25 + $0x640] sm:$0xff] %v1150_v19  ;;  %v657_v19 = vmul.f32 %v2433_v21, %v397_v8  ;;  %v915_v26 = vadd.f32 %v2441_v43, %v655_v11  ;;  %v1169_v33 = vmax.f32 %v913_v18, 0.0  ;;  %v415_v18 = vld [vmem:[%s1587_s20 + $0x788] sm:$0xff] }
  0xde   : > { %1407 = vst [vmem:[%s1615_s25 + $0x648] sm:$0xff] %v1151_v24  ;;  %v658_v24 = vmul.f32 %v2433_v21, %v398_v12  ;;  %v916_v30 = vadd.f32 %v2441_v43, %v656_v15  ;;  %v1170_v37 = vmax.f32 %v914_v23, 0.0  ;;  %v416_v23 = vld [vmem:[%s1587_s20 + $0x790] sm:$0xff] }
  0xdf   : > { %1408 = vst [vmem:[%s1615_s25 + $0x650] sm:$0xff] %v1152_v27  ;;  %v659_v27 = vmul.f32 %v2433_v21, %v399_v16  ;;  %v917_v34 = vadd.f32 %v2441_v43, %v657_v19  ;;  %v1171_v41 = vmax.f32 %v915_v26, 0.0  ;;  %v417_v26 = vld [vmem:[%s1587_s20 + $0x798] sm:$0xff] }
  0xe0   : > { %1409 = vst [vmem:[%s1615_s25 + $0x658] sm:$0xff] %v1153_v31  ;;  %v660_v31 = vmul.f32 %v2433_v21, %v400_v20  ;;  %v918_v38 = vadd.f32 %v2441_v43, %v658_v24  ;;  %v1172_v46 = vmax.f32 %v916_v30, 0.0  ;;  %v418_v30 = vld [vmem:[%s1587_s20 + $0x7a0] sm:$0xff] }
  0xe1   : > { %1410 = vst [vmem:[%s1615_s25 + $0x660] sm:$0xff] %v1154_v35  ;;  %v661_v35 = vmul.f32 %v2433_v21, %v401_v25  ;;  %v919_v42 = vadd.f32 %v2441_v43, %v659_v27  ;;  %v1173_v49 = vmax.f32 %v917_v34, 0.0  ;;  %v419_v34 = vld [vmem:[%s1587_s20 + $0x7a8] sm:$0xff] }
  0xe2   : > { %1411 = vst [vmem:[%s1615_s25 + $0x668] sm:$0xff] %v1155_v39  ;;  %v662_v39 = vmul.f32 %v2433_v21, %v402_v28  ;;  %v920_v47 = vadd.f32 %v2441_v43, %v660_v31  ;;  %v1174_v53 = vmax.f32 %v918_v38, 0.0  ;;  %v420_v38 = vld [vmem:[%s1587_s20 + $0x7b0] sm:$0xff] }
  0xe3   : > { %1412 = vst [vmem:[%s1615_s25 + $0x670] sm:$0xff] %v1156_v44  ;;  %v663_v44 = vmul.f32 %v2433_v21, %v403_v32  ;;  %v921_v50 = vadd.f32 %v2441_v43, %v661_v35  ;;  %v1175_v57 = vmax.f32 %v919_v42, 0.0  ;;  %v421_v42 = vld [vmem:[%s1587_s20 + $0x7b8] sm:$0xff] }
  0xe4   : > { %1413 = vst [vmem:[%s1615_s25 + $0x678] sm:$0xff] %v1157_v1  ;;  %v664_v1 = vmul.f32 %v2433_v21, %v404_v36  ;;  %v922_v54 = vadd.f32 %v2441_v43, %v662_v39  ;;  %v1176_v61 = vmax.f32 %v920_v47, 0.0  ;;  %v422_v47 = vld [vmem:[%s1587_s20 + $0x7c0] sm:$0xff] }
  0xe5   : > { %1414 = vst [vmem:[%s1615_s25 + $0x680] sm:$0xff] %v1158_v51  ;;  %v665_v51 = vmul.f32 %v2433_v21, %v405_v40  ;;  %v923_v58 = vadd.f32 %v2441_v43, %v663_v44  ;;  %v1177_v3 = vmax.f32 %v921_v50, 0.0  ;;  %v423_v50 = vld [vmem:[%s1587_s20 + $0x7c8] sm:$0xff] }
  0xe6   : > { %1415 = vst [vmem:[%s1615_s25 + $0x688] sm:$0xff] %v1159_v55  ;;  %v666_v55 = vmul.f32 %v2433_v21, %v406_v45  ;;  %v924_v62 = vadd.f32 %v2441_v43, %v664_v1  ;;  %v1178_v7 = vmax.f32 %v922_v54, 0.0  ;;  %v424_v54 = vld [vmem:[%s1587_s20 + $0x7d0] sm:$0xff] }
  0xe7   : > { %1416 = vst [vmem:[%s1615_s25 + $0x690] sm:$0xff] %v1160_v59  ;;  %v667_v59 = vmul.f32 %v2433_v21, %v407_v48  ;;  %v925_v4 = vadd.f32 %v2441_v43, %v665_v51  ;;  %v1179_v11 = vmax.f32 %v923_v58, 0.0  ;;  %v425_v58 = vld [vmem:[%s1587_s20 + $0x7d8] sm:$0xff] }
  0xe8   : > { %1417 = vst [vmem:[%s1615_s25 + $0x698] sm:$0xff] %v1161_v63  ;;  %v668_v63 = vmul.f32 %v2433_v21, %v408_v52  ;;  %v926_v8 = vadd.f32 %v2441_v43, %v666_v55  ;;  %v1180_v15 = vmax.f32 %v924_v62, 0.0  ;;  %v426_v62 = vld [vmem:[%s1587_s20 + $0x7e0] sm:$0xff] }
  0xe9   : > { %1418 = vst [vmem:[%s1615_s25 + $0x6a0] sm:$0xff] %v1162_v5  ;;  %v669_v5 = vmul.f32 %v2433_v21, %v409_v56  ;;  %v927_v12 = vadd.f32 %v2441_v43, %v667_v59  ;;  %v1181_v19 = vmax.f32 %v925_v4, 0.0  ;;  %v427_v4 = vld [vmem:[%s1587_s20 + $0x7e8] sm:$0xff] }
  0xea   : > { %1419 = vst [vmem:[%s1615_s25 + $0x6a8] sm:$0xff] %v1163_v9  ;;  %v670_v9 = vmul.f32 %v2433_v21, %v410_v60  ;;  %v928_v16 = vadd.f32 %v2441_v43, %v668_v63  ;;  %v1182_v24 = vmax.f32 %v926_v8, 0.0  ;;  %v428_v8 = vld [vmem:[%s1587_s20 + $0x7f0] sm:$0xff] }
  0xeb   : > { %1420 = vst [vmem:[%s1615_s25 + $0x6b0] sm:$0xff] %v1164_v13  ;;  %v671_v13 = vmul.f32 %v2433_v21, %v411_v2  ;;  %v929_v20 = vadd.f32 %v2441_v43, %v669_v5  ;;  %v1183_v27 = vmax.f32 %v927_v12, 0.0  ;;  %v429_v12 = vld [vmem:[%s1587_s20 + $0x7f8] sm:$0xff] }
  0xec   : > { %1421 = vst [vmem:[%s1615_s25 + $0x6b8] sm:$0xff] %v1165_v17  ;;  %v672_v17 = vmul.f32 %v2433_v21, %v412_v6  ;;  %v930_v25 = vadd.f32 %v2441_v43, %v670_v9  ;;  %v1184_v31 = vmax.f32 %v928_v16, 0.0 }
  0xed   : > { %1422 = vst [vmem:[%s1615_s25 + $0x6c0] sm:$0xff] %v1166_v22  ;;  %v673_v22 = vmul.f32 %v2433_v21, %v413_v10  ;;  %v931_v28 = vadd.f32 %v2441_v43, %v671_v13  ;;  %v1185_v35 = vmax.f32 %v929_v20, 0.0 }
  0xee   : > { %1423 = vst [vmem:[%s1615_s25 + $0x6c8] sm:$0xff] %v1167_v0  ;;  %v674_v0 = vmul.f32 %v2433_v21, %v414_v14  ;;  %v932_v32 = vadd.f32 %v2441_v43, %v672_v17  ;;  %v1186_v39 = vmax.f32 %v930_v25, 0.0 }
  0xef   : > { %1424 = vst [vmem:[%s1615_s25 + $0x6d0] sm:$0xff] %v1168_v29  ;;  %v675_v29 = vmul.f32 %v2433_v21, %v415_v18  ;;  %v933_v36 = vadd.f32 %v2441_v43, %v673_v22  ;;  %v1187_v44 = vmax.f32 %v931_v28, 0.0  ;;  %v688_v18 = vmul.f32 %v2433_v21, %v428_v8 }
  0xf0   : > { %1425 = vst [vmem:[%s1615_s25 + $0x6d8] sm:$0xff] %v1169_v33  ;;  %v676_v33 = vmul.f32 %v2433_v21, %v416_v23  ;;  %v934_v40 = vadd.f32 %v2441_v43, %v674_v0  ;;  %v1188_v1 = vmax.f32 %v932_v32, 0.0  ;;  %v689_v22 = vmul.f32 %v2433_v21, %v429_v12 }
  0xf1   : > { %1426 = vst [vmem:[%s1615_s25 + $0x6e0] sm:$0xff] %v1170_v37  ;;  %v677_v37 = vmul.f32 %v2433_v21, %v417_v26  ;;  %v935_v45 = vadd.f32 %v2441_v43, %v675_v29  ;;  %v1189_v51 = vmax.f32 %v933_v36, 0.0 }
  0xf2   : > { %1427 = vst [vmem:[%s1615_s25 + $0x6e8] sm:$0xff] %v1171_v41  ;;  %v678_v41 = vmul.f32 %v2433_v21, %v418_v30  ;;  %v936_v48 = vadd.f32 %v2441_v43, %v676_v33  ;;  %v1190_v55 = vmax.f32 %v934_v40, 0.0  ;;  %v949_v28 = vadd.f32 %v2441_v43, %v689_v22 }
  0xf3   : > { %1428 = vst [vmem:[%s1615_s25 + $0x6f0] sm:$0xff] %v1172_v46  ;;  %v679_v46 = vmul.f32 %v2433_v21, %v419_v34  ;;  %v937_v52 = vadd.f32 %v2441_v43, %v677_v37  ;;  %v1191_v59 = vmax.f32 %v935_v45, 0.0 }
  0xf4   : > { %1429 = vst [vmem:[%s1615_s25 + $0x6f8] sm:$0xff] %v1173_v49  ;;  %v680_v49 = vmul.f32 %v2433_v21, %v420_v38  ;;  %v938_v56 = vadd.f32 %v2441_v43, %v678_v41  ;;  %v1192_v63 = vmax.f32 %v936_v48, 0.0  ;;  %v1205_v32 = vmax.f32 %v949_v28, 0.0 }
  0xf5   : > { %1430 = vst [vmem:[%s1615_s25 + $0x700] sm:$0xff] %v1174_v53  ;;  %v681_v53 = vmul.f32 %v2433_v21, %v421_v42  ;;  %v939_v60 = vadd.f32 %v2441_v43, %v679_v46  ;;  %v1193_v5 = vmax.f32 %v937_v52, 0.0 }
  0xf6   : > { %1431 = vst [vmem:[%s1615_s25 + $0x708] sm:$0xff] %v1175_v57  ;;  %v682_v57 = vmul.f32 %v2433_v21, %v422_v47  ;;  %v940_v2 = vadd.f32 %v2441_v43, %v680_v49  ;;  %v1194_v9 = vmax.f32 %v938_v56, 0.0 }
  0xf7   : > { %1432 = vst [vmem:[%s1615_s25 + $0x710] sm:$0xff] %v1176_v61  ;;  %v683_v61 = vmul.f32 %v2433_v21, %v423_v50  ;;  %v941_v6 = vadd.f32 %v2441_v43, %v681_v53  ;;  %v1195_v13 = vmax.f32 %v939_v60, 0.0 }
  0xf8   : > { %1433 = vst [vmem:[%s1615_s25 + $0x718] sm:$0xff] %v1177_v3  ;;  %v684_v3 = vmul.f32 %v2433_v21, %v424_v54  ;;  %v942_v10 = vadd.f32 %v2441_v43, %v682_v57  ;;  %v1196_v16 = vmax.f32 %v940_v2, 0.0 }
  0xf9   : > { %1434 = vst [vmem:[%s1615_s25 + $0x720] sm:$0xff] %v1178_v7  ;;  %v685_v7 = vmul.f32 %v2433_v21, %v425_v58  ;;  %v943_v14 = vadd.f32 %v2441_v43, %v683_v61 }
  0xfa   : > { %1435 = vst [vmem:[%s1615_s25 + $0x728] sm:$0xff] %v1179_v11  ;;  %v686_v11 = vmul.f32 %v2433_v21, %v426_v62  ;;  %v944_v17 = vadd.f32 %v2441_v43, %v684_v3  ;;  %v1198_v23 = vmax.f32 %v942_v10, 0.0 }
  0xfb   : > { %1436 = vst [vmem:[%s1615_s25 + $0x730] sm:$0xff] %v1180_v15  ;;  %v687_v15 = vmul.f32 %v2433_v21, %v427_v4  ;;  %v945_v20 = vadd.f32 %v2441_v43, %v685_v7  ;;  %v1199_v25 = vmax.f32 %v943_v14, 0.0 }
  0xfc   : > { %1437 = vst [vmem:[%s1615_s25 + $0x738] sm:$0xff] %v1181_v19  ;;  %v1197_v19 = vmax.f32 %v941_v6, 0.0  ;;  %v1200_v26 = vmax.f32 %v944_v17, 0.0 }
  0xfd   : > { %1438 = vst [vmem:[%s1615_s25 + $0x740] sm:$0xff] %v1182_v24  ;;  %v946_v24 = vadd.f32 %v2441_v43, %v686_v11  ;;  %v947_v0 = vadd.f32 %v2441_v43, %v687_v15  ;;  %v1201_v21 = vmax.f32 %v945_v20, 0.0 }
  0xfe   : > { %1439 = vst [vmem:[%s1615_s25 + $0x748] sm:$0xff] %v1183_v27  ;;  %v948_v27 = vadd.f32 %v2441_v43, %v688_v18 }
  0xff   : > { %1440 = vst [vmem:[%s1615_s25 + $0x750] sm:$0xff] %v1184_v31  ;;  %v1202_v29 = vmax.f32 %v946_v24, 0.0  ;;  %v1203_v30 = vmax.f32 %v947_v0, 0.0 }
 0x100   : > { %1441 = vst [vmem:[%s1615_s25 + $0x758] sm:$0xff] %v1185_v35  ;;  %v1204_v31 = vmax.f32 %v948_v27, 0.0 }
 0x101   : > { %1442 = vst [vmem:[%s1615_s25 + $0x760] sm:$0xff] %v1186_v39 }
 0x102   : > { %1443 = vst [vmem:[%s1615_s25 + $0x768] sm:$0xff] %v1187_v44 }
 0x103   : > { %1444 = vst [vmem:[%s1615_s25 + $0x770] sm:$0xff] %v1188_v1 }
 0x104   : > { %1445 = vst [vmem:[%s1615_s25 + $0x778] sm:$0xff] %v1189_v51 }
 0x105   : > { %1446 = vst [vmem:[%s1615_s25 + $0x780] sm:$0xff] %v1190_v55 }
 0x106   : > { %1447 = vst [vmem:[%s1615_s25 + $0x788] sm:$0xff] %v1191_v59 }
 0x107   : > { %1448 = vst [vmem:[%s1615_s25 + $0x790] sm:$0xff] %v1192_v63 }
 0x108   : > { %1449 = vst [vmem:[%s1615_s25 + $0x798] sm:$0xff] %v1193_v5 }
 0x109   : > { %1450 = vst [vmem:[%s1615_s25 + $0x7a0] sm:$0xff] %v1194_v9 }
 0x10a   : > { %1451 = vst [vmem:[%s1615_s25 + $0x7a8] sm:$0xff] %v1195_v13 }
 0x10b   : > { %1452 = vst [vmem:[%s1615_s25 + $0x7b0] sm:$0xff] %v1196_v16 }
 0x10c   : > { %1453 = vst [vmem:[%s1615_s25 + $0x7b8] sm:$0xff] %v1197_v19 }
 0x10d   : > { %1454 = vst [vmem:[%s1615_s25 + $0x7c0] sm:$0xff] %v1198_v23 }
 0x10e   : > { %1455 = vst [vmem:[%s1615_s25 + $0x7c8] sm:$0xff] %v1199_v25 }
 0x10f   : > { %1456 = vst [vmem:[%s1615_s25 + $0x7d0] sm:$0xff] %v1200_v26 }
 0x110   : > { %1457 = vst [vmem:[%s1615_s25 + $0x7d8] sm:$0xff] %v1201_v21 }
 0x111   : > { %1458 = vst [vmem:[%s1615_s25 + $0x7e0] sm:$0xff] %v1202_v29 }
 0x112   : > { %1459 = vst [vmem:[%s1615_s25 + $0x7e8] sm:$0xff] %v1203_v30 }
 0x113   : > { %1460 = vst [vmem:[%s1615_s25 + $0x7f0] sm:$0xff] %v1204_v31 }
 0x114   : > { %1461 = vst [vmem:[%s1615_s25 + $0x7f8] sm:$0xff] %v1205_v32 }
 0x115 PF: > { %s13_s12 = sadd.s32 1, %s1549_s12  }
 0x116   : > { %p10_p4 = scmp.ge.s32.totalorder %s13_s12, 4  }
 0x118   :  { %12 = sbr.rel (!%p10_p4) target bundleno = 1 (0x1), region = 62 }

// kernel: unit3d_forward.2
= control target key start
LH: loop header
LB: loop body
LE: loop exit
PB: predicated region body
PF: predicated region fallthrough
CT: control target
= control target key end

     0   :  { %s5275_s12 = smov 0   ;;  %s5277_s13 = smov 0   ;;  %s6494_s0 = inlined_call_operand.vmem [shape: bf16[4096,128], index: 0, kind: input, shape index: {}]   ;;  %s6495_s1 = inlined_call_operand.vmem [shape: bf16[128,128], index: 1, kind: input, shape index: {}]   ;;  %s6496_s2 = inlined_call_operand.vmem [shape: f32[4096,128], index: 2, kind: output, shape index: {0}]   ;;  %s6497_s3 = inlined_call_operand.vmem [shape: f32[2,2,128], index: 3, kind: output, shape index: {1}]  }
   0x1   :  { %s5279_s14 = smov 0  }
   0x2 LB: > { %s26_s15 = sadd.s32 1, %s5249_s13  ;;  %p4410_p0 = scmp.ge.s32.totalorder %s5253_s14, 1  ;;  %s5253_s14 = sphi %s5279_s14, %s14_s14   ;;  %s5249_s13 = sphi %s5277_s13, %s6499_s13   ;;  %s5245_s12 = sphi %s5275_s12, %s6498_s12  }
   0x3   : > { %p28_p1 = scmp.ge.s32.totalorder %s26_s15, 2  ;;  %p169_p2 = scmp.lt.s32.totalorder %s5253_s14, 3 }
   0x5   : > { %s6501_s15 = smov (%p28_p1, %s26_s15), 0  ;;  %p170_p3 = pnand %p4410_p0, %p169_p2 }
   0x6   : > { %s4411_s24 = sshll.u32 (!%p170_p3), %s5245_s12, 8  ;;  %p226_p5 = scmp.lt.s32.totalorder (!%p170_p3), %s5245_s12, 1 }
   0x7   : > { %173 = sbr.rel (%p170_p3) target bundleno = 1076 (0x434), region = 28  ;;  %p206_p4 = scmp.lt.s32.totalorder (!%p170_p3), %s4411_s24, 511 }
   0xc   : > { %v5097_v0 = vld [vmem:[%s6495_s1 + $0x38] sm:$0xff]  ;;  %v5096_v1 = vld [vmem:[%s6495_s1 + $0x30] sm:$0xff]  ;;  %v5095_v2 = vld [vmem:[%s6495_s1 + $0x28] sm:$0xff]  ;;  %s6503_s24 = smov (!%p206_p4, %s4411_s24), 511  ;;  %s6505_s12 = smov (!%p226_p5, %s5245_s12), 1  ;;  %vm4288_vm0 = vcmask 1040384  }
   0xd   : > { %1834 = vmatpush.bf16.msra.mxu0 %v5097_v0  ;;  %5098 = vmatpush.bf16.msra.mxu1 %v5097_v0  ;;  %v5094_v3 = vld [vmem:[%s6495_s1 + $0x20] sm:$0xff]  ;;  %v5093_v4 = vld [vmem:[%s6495_s1 + $0x18] sm:$0xff]  ;;  %v5092_v5 = vld [vmem:[%s6495_s1 + $0x10] sm:$0xff]  ;;  %s4412_s4 = sshll.u32 %s6503_s24, 2  ;;  %s4414_s10 = sshll.u32 %s6503_s24, 3 }
   0xe   : > { %5099 = vmatpush.bf16.msra.mxu2 %v5097_v0  ;;  %5100 = vmatpush.bf16.msra.mxu3 %v5097_v0  ;;  %v5091_v6 = vld [vmem:[%s6495_s1 + $0x8] sm:$0xff]  ;;  %v5090_v7 = vld [vmem:[%s6495_s1] sm:$0xff]  ;;  %s5326_s9 = scalar_lea.vmem %s6494_s0, %s4412_s4  ;;  %s5343_s17 = scalar_lea.vmem %s6496_s2, %s4414_s10 }
   0xf   : > { %v4962_v8 = vld [vmem:[%s5326_s9] sm:$0xff]  ;;  %v4963_v9 = vld [vmem:[%s5326_s9 + $0x8] sm:$0xff]  ;;  %v4964_v10 = vld [vmem:[%s5326_s9 + $0x10] sm:$0xff]  ;;  %s4415_s18 = sshll.u32 %s6505_s12, 1 }
  0x10   : > { %v4965_v11 = vld [vmem:[%s5326_s9 + $0x18] sm:$0xff]  ;;  %v4966_v12 = vld [vmem:[%s5326_s9 + $0x20] sm:$0xff]  ;;  %v4967_v13 = vld [vmem:[%s5326_s9 + $0x28] sm:$0xff]  ;;  %s229_s21 = scalar_lea.vmem %s6497_s3, %s4415_s18 }
  0x11   : > { %1835 = vmatpush.bf16.msra.mxu0 %v5096_v1  ;;  %5101 = vmatpush.bf16.msra.mxu1 %v5096_v1  ;;  %v4994_v14 = vld [vmem:[%s5326_s9 + $0x100] sm:$0xff]  ;;  %v4968_v15 = vld [vmem:[%s5326_s9 + $0x30] sm:$0xff]  ;;  %v4995_v16 = vld [vmem:[%s5326_s9 + $0x108] sm:$0xff] }
  0x12   : > { %5102 = vmatpush.bf16.msra.mxu2 %v5096_v1  ;;  %5103 = vmatpush.bf16.msra.mxu3 %v5096_v1  ;;  %v4969_v17 = vld [vmem:[%s5326_s9 + $0x38] sm:$0xff]  ;;  %v4996_v18 = vld [vmem:[%s5326_s9 + $0x110] sm:$0xff]  ;;  %v4970_v19 = vld [vmem:[%s5326_s9 + $0x40] sm:$0xff] }
  0x13   : > { %v4997_v25 = vld [vmem:[%s5326_s9 + $0x118] sm:$0xff]  ;;  %v4971_v27 = vld [vmem:[%s5326_s9 + $0x48] sm:$0xff]  ;;  %v4998_v35 = vld [vmem:[%s5326_s9 + $0x120] sm:$0xff] }
  0x14   : > { %v4972_v37 = vld [vmem:[%s5326_s9 + $0x50] sm:$0xff]  ;;  %v4999_v45 = vld [vmem:[%s5326_s9 + $0x128] sm:$0xff]  ;;  %v4973_v47 = vld [vmem:[%s5326_s9 + $0x58] sm:$0xff] }
  0x15   : > { %1836 = vmatpush.bf16.msra.mxu0 %v5095_v2  ;;  %5104 = vmatpush.bf16.msra.mxu1 %v5095_v2  ;;  %v5000_v55 = vld [vmem:[%s5326_s9 + $0x130] sm:$0xff]  ;;  %v4974_v57 = vld [vmem:[%s5326_s9 + $0x60] sm:$0xff]  ;;  %v5001_v1 = vld [vmem:[%s5326_s9 + $0x138] sm:$0xff] }
  0x16   : > { %5105 = vmatpush.bf16.msra.mxu2 %v5095_v2  ;;  %5106 = vmatpush.bf16.msra.mxu3 %v5095_v2 }
  0x19   : > { %1837 = vmatpush.bf16.msra.mxu0 %v5094_v3  ;;  %5107 = vmatpush.bf16.msra.mxu1 %v5094_v3 }
  0x1a   : > { %5108 = vmatpush.bf16.msra.mxu2 %v5094_v3  ;;  %5109 = vmatpush.bf16.msra.mxu3 %v5094_v3  ;;  %v4975_v3 = vld [vmem:[%s5326_s9 + $0x68] sm:$0xff] }
  0x1d   : > { %1838 = vmatpush.bf16.msra.mxu0 %v5093_v4  ;;  %5110 = vmatpush.bf16.msra.mxu1 %v5093_v4 }
  0x1e   : > { %5111 = vmatpush.bf16.msra.mxu2 %v5093_v4  ;;  %5112 = vmatpush.bf16.msra.mxu3 %v5093_v4 }
  0x21   : > { %1839 = vmatpush.bf16.msra.mxu0 %v5092_v5  ;;  %5113 = vmatpush.bf16.msra.mxu1 %v5092_v5 }
  0x22   : > { %5114 = vmatpush.bf16.msra.mxu2 %v5092_v5  ;;  %5115 = vmatpush.bf16.msra.mxu3 %v5092_v5 }
  0x25   : > { %1840 = vmatpush.bf16.msra.mxu0 %v5091_v6  ;;  %5116 = vmatpush.bf16.msra.mxu1 %v5091_v6 }
  0x26   : > { %5117 = vmatpush.bf16.msra.mxu2 %v5091_v6  ;;  %5118 = vmatpush.bf16.msra.mxu3 %v5091_v6 }
  0x29   : > { %1841 = vmatpush.bf16.msra.mxu0 %v5090_v7  ;;  %5119 = vmatpush.bf16.msra.mxu1 %v5090_v7 }
  0x2a   : > { %5120 = vmatpush.bf16.msra.mxu2 %v5090_v7  ;;  %5121 = vmatpush.bf16.msra.mxu3 %v5090_v7 }
  0x2c   : > { %1842 = vmatmul.bf16.vlgmr.msra.gmra.mxu0 %v4962_v8  ;;  %2002 = vmatmul.bf16.vlgmr.msra.gmra.mxu1 %v4994_v14  ;;  %v5026_v8 = vld [vmem:[%s5326_s9 + $0x200] sm:$0xff] }
  0x2d   : > { %2162 = vmatmul.bf16.vlgmr.msra.gmra.mxu2 %v5026_v8 }
  0x3c   : > { %1847 = vmatmul.bf16.gmra.mxu0 %v4963_v9  ;;  %2007 = vmatmul.bf16.gmra.mxu1 %v4995_v16 }
  0x4c   : > { %1852 = vmatmul.bf16.gmra.mxu0 %v4964_v10  ;;  %2012 = vmatmul.bf16.gmra.mxu1 %v4996_v18 }
  0x5c   : > { %1857 = vmatmul.bf16.gmra.mxu0 %v4965_v11  ;;  %2017 = vmatmul.bf16.gmra.mxu1 %v4997_v25 }
  0x6c   : > { %1862 = vmatmul.bf16.gmra.mxu0 %v4966_v12  ;;  %2022 = vmatmul.bf16.gmra.mxu1 %v4998_v35 }
  0x7c   : > { %1867 = vmatmul.bf16.gmra.mxu0 %v4967_v13  ;;  %2027 = vmatmul.bf16.gmra.mxu1 %v4999_v45  ;;  %v5002_v13 = vld [vmem:[%s5326_s9 + $0x140] sm:$0xff] }
  0x8c   : > { %1872 = vmatmul.bf16.gmra.mxu0 %v4968_v15  ;;  %2032 = vmatmul.bf16.gmra.mxu1 %v5000_v55  ;;  %v4976_v15 = vld [vmem:[%s5326_s9 + $0x70] sm:$0xff] }
  0x9c   : > { %1877 = vmatmul.bf16.gmra.mxu0 %v4969_v17  ;;  %2037 = vmatmul.bf16.gmra.mxu1 %v5001_v1  ;;  %v5006_v1 = vld [vmem:[%s5326_s9 + $0x160] sm:$0xff] }
  0xa9   : > { %v1843_v20 = vpop.f32.mrf.mxu0  ;;  %v2003_v10 = vpop.f32.mrf.mxu1 }
  0xaa   : > { %3254 = vst [vmem:[%s5343_s17] sm:$0xff] %v1843_v20  ;;  %v3771_v22 = vmul.f32 %v1843_v20, %v1843_v20 }
  0xab   : > { %3318 = vst [vmem:[%s5343_s17 + $0x200] sm:$0xff] %v2003_v10 }
  0xac   : > { %1882 = vmatmul.bf16.gmra.mxu0 %v4970_v19  ;;  %2042 = vmatmul.bf16.gmra.mxu1 %v5002_v13 }
  0xb1   : > { %v1845_v21 = vpop.f32.mrf.mxu0  ;;  %v2005_v17 = vpop.f32.mrf.mxu1 }
  0xb2   : > { %3255 = vst [vmem:[%s5343_s17 + $0x8] sm:$0xff] %v1845_v21  ;;  %v3510_v23 = vadd.f32 %v1845_v21, %v1843_v20  ;;  %v3772_v24 = vmul.f32 %v1845_v21, %v1845_v21  ;;  %v5027_v21 = vld [vmem:[%s5326_s9 + $0x208] sm:$0xff] }
  0xb3   : > { %3319 = vst [vmem:[%s5343_s17 + $0x208] sm:$0xff] %v2005_v17  ;;  %2167 = vmatmul.bf16.gmra.mxu2 %v5027_v21 }
  0xb4   : > { %v4027_v26 = vadd.f32 %v3772_v24, %v3771_v22 }
  0xb9   : > { %v1848_v28 = vpop.f32.mrf.mxu0 }
  0xba   : > { %3256 = vst [vmem:[%s5343_s17 + $0x10] sm:$0xff] %v1848_v28  ;;  %v3511_v29 = vadd.f32 %v3510_v23, %v1848_v28  ;;  %v3773_v30 = vmul.f32 %v1848_v28, %v1848_v28  ;;  %v2008_v23 = vpop.f32.mrf.mxu1  ;;  %v4977_v28 = vld [vmem:[%s5326_s9 + $0x78] sm:$0xff] }
  0xbb   : > { %3320 = vst [vmem:[%s5343_s17 + $0x210] sm:$0xff] %v2008_v23 }
  0xbc   : > { %v4028_v31 = vadd.f32 %v4027_v26, %v3773_v30  ;;  %1887 = vmatmul.bf16.gmra.mxu0 %v4971_v27  ;;  %v5003_v26 = vld [vmem:[%s5326_s9 + $0x148] sm:$0xff] }
  0xbd   : > { %2047 = vmatmul.bf16.gmra.mxu1 %v5003_v26 }
  0xc1   : > { %v1850_v32 = vpop.f32.mrf.mxu0 }
  0xc2   : > { %3257 = vst [vmem:[%s5343_s17 + $0x18] sm:$0xff] %v1850_v32  ;;  %v3512_v33 = vadd.f32 %v3511_v29, %v1850_v32  ;;  %v3774_v34 = vmul.f32 %v1850_v32, %v1850_v32  ;;  %v2010_v30 = vpop.f32.mrf.mxu1 }
  0xc3   : > { %3321 = vst [vmem:[%s5343_s17 + $0x218] sm:$0xff] %v2010_v30 }
  0xc4   : > { %v4029_v36 = vadd.f32 %v4028_v31, %v3774_v34  ;;  %v5028_v34 = vld [vmem:[%s5326_s9 + $0x210] sm:$0xff] }
  0xc5   : > { %2172 = vmatmul.bf16.gmra.mxu2 %v5028_v34 }
  0xc9   : > { %v1853_v38 = vpop.f32.mrf.mxu0 }
  0xca   : > { %3258 = vst [vmem:[%s5343_s17 + $0x20] sm:$0xff] %v1853_v38  ;;  %v3513_v39 = vadd.f32 %v3512_v33, %v1853_v38  ;;  %v3775_v40 = vmul.f32 %v1853_v38, %v1853_v38 }
  0xcc   : > { %v4030_v41 = vadd.f32 %v4029_v36, %v3775_v40  ;;  %1892 = vmatmul.bf16.gmra.mxu0 %v4972_v37  ;;  %v2013_v36 = vpop.f32.mrf.mxu1 }
  0xcd   : > { %3322 = vst [vmem:[%s5343_s17 + $0x220] sm:$0xff] %v2013_v36 }
  0xd1   : > { %v1855_v42 = vpop.f32.mrf.mxu0 }
  0xd2   : > { %3259 = vst [vmem:[%s5343_s17 + $0x28] sm:$0xff] %v1855_v42  ;;  %v3514_v43 = vadd.f32 %v3513_v39, %v1855_v42  ;;  %v3776_v44 = vmul.f32 %v1855_v42, %v1855_v42  ;;  %v5004_v39 = vld [vmem:[%s5326_s9 + $0x150] sm:$0xff] }
  0xd3   : > { %2052 = vmatmul.bf16.gmra.mxu1 %v5004_v39 }
  0xd4   : > { %v4031_v46 = vadd.f32 %v4030_v41, %v3776_v44  ;;  %v4978_v41 = vld [vmem:[%s5326_s9 + $0x80] sm:$0xff] }
  0xd9   : > { %v1858_v48 = vpop.f32.mrf.mxu0 }
  0xda   : > { %3260 = vst [vmem:[%s5343_s17 + $0x30] sm:$0xff] %v1858_v48  ;;  %v3515_v49 = vadd.f32 %v3514_v43, %v1858_v48  ;;  %v3777_v50 = vmul.f32 %v1858_v48, %v1858_v48  ;;  %v2015_v43 = vpop.f32.mrf.mxu1 }
  0xdb   : > { %3323 = vst [vmem:[%s5343_s17 + $0x228] sm:$0xff] %v2015_v43 }
  0xdc   : > { %v4032_v51 = vadd.f32 %v4031_v46, %v3777_v50  ;;  %1897 = vmatmul.bf16.gmra.mxu0 %v4973_v47  ;;  %v5029_v47 = vld [vmem:[%s5326_s9 + $0x218] sm:$0xff] }
  0xdd   : > { %2177 = vmatmul.bf16.gmra.mxu2 %v5029_v47 }
  0xe1   : > { %v1860_v52 = vpop.f32.mrf.mxu0 }
  0xe2   : > { %3261 = vst [vmem:[%s5343_s17 + $0x38] sm:$0xff] %v1860_v52  ;;  %v3516_v53 = vadd.f32 %v3515_v49, %v1860_v52  ;;  %v3778_v54 = vmul.f32 %v1860_v52, %v1860_v52  ;;  %v2018_v49 = vpop.f32.mrf.mxu1  ;;  %v5005_v52 = vld [vmem:[%s5326_s9 + $0x158] sm:$0xff] }
  0xe3   : > { %3324 = vst [vmem:[%s5343_s17 + $0x230] sm:$0xff] %v2018_v49  ;;  %2057 = vmatmul.bf16.gmra.mxu1 %v5005_v52  ;;  %v5058_v49 = vld [vmem:[%s5326_s9 + $0x300] sm:$0xff] }
  0xe4   : > { %v4033_v56 = vadd.f32 %v4032_v51, %v3778_v54  ;;  %v4979_v54 = vld [vmem:[%s5326_s9 + $0x88] sm:$0xff]  ;;  %2322 = vmatmul.bf16.vlgmr.msra.gmra.mxu3 %v5058_v49  ;;  %v5062_v49 = vld [vmem:[%s5326_s9 + $0x320] sm:$0xff] }
  0xe9   : > { %v1863_v58 = vpop.f32.mrf.mxu0 }
  0xea   : > { %3262 = vst [vmem:[%s5343_s17 + $0x40] sm:$0xff] %v1863_v58  ;;  %v3517_v59 = vadd.f32 %v3516_v53, %v1863_v58  ;;  %v3779_v60 = vmul.f32 %v1863_v58, %v1863_v58 }
  0xec   : > { %v4034_v61 = vadd.f32 %v4033_v56, %v3779_v60  ;;  %1902 = vmatmul.bf16.gmra.mxu0 %v4974_v57  ;;  %v2020_v56 = vpop.f32.mrf.mxu1  ;;  %v5030_v60 = vld [vmem:[%s5326_s9 + $0x220] sm:$0xff] }
  0xed   : > { %3325 = vst [vmem:[%s5343_s17 + $0x238] sm:$0xff] %v2020_v56  ;;  %2182 = vmatmul.bf16.gmra.mxu2 %v5030_v60 }
  0xf1   : > { %v1865_v62 = vpop.f32.mrf.mxu0 }
  0xf2   : > { %3263 = vst [vmem:[%s5343_s17 + $0x48] sm:$0xff] %v1865_v62  ;;  %v3518_v63 = vadd.f32 %v3517_v59, %v1865_v62  ;;  %v3780_v0 = vmul.f32 %v1865_v62, %v1865_v62 }
  0xf3   : > { %2062 = vmatmul.bf16.gmra.mxu1 %v5006_v1  ;;  %v5059_v1 = vld [vmem:[%s5326_s9 + $0x308] sm:$0xff] }
  0xf4   : > { %v4035_v2 = vadd.f32 %v4034_v61, %v3780_v0  ;;  %v2023_v62 = vpop.f32.mrf.mxu1  ;;  %2327 = vmatmul.bf16.gmra.mxu3 %v5059_v1  ;;  %v5063_v1 = vld [vmem:[%s5326_s9 + $0x328] sm:$0xff] }
  0xf5   : > { %3326 = vst [vmem:[%s5343_s17 + $0x240] sm:$0xff] %v2023_v62 }
  0xf9   : > { %v1868_v4 = vpop.f32.mrf.mxu0 }
  0xfa   : > { %3264 = vst [vmem:[%s5343_s17 + $0x50] sm:$0xff] %v1868_v4  ;;  %v3519_v5 = vadd.f32 %v3518_v63, %v1868_v4  ;;  %v3781_v6 = vmul.f32 %v1868_v4, %v1868_v4 }
  0xfc   : > { %v4036_v7 = vadd.f32 %v4035_v2, %v3781_v6  ;;  %1907 = vmatmul.bf16.gmra.mxu0 %v4975_v3  ;;  %v4980_v3 = vld [vmem:[%s5326_s9 + $0x90] sm:$0xff] }
 0x101   : > { %v1870_v9 = vpop.f32.mrf.mxu0 }
 0x102   : > { %3265 = vst [vmem:[%s5343_s17 + $0x58] sm:$0xff] %v1870_v9  ;;  %v3520_v11 = vadd.f32 %v3519_v5, %v1870_v9  ;;  %v3782_v12 = vmul.f32 %v1870_v9, %v1870_v9  ;;  %v2025_v5 = vpop.f32.mrf.mxu1  ;;  %v5031_v9 = vld [vmem:[%s5326_s9 + $0x228] sm:$0xff] }
 0x103   : > { %3327 = vst [vmem:[%s5343_s17 + $0x248] sm:$0xff] %v2025_v5  ;;  %2187 = vmatmul.bf16.gmra.mxu2 %v5031_v9  ;;  %v4985_v9 = vld [vmem:[%s5326_s9 + $0xb8] sm:$0xff] }
 0x104   : > { %v4037_v14 = vadd.f32 %v4036_v7, %v3782_v12 }
 0x109   : > { %v1873_v16 = vpop.f32.mrf.mxu0 }
 0x10a   : > { %3266 = vst [vmem:[%s5343_s17 + $0x60] sm:$0xff] %v1873_v16  ;;  %v3521_v18 = vadd.f32 %v3520_v11, %v1873_v16  ;;  %v3783_v19 = vmul.f32 %v1873_v16, %v1873_v16  ;;  %v2028_v11 = vpop.f32.mrf.mxu1  ;;  %v4981_v16 = vld [vmem:[%s5326_s9 + $0x98] sm:$0xff] }
 0x10b   : > { %3328 = vst [vmem:[%s5343_s17 + $0x250] sm:$0xff] %v2028_v11 }
 0x10c   : > { %v4038_v20 = vadd.f32 %v4037_v14, %v3783_v19  ;;  %1912 = vmatmul.bf16.gmra.mxu0 %v4976_v15  ;;  %v5007_v14 = vld [vmem:[%s5326_s9 + $0x168] sm:$0xff] }
 0x10d   : > { %2067 = vmatmul.bf16.gmra.mxu1 %v5007_v14 }
 0x111   : > { %v1875_v22 = vpop.f32.mrf.mxu0 }
 0x112   : > { %3267 = vst [vmem:[%s5343_s17 + $0x68] sm:$0xff] %v1875_v22  ;;  %v3522_v24 = vadd.f32 %v3521_v18, %v1875_v22  ;;  %v3784_v25 = vmul.f32 %v1875_v22, %v1875_v22  ;;  %v2030_v18 = vpop.f32.mrf.mxu1  ;;  %v5032_v22 = vld [vmem:[%s5326_s9 + $0x230] sm:$0xff] }
 0x113   : > { %3329 = vst [vmem:[%s5343_s17 + $0x258] sm:$0xff] %v2030_v18  ;;  %2192 = vmatmul.bf16.gmra.mxu2 %v5032_v22 }
 0x114   : > { %v4039_v27 = vadd.f32 %v4038_v20, %v3784_v25 }
 0x119   : > { %v1878_v29 = vpop.f32.mrf.mxu0 }
 0x11a   : > { %3268 = vst [vmem:[%s5343_s17 + $0x70] sm:$0xff] %v1878_v29  ;;  %v3523_v31 = vadd.f32 %v3522_v24, %v1878_v29  ;;  %v3785_v32 = vmul.f32 %v1878_v29, %v1878_v29  ;;  %v2033_v24 = vpop.f32.mrf.mxu1  ;;  %v4982_v29 = vld [vmem:[%s5326_s9 + $0xa0] sm:$0xff] }
 0x11b   : > { %3330 = vst [vmem:[%s5343_s17 + $0x260] sm:$0xff] %v2033_v24 }
 0x11c   : > { %v4040_v33 = vadd.f32 %v4039_v27, %v3785_v32  ;;  %1917 = vmatmul.bf16.gmra.mxu0 %v4977_v28  ;;  %v5008_v27 = vld [vmem:[%s5326_s9 + $0x170] sm:$0xff] }
 0x11d   : > { %2072 = vmatmul.bf16.gmra.mxu1 %v5008_v27 }
 0x121   : > { %v1880_v35 = vpop.f32.mrf.mxu0 }
 0x122   : > { %3269 = vst [vmem:[%s5343_s17 + $0x78] sm:$0xff] %v1880_v35  ;;  %v3524_v37 = vadd.f32 %v3523_v31, %v1880_v35  ;;  %v3786_v38 = vmul.f32 %v1880_v35, %v1880_v35  ;;  %v2035_v31 = vpop.f32.mrf.mxu1  ;;  %v5033_v35 = vld [vmem:[%s5326_s9 + $0x238] sm:$0xff] }
 0x123   : > { %3331 = vst [vmem:[%s5343_s17 + $0x268] sm:$0xff] %v2035_v31  ;;  %2197 = vmatmul.bf16.gmra.mxu2 %v5033_v35 }
 0x124   : > { %v4041_v40 = vadd.f32 %v4040_v33, %v3786_v38 }
 0x129   : > { %v1883_v42 = vpop.f32.mrf.mxu0 }
 0x12a   : > { %3270 = vst [vmem:[%s5343_s17 + $0x80] sm:$0xff] %v1883_v42  ;;  %v3525_v44 = vadd.f32 %v3524_v37, %v1883_v42  ;;  %v3787_v45 = vmul.f32 %v1883_v42, %v1883_v42  ;;  %v2038_v37 = vpop.f32.mrf.mxu1  ;;  %v4983_v42 = vld [vmem:[%s5326_s9 + $0xa8] sm:$0xff] }
 0x12b   : > { %3332 = vst [vmem:[%s5343_s17 + $0x270] sm:$0xff] %v2038_v37 }
 0x12c   : > { %v4042_v46 = vadd.f32 %v4041_v40, %v3787_v45  ;;  %1922 = vmatmul.bf16.gmra.mxu0 %v4978_v41  ;;  %v5009_v40 = vld [vmem:[%s5326_s9 + $0x178] sm:$0xff] }
 0x12d   : > { %2077 = vmatmul.bf16.gmra.mxu1 %v5009_v40 }
 0x131   : > { %v1885_v48 = vpop.f32.mrf.mxu0 }
 0x132   : > { %3271 = vst [vmem:[%s5343_s17 + $0x88] sm:$0xff] %v1885_v48  ;;  %v3526_v50 = vadd.f32 %v3525_v44, %v1885_v48  ;;  %v3788_v51 = vmul.f32 %v1885_v48, %v1885_v48  ;;  %v2040_v44 = vpop.f32.mrf.mxu1  ;;  %v5034_v48 = vld [vmem:[%s5326_s9 + $0x240] sm:$0xff] }
 0x133   : > { %3333 = vst [vmem:[%s5343_s17 + $0x278] sm:$0xff] %v2040_v44  ;;  %2202 = vmatmul.bf16.gmra.mxu2 %v5034_v48  ;;  %v5038_v48 = vld [vmem:[%s5326_s9 + $0x260] sm:$0xff] }
 0x134   : > { %v4043_v53 = vadd.f32 %v4042_v46, %v3788_v51 }
 0x139   : > { %v1888_v55 = vpop.f32.mrf.mxu0 }
 0x13a   : > { %3272 = vst [vmem:[%s5343_s17 + $0x90] sm:$0xff] %v1888_v55  ;;  %v3527_v57 = vadd.f32 %v3526_v50, %v1888_v55  ;;  %v3789_v58 = vmul.f32 %v1888_v55, %v1888_v55  ;;  %v2043_v51 = vpop.f32.mrf.mxu1  ;;  %v5010_v55 = vld [vmem:[%s5326_s9 + $0x180] sm:$0xff] }
 0x13b   : > { %3334 = vst [vmem:[%s5343_s17 + $0x280] sm:$0xff] %v2043_v51 }
 0x13c   : > { %v4044_v59 = vadd.f32 %v4043_v53, %v3789_v58  ;;  %1927 = vmatmul.bf16.gmra.mxu0 %v4979_v54  ;;  %v2163_v54 = vpop.f32.mrf.mxu2 }
 0x13d   : > { %3382 = vst [vmem:[%s5343_s17 + $0x400] sm:$0xff] %v2163_v54  ;;  %2082 = vmatmul.bf16.gmra.mxu1 %v5010_v55  ;;  %v5014_v55 = vld [vmem:[%s5326_s9 + $0x1a0] sm:$0xff] }
 0x141   : > { %v1890_v61 = vpop.f32.mrf.mxu0 }
 0x142   : > { %3273 = vst [vmem:[%s5343_s17 + $0x98] sm:$0xff] %v1890_v61  ;;  %v3528_v63 = vadd.f32 %v3527_v57, %v1890_v61  ;;  %v3790_v0 = vmul.f32 %v1890_v61, %v1890_v61  ;;  %v4984_v57 = vld [vmem:[%s5326_s9 + $0xb0] sm:$0xff] }
 0x144   : > { %v4045_v2 = vadd.f32 %v4044_v59, %v3790_v0  ;;  %v2045_v59 = vpop.f32.mrf.mxu1  ;;  %v2165_v62 = vpop.f32.mrf.mxu2  ;;  %v5035_v0 = vld [vmem:[%s5326_s9 + $0x248] sm:$0xff] }
 0x145   : > { %3335 = vst [vmem:[%s5343_s17 + $0x288] sm:$0xff] %v2045_v59  ;;  %2207 = vmatmul.bf16.gmra.mxu2 %v5035_v0  ;;  %v5039_v0 = vld [vmem:[%s5326_s9 + $0x268] sm:$0xff] }
 0x146   : > { %3383 = vst [vmem:[%s5343_s17 + $0x408] sm:$0xff] %v2165_v62 }
 0x149   : > { %v1893_v4 = vpop.f32.mrf.mxu0 }
 0x14a   : > { %3274 = vst [vmem:[%s5343_s17 + $0xa0] sm:$0xff] %v1893_v4  ;;  %v3529_v6 = vadd.f32 %v3528_v63, %v1893_v4  ;;  %v3791_v7 = vmul.f32 %v1893_v4, %v1893_v4 }
 0x14c   : > { %v4046_v8 = vadd.f32 %v4045_v2, %v3791_v7  ;;  %1932 = vmatmul.bf16.gmra.mxu0 %v4980_v3  ;;  %v2048_v3 = vpop.f32.mrf.mxu1  ;;  %v5011_v7 = vld [vmem:[%s5326_s9 + $0x188] sm:$0xff] }
 0x14d   : > { %3336 = vst [vmem:[%s5343_s17 + $0x290] sm:$0xff] %v2048_v3  ;;  %2087 = vmatmul.bf16.gmra.mxu1 %v5011_v7  ;;  %v5015_v7 = vld [vmem:[%s5326_s9 + $0x1a8] sm:$0xff] }
 0x151   : > { %v1895_v10 = vpop.f32.mrf.mxu0 }
 0x152   : > { %3275 = vst [vmem:[%s5343_s17 + $0xa8] sm:$0xff] %v1895_v10  ;;  %v3530_v12 = vadd.f32 %v3529_v6, %v1895_v10  ;;  %v3792_v13 = vmul.f32 %v1895_v10, %v1895_v10  ;;  %v2168_v6 = vpop.f32.mrf.mxu2 }
 0x153   : > { %3384 = vst [vmem:[%s5343_s17 + $0x410] sm:$0xff] %v2168_v6 }
 0x154   : > { %v4047_v15 = vadd.f32 %v4046_v8, %v3792_v13  ;;  %v2050_v11 = vpop.f32.mrf.mxu1 }
 0x155   : > { %3337 = vst [vmem:[%s5343_s17 + $0x298] sm:$0xff] %v2050_v11 }
 0x159   : > { %v1898_v17 = vpop.f32.mrf.mxu0 }
 0x15a   : > { %3276 = vst [vmem:[%s5343_s17 + $0xb0] sm:$0xff] %v1898_v17  ;;  %v3531_v19 = vadd.f32 %v3530_v12, %v1898_v17  ;;  %v3793_v20 = vmul.f32 %v1898_v17, %v1898_v17  ;;  %v2170_v14 = vpop.f32.mrf.mxu2  ;;  %v5060_v17 = vld [vmem:[%s5326_s9 + $0x310] sm:$0xff] }
 0x15b   : > { %3385 = vst [vmem:[%s5343_s17 + $0x418] sm:$0xff] %v2170_v14  ;;  %2332 = vmatmul.bf16.gmra.mxu3 %v5060_v17  ;;  %v5064_v17 = vld [vmem:[%s5326_s9 + $0x330] sm:$0xff] }
 0x15c   : > { %v4048_v21 = vadd.f32 %v4047_v15, %v3793_v20  ;;  %1937 = vmatmul.bf16.gmra.mxu0 %v4981_v16  ;;  %v5036_v16 = vld [vmem:[%s5326_s9 + $0x250] sm:$0xff] }
 0x15d   : > { %2212 = vmatmul.bf16.gmra.mxu2 %v5036_v16  ;;  %v5040_v16 = vld [vmem:[%s5326_s9 + $0x270] sm:$0xff] }
 0x161   : > { %v1900_v23 = vpop.f32.mrf.mxu0 }
 0x162   : > { %3277 = vst [vmem:[%s5343_s17 + $0xb8] sm:$0xff] %v1900_v23  ;;  %v3532_v25 = vadd.f32 %v3531_v19, %v1900_v23  ;;  %v3794_v26 = vmul.f32 %v1900_v23, %v1900_v23  ;;  %v2053_v19 = vpop.f32.mrf.mxu1  ;;  %v2173_v22 = vpop.f32.mrf.mxu2  ;;  %v5012_v23 = vld [vmem:[%s5326_s9 + $0x190] sm:$0xff] }
 0x163   : > { %3338 = vst [vmem:[%s5343_s17 + $0x2a0] sm:$0xff] %v2053_v19  ;;  %2092 = vmatmul.bf16.gmra.mxu1 %v5012_v23  ;;  %v5016_v23 = vld [vmem:[%s5326_s9 + $0x1b0] sm:$0xff] }
 0x164   : > { %v4049_v28 = vadd.f32 %v4048_v21, %v3794_v26  ;;  %3386 = vst [vmem:[%s5343_s17 + $0x420] sm:$0xff] %v2173_v22 }
 0x169   : > { %v1903_v30 = vpop.f32.mrf.mxu0 }
 0x16a   : > { %3278 = vst [vmem:[%s5343_s17 + $0xc0] sm:$0xff] %v1903_v30  ;;  %v3533_v32 = vadd.f32 %v3532_v25, %v1903_v30  ;;  %v3795_v33 = vmul.f32 %v1903_v30, %v1903_v30  ;;  %v4986_v25 = vld [vmem:[%s5326_s9 + $0xc0] sm:$0xff]  ;;  %v2055_v27 = vpop.f32.mrf.mxu1  ;;  %v2175_v30 = vpop.f32.mrf.mxu2 }
 0x16b   : > { %3339 = vst [vmem:[%s5343_s17 + $0x2a8] sm:$0xff] %v2055_v27 }
 0x16c   : > { %v4050_v34 = vadd.f32 %v4049_v28, %v3795_v33  ;;  %1942 = vmatmul.bf16.gmra.mxu0 %v4982_v29  ;;  %3387 = vst [vmem:[%s5343_s17 + $0x428] sm:$0xff] %v2175_v30  ;;  %v5061_v33 = vld [vmem:[%s5326_s9 + $0x318] sm:$0xff] }
 0x16d   : > { %2337 = vmatmul.bf16.gmra.mxu3 %v5061_v33  ;;  %v5065_v33 = vld [vmem:[%s5326_s9 + $0x338] sm:$0xff] }
 0x171   : > { %v1905_v36 = vpop.f32.mrf.mxu0 }
 0x172   : > { %3279 = vst [vmem:[%s5343_s17 + $0xc8] sm:$0xff] %v1905_v36  ;;  %v3534_v38 = vadd.f32 %v3533_v32, %v1905_v36  ;;  %v3796_v39 = vmul.f32 %v1905_v36, %v1905_v36  ;;  %v5037_v32 = vld [vmem:[%s5326_s9 + $0x258] sm:$0xff]  ;;  %v2058_v35 = vpop.f32.mrf.mxu1 }
 0x173   : > { %2217 = vmatmul.bf16.gmra.mxu2 %v5037_v32  ;;  %3340 = vst [vmem:[%s5343_s17 + $0x2b0] sm:$0xff] %v2058_v35  ;;  %v5041_v32 = vld [vmem:[%s5326_s9 + $0x278] sm:$0xff] }
 0x174   : > { %v4051_v41 = vadd.f32 %v4050_v34, %v3796_v39  ;;  %v5013_v39 = vld [vmem:[%s5326_s9 + $0x198] sm:$0xff] }
 0x175   : > { %2097 = vmatmul.bf16.gmra.mxu1 %v5013_v39  ;;  %v5017_v39 = vld [vmem:[%s5326_s9 + $0x1b8] sm:$0xff] }
 0x179   : > { %v1908_v43 = vpop.f32.mrf.mxu0 }
 0x17a   : > { %3280 = vst [vmem:[%s5343_s17 + $0xd0] sm:$0xff] %v1908_v43  ;;  %v3535_v45 = vadd.f32 %v3534_v38, %v1908_v43  ;;  %v3797_v46 = vmul.f32 %v1908_v43, %v1908_v43  ;;  %v2178_v38 = vpop.f32.mrf.mxu2  ;;  %v2060_v43 = vpop.f32.mrf.mxu1 }
 0x17b   : > { %3388 = vst [vmem:[%s5343_s17 + $0x430] sm:$0xff] %v2178_v38 }
 0x17c   : > { %v4052_v47 = vadd.f32 %v4051_v41, %v3797_v46  ;;  %1947 = vmatmul.bf16.gmra.mxu0 %v4983_v42  ;;  %v4987_v41 = vld [vmem:[%s5326_s9 + $0xc8] sm:$0xff]  ;;  %3341 = vst [vmem:[%s5343_s17 + $0x2b8] sm:$0xff] %v2060_v43 }
 0x17d   : > { %2342 = vmatmul.bf16.gmra.mxu3 %v5062_v49  ;;  %v5066_v49 = vld [vmem:[%s5326_s9 + $0x340] sm:$0xff] }
 0x181   : > { %v1910_v50 = vpop.f32.mrf.mxu0 }
 0x182   : > { %3281 = vst [vmem:[%s5343_s17 + $0xd8] sm:$0xff] %v1910_v50  ;;  %v3536_v52 = vadd.f32 %v3535_v45, %v1910_v50  ;;  %v3798_v53 = vmul.f32 %v1910_v50, %v1910_v50  ;;  %v2180_v46 = vpop.f32.mrf.mxu2  ;;  %v5465_v51 = vpop.f32.mrf.mxu1 }
 0x183   : > { %3389 = vst [vmem:[%s5343_s17 + $0x438] sm:$0xff] %v2180_v46  ;;  %2222 = vmatmul.bf16.gmra.mxu2 %v5038_v48  ;;  %v5042_v48 = vld [vmem:[%s5326_s9 + $0x280] sm:$0xff] }
 0x184   : > { %v4053_v56 = vadd.f32 %v4052_v47, %v3798_v53  ;;  %3342 = vst [vmem:[%s5343_s17 + $0x2c0] sm:$0xff] %v5465_v51 }
 0x185   : > { %2102 = vmatmul.bf16.gmra.mxu1 %v5014_v55 }
 0x189   : > { %v1913_v58 = vpop.f32.mrf.mxu0 }
 0x18a   : > { %3282 = vst [vmem:[%s5343_s17 + $0xe0] sm:$0xff] %v1913_v58  ;;  %v3537_v60 = vadd.f32 %v3536_v52, %v1913_v58  ;;  %v3799_v61 = vmul.f32 %v1913_v58, %v1913_v58  ;;  %v2183_v54 = vpop.f32.mrf.mxu2  ;;  %v5473_v59 = vpop.f32.mrf.mxu1 }
 0x18b   : > { %3390 = vst [vmem:[%s5343_s17 + $0x440] sm:$0xff] %v2183_v54 }
 0x18c   : > { %v4054_v63 = vadd.f32 %v4053_v56, %v3799_v61  ;;  %1952 = vmatmul.bf16.gmra.mxu0 %v4984_v57  ;;  %v4988_v57 = vld [vmem:[%s5326_s9 + $0xd0] sm:$0xff]  ;;  %3343 = vst [vmem:[%s5343_s17 + $0x2c8] sm:$0xff] %v5473_v59 }
 0x18d   : > { %2347 = vmatmul.bf16.gmra.mxu3 %v5063_v1 }
 0x191   : > { %v1915_v2 = vpop.f32.mrf.mxu0 }
 0x192   : > { %3283 = vst [vmem:[%s5343_s17 + $0xe8] sm:$0xff] %v1915_v2  ;;  %v3538_v4 = vadd.f32 %v3537_v60, %v1915_v2  ;;  %v3800_v5 = vmul.f32 %v1915_v2, %v1915_v2  ;;  %v2185_v62 = vpop.f32.mrf.mxu2  ;;  %v5481_v3 = vpop.f32.mrf.mxu1 }
 0x193   : > { %3391 = vst [vmem:[%s5343_s17 + $0x448] sm:$0xff] %v2185_v62  ;;  %2227 = vmatmul.bf16.gmra.mxu2 %v5039_v0 }
 0x194   : > { %v4055_v8 = vadd.f32 %v4054_v63, %v3800_v5  ;;  %3344 = vst [vmem:[%s5343_s17 + $0x2d0] sm:$0xff] %v5481_v3 }
 0x195   : > { %2107 = vmatmul.bf16.gmra.mxu1 %v5015_v7 }
 0x199   : > { %v1918_v10 = vpop.f32.mrf.mxu0 }
 0x19a   : > { %3284 = vst [vmem:[%s5343_s17 + $0xf0] sm:$0xff] %v1918_v10  ;;  %v3539_v12 = vadd.f32 %v3538_v4, %v1918_v10  ;;  %v3801_v13 = vmul.f32 %v1918_v10, %v1918_v10  ;;  %v2188_v6 = vpop.f32.mrf.mxu2  ;;  %v5489_v11 = vpop.f32.mrf.mxu1 }
 0x19b   : > { %3392 = vst [vmem:[%s5343_s17 + $0x450] sm:$0xff] %v2188_v6  ;;  %v5067_v6 = vld [vmem:[%s5326_s9 + $0x348] sm:$0xff] }
 0x19c   : > { %v4056_v15 = vadd.f32 %v4055_v8, %v3801_v13  ;;  %1957 = vmatmul.bf16.gmra.mxu0 %v4985_v9  ;;  %v4989_v9 = vld [vmem:[%s5326_s9 + $0xd8] sm:$0xff]  ;;  %3345 = vst [vmem:[%s5343_s17 + $0x2d8] sm:$0xff] %v5489_v11 }
 0x19d   : > { %2352 = vmatmul.bf16.gmra.mxu3 %v5064_v17 }
 0x1a1   : > { %v1920_v18 = vpop.f32.mrf.mxu0 }
 0x1a2   : > { %3285 = vst [vmem:[%s5343_s17 + $0xf8] sm:$0xff] %v1920_v18  ;;  %v3540_v20 = vadd.f32 %v3539_v12, %v1920_v18  ;;  %v3802_v21 = vmul.f32 %v1920_v18, %v1920_v18  ;;  %v2190_v14 = vpop.f32.mrf.mxu2  ;;  %v5497_v19 = vpop.f32.mrf.mxu1 }
 0x1a3   : > { %3393 = vst [vmem:[%s5343_s17 + $0x458] sm:$0xff] %v2190_v14  ;;  %2232 = vmatmul.bf16.gmra.mxu2 %v5040_v16  ;;  %v5019_v14 = vld [vmem:[%s5326_s9 + $0x1c8] sm:$0xff]  ;;  %v4993_v16 = vld [vmem:[%s5326_s9 + $0xf8] sm:$0xff] }
 0x1a4   : > { %v4057_v24 = vadd.f32 %v4056_v15, %v3802_v21  ;;  %3346 = vst [vmem:[%s5343_s17 + $0x2e0] sm:$0xff] %v5497_v19 }
 0x1a5   : > { %2112 = vmatmul.bf16.gmra.mxu1 %v5016_v23 }
 0x1a9   : > { %v1923_v26 = vpop.f32.mrf.mxu0 }
 0x1aa   : > { %3286 = vst [vmem:[%s5343_s17 + $0x100] sm:$0xff] %v1923_v26  ;;  %v3541_v28 = vadd.f32 %v3540_v20, %v1923_v26  ;;  %v3803_v29 = vmul.f32 %v1923_v26, %v1923_v26  ;;  %v2193_v22 = vpop.f32.mrf.mxu2  ;;  %v5505_v27 = vpop.f32.mrf.mxu1 }
 0x1ab   : > { %3394 = vst [vmem:[%s5343_s17 + $0x460] sm:$0xff] %v2193_v22 }
 0x1ac   : > { %v4058_v31 = vadd.f32 %v4057_v24, %v3803_v29  ;;  %1962 = vmatmul.bf16.gmra.mxu0 %v4986_v25  ;;  %v4990_v25 = vld [vmem:[%s5326_s9 + $0xe0] sm:$0xff]  ;;  %3347 = vst [vmem:[%s5343_s17 + $0x2e8] sm:$0xff] %v5505_v27 }
 0x1ad   : > { %2357 = vmatmul.bf16.gmra.mxu3 %v5065_v33 }
 0x1b1   : > { %v1925_v34 = vpop.f32.mrf.mxu0 }
 0x1b2   : > { %3287 = vst [vmem:[%s5343_s17 + $0x108] sm:$0xff] %v1925_v34  ;;  %v3804_v36 = vmul.f32 %v1925_v34, %v1925_v34  ;;  %v3542_v37 = vadd.f32 %v3541_v28, %v1925_v34  ;;  %v2195_v30 = vpop.f32.mrf.mxu2  ;;  %v5513_v35 = vpop.f32.mrf.mxu1 }
 0x1b3   : > { %3395 = vst [vmem:[%s5343_s17 + $0x468] sm:$0xff] %v2195_v30  ;;  %2237 = vmatmul.bf16.gmra.mxu2 %v5041_v32 }
 0x1b4   : > { %v4059_v40 = vadd.f32 %v4058_v31, %v3804_v36  ;;  %3348 = vst [vmem:[%s5343_s17 + $0x2f0] sm:$0xff] %v5513_v35 }
 0x1b5   : > { %2117 = vmatmul.bf16.gmra.mxu1 %v5017_v39 }
 0x1b9   : > { %v1928_v42 = vpop.f32.mrf.mxu0 }
 0x1ba   : > { %3288 = vst [vmem:[%s5343_s17 + $0x110] sm:$0xff] %v1928_v42  ;;  %v3543_v44 = vadd.f32 %v3542_v37, %v1928_v42  ;;  %v3805_v45 = vmul.f32 %v1928_v42, %v1928_v42  ;;  %v2198_v38 = vpop.f32.mrf.mxu2  ;;  %v5521_v43 = vpop.f32.mrf.mxu1 }
 0x1bb   : > { %3396 = vst [vmem:[%s5343_s17 + $0x470] sm:$0xff] %v2198_v38 }
 0x1bc   : > { %v4060_v47 = vadd.f32 %v4059_v40, %v3805_v45  ;;  %1967 = vmatmul.bf16.gmra.mxu0 %v4987_v41  ;;  %v4991_v41 = vld [vmem:[%s5326_s9 + $0xe8] sm:$0xff]  ;;  %3349 = vst [vmem:[%s5343_s17 + $0x2f8] sm:$0xff] %v5521_v43 }
 0x1bd   : > { %2362 = vmatmul.bf16.gmra.mxu3 %v5066_v49 }
 0x1c1   : > { %v1930_v50 = vpop.f32.mrf.mxu0 }
 0x1c2   : > { %3289 = vst [vmem:[%s5343_s17 + $0x118] sm:$0xff] %v1930_v50  ;;  %v3806_v52 = vmul.f32 %v1930_v50, %v1930_v50  ;;  %v3544_v53 = vadd.f32 %v3543_v44, %v1930_v50  ;;  %v2200_v46 = vpop.f32.mrf.mxu2 }
 0x1c3   : > { %3397 = vst [vmem:[%s5343_s17 + $0x478] sm:$0xff] %v2200_v46  ;;  %2242 = vmatmul.bf16.gmra.mxu2 %v5042_v48  ;;  %v5069_v46 = vld [vmem:[%s5326_s9 + $0x358] sm:$0xff] }
 0x1c4   : > { %v4061_v56 = vadd.f32 %v4060_v47, %v3806_v52  ;;  %v5529_v52 = vpop.f32.mrf.mxu1 }
 0x1c5   : > { %3350 = vst [vmem:[%s5343_s17 + $0x300] sm:$0xff] %v5529_v52 }
 0x1c9   : > { %v1933_v58 = vpop.f32.mrf.mxu0 }
 0x1ca   : > { %3290 = vst [vmem:[%s5343_s17 + $0x120] sm:$0xff] %v1933_v58  ;;  %v3545_v60 = vadd.f32 %v3544_v53, %v1933_v58  ;;  %v3807_v61 = vmul.f32 %v1933_v58, %v1933_v58  ;;  %v2203_v55 = vpop.f32.mrf.mxu2 }
 0x1cb   : > { %3398 = vst [vmem:[%s5343_s17 + $0x480] sm:$0xff] %v2203_v55  ;;  %v5021_v55 = vld [vmem:[%s5326_s9 + $0x1d8] sm:$0xff] }
 0x1cc   : > { %v4062_v63 = vadd.f32 %v4061_v56, %v3807_v61  ;;  %1972 = vmatmul.bf16.gmra.mxu0 %v4988_v57  ;;  %v2323_v56 = vpop.f32.mrf.mxu3  ;;  %v5018_v57 = vld [vmem:[%s5326_s9 + $0x1c0] sm:$0xff]  ;;  %v5538_v62 = vpop.f32.mrf.mxu1 }
 0x1cd   : > { %3446 = vst [vmem:[%s5343_s17 + $0x600] sm:$0xff] %v2323_v56  ;;  %2122 = vmatmul.bf16.gmra.mxu1 %v5018_v57  ;;  %2367 = vmatmul.bf16.gmra.mxu3 %v5067_v6 }
 0x1ce   : > { %3351 = vst [vmem:[%s5343_s17 + $0x308] sm:$0xff] %v5538_v62 }
 0x1d1   : > { %v1935_v2 = vpop.f32.mrf.mxu0 }
 0x1d2   : > { %3291 = vst [vmem:[%s5343_s17 + $0x128] sm:$0xff] %v1935_v2  ;;  %v3808_v4 = vmul.f32 %v1935_v2, %v1935_v2  ;;  %v3546_v5 = vadd.f32 %v3545_v60, %v1935_v2  ;;  %v4992_v60 = vld [vmem:[%s5326_s9 + $0xf0] sm:$0xff]  ;;  %v2205_v1 = vpop.f32.mrf.mxu2 }
 0x1d3   : > { %3399 = vst [vmem:[%s5343_s17 + $0x488] sm:$0xff] %v2205_v1 }
 0x1d4   : > { %v4063_v8 = vadd.f32 %v4062_v63, %v3808_v4  ;;  %v2325_v2 = vpop.f32.mrf.mxu3 }
 0x1d5   : > { %3447 = vst [vmem:[%s5343_s17 + $0x608] sm:$0xff] %v2325_v2  ;;  %v5046_v2 = vld [vmem:[%s5326_s9 + $0x2a0] sm:$0xff] }
 0x1d9   : > { %v1938_v10 = vpop.f32.mrf.mxu0 }
 0x1da   : > { %3292 = vst [vmem:[%s5343_s17 + $0x130] sm:$0xff] %v1938_v10  ;;  %v3547_v12 = vadd.f32 %v3546_v5, %v1938_v10  ;;  %v3809_v13 = vmul.f32 %v1938_v10, %v1938_v10  ;;  %v5043_v5 = vld [vmem:[%s5326_s9 + $0x288] sm:$0xff] }
 0x1db   : > { %2247 = vmatmul.bf16.gmra.mxu2 %v5043_v5 }
 0x1dc   : > { %v4064_v15 = vadd.f32 %v4063_v8, %v3809_v13  ;;  %1977 = vmatmul.bf16.gmra.mxu0 %v4989_v9  ;;  %v5547_v8 = vpop.f32.mrf.mxu1  ;;  %v2328_v13 = vpop.f32.mrf.mxu3 }
 0x1dd   : > { %3352 = vst [vmem:[%s5343_s17 + $0x310] sm:$0xff] %v5547_v8  ;;  %2127 = vmatmul.bf16.gmra.mxu1 %v5019_v14 }
 0x1de   : > { %3448 = vst [vmem:[%s5343_s17 + $0x610] sm:$0xff] %v2328_v13  ;;  %v5022_v13 = vld [vmem:[%s5326_s9 + $0x1e0] sm:$0xff] }
 0x1e1   : > { %v1940_v18 = vpop.f32.mrf.mxu0 }
 0x1e2   : > { %3293 = vst [vmem:[%s5343_s17 + $0x138] sm:$0xff] %v1940_v18  ;;  %v3810_v20 = vmul.f32 %v1940_v18, %v1940_v18  ;;  %v3548_v21 = vadd.f32 %v3547_v12, %v1940_v18  ;;  %v2208_v12 = vpop.f32.mrf.mxu2 }
 0x1e3   : > { %3400 = vst [vmem:[%s5343_s17 + $0x490] sm:$0xff] %v2208_v12 }
 0x1e4   : > { %v4065_v24 = vadd.f32 %v4064_v15, %v3810_v20  ;;  %v5556_v18 = vpop.f32.mrf.mxu1  ;;  %v2330_v23 = vpop.f32.mrf.mxu3 }
 0x1e5   : > { %3353 = vst [vmem:[%s5343_s17 + $0x318] sm:$0xff] %v5556_v18 }
 0x1e6   : > { %3449 = vst [vmem:[%s5343_s17 + $0x618] sm:$0xff] %v2330_v23 }
 0x1e9   : > { %v1943_v26 = vpop.f32.mrf.mxu0 }
 0x1ea   : > { %3294 = vst [vmem:[%s5343_s17 + $0x140] sm:$0xff] %v1943_v26  ;;  %v3549_v28 = vadd.f32 %v3548_v21, %v1943_v26  ;;  %v3811_v29 = vmul.f32 %v1943_v26, %v1943_v26  ;;  %v2210_v22 = vpop.f32.mrf.mxu2  ;;  %v5068_v26 = vld [vmem:[%s5326_s9 + $0x350] sm:$0xff] }
 0x1eb   : > { %3401 = vst [vmem:[%s5343_s17 + $0x498] sm:$0xff] %v2210_v22  ;;  %2372 = vmatmul.bf16.gmra.mxu3 %v5068_v26 }
 0x1ec   : > { %v4066_v31 = vadd.f32 %v4065_v24, %v3811_v29  ;;  %1982 = vmatmul.bf16.gmra.mxu0 %v4990_v25  ;;  %v5044_v25 = vld [vmem:[%s5326_s9 + $0x290] sm:$0xff]  ;;  %v5565_v29 = vpop.f32.mrf.mxu1  ;;  %v2333_v33 = vpop.f32.mrf.mxu3 }
 0x1ed   : > { %2252 = vmatmul.bf16.gmra.mxu2 %v5044_v25  ;;  %3354 = vst [vmem:[%s5343_s17 + $0x320] sm:$0xff] %v5565_v29  ;;  %v5071_v25 = vld [vmem:[%s5326_s9 + $0x368] sm:$0xff] }
 0x1ee   : > { %3450 = vst [vmem:[%s5343_s17 + $0x620] sm:$0xff] %v2333_v33 }
 0x1f1   : > { %v1945_v34 = vpop.f32.mrf.mxu0 }
 0x1f2   : > { %3295 = vst [vmem:[%s5343_s17 + $0x148] sm:$0xff] %v1945_v34  ;;  %v3550_v36 = vadd.f32 %v3549_v28, %v1945_v34  ;;  %v3812_v37 = vmul.f32 %v1945_v34, %v1945_v34  ;;  %v2213_v32 = vpop.f32.mrf.mxu2  ;;  %v5020_v34 = vld [vmem:[%s5326_s9 + $0x1d0] sm:$0xff] }
 0x1f3   : > { %3402 = vst [vmem:[%s5343_s17 + $0x4a0] sm:$0xff] %v2213_v32  ;;  %2132 = vmatmul.bf16.gmra.mxu1 %v5020_v34  ;;  %v5023_v32 = vld [vmem:[%s5326_s9 + $0x1e8] sm:$0xff] }
 0x1f4   : > { %v4067_v40 = vadd.f32 %v4066_v31, %v3812_v37  ;;  %v5573_v38 = vpop.f32.mrf.mxu1 }
 0x1f5   : > { %3355 = vst [vmem:[%s5343_s17 + $0x328] sm:$0xff] %v5573_v38 }
 0x1f9   : > { %v1948_v42 = vpop.f32.mrf.mxu0 }
 0x1fa   : > { %3296 = vst [vmem:[%s5343_s17 + $0x150] sm:$0xff] %v1948_v42  ;;  %v3551_v44 = vadd.f32 %v3550_v36, %v1948_v42  ;;  %v3813_v45 = vmul.f32 %v1948_v42, %v1948_v42  ;;  %v2335_v42 = vpop.f32.mrf.mxu3 }
 0x1fb   : > { %3451 = vst [vmem:[%s5343_s17 + $0x628] sm:$0xff] %v2335_v42  ;;  %2377 = vmatmul.bf16.gmra.mxu3 %v5069_v46  ;;  %v5024_v46 = vld [vmem:[%s5326_s9 + $0x1f0] sm:$0xff] }
 0x1fc   : > { %v4068_v47 = vadd.f32 %v4067_v40, %v3813_v45  ;;  %1987 = vmatmul.bf16.gmra.mxu0 %v4991_v41  ;;  %v2215_v41 = vpop.f32.mrf.mxu2  ;;  %v5045_v45 = vld [vmem:[%s5326_s9 + $0x298] sm:$0xff]  ;;  %v5582_v48 = vpop.f32.mrf.mxu1 }
 0x1fd   : > { %3403 = vst [vmem:[%s5343_s17 + $0x4a8] sm:$0xff] %v2215_v41  ;;  %2257 = vmatmul.bf16.gmra.mxu2 %v5045_v45 }
 0x1fe   : > { %3356 = vst [vmem:[%s5343_s17 + $0x330] sm:$0xff] %v5582_v48 }
 0x201   : > { %v1950_v50 = vpop.f32.mrf.mxu0 }
 0x202   : > { %3297 = vst [vmem:[%s5343_s17 + $0x158] sm:$0xff] %v1950_v50  ;;  %v3552_v53 = vadd.f32 %v3551_v44, %v1950_v50  ;;  %v3814_v54 = vmul.f32 %v1950_v50, %v1950_v50 }
 0x203   : > { %2137 = vmatmul.bf16.gmra.mxu1 %v5021_v55  ;;  %v5073_v55 = vld [vmem:[%s5326_s9 + $0x378] sm:$0xff] }
 0x204   : > { %v4069_v58 = vadd.f32 %v4068_v47, %v3814_v54  ;;  %v2338_v54 = vpop.f32.mrf.mxu3 }
 0x205   : > { %3452 = vst [vmem:[%s5343_s17 + $0x630] sm:$0xff] %v2338_v54  ;;  %v5049_v54 = vld [vmem:[%s5326_s9 + $0x2b8] sm:$0xff] }
 0x209   : > { %v1953_v61 = vpop.f32.mrf.mxu0 }
 0x20a   : > { %3298 = vst [vmem:[%s5343_s17 + $0x160] sm:$0xff] %v1953_v61  ;;  %v3553_v63 = vadd.f32 %v3552_v53, %v1953_v61  ;;  %v3815_v0 = vmul.f32 %v1953_v61, %v1953_v61  ;;  %v2218_v53 = vpop.f32.mrf.mxu2 }
 0x20b   : > { %3404 = vst [vmem:[%s5343_s17 + $0x4b0] sm:$0xff] %v2218_v53 }
 0x20c   : > { %v4070_v4 = vadd.f32 %v4069_v58, %v3815_v0  ;;  %1992 = vmatmul.bf16.gmra.mxu0 %v4992_v60  ;;  %v5590_v58 = vpop.f32.mrf.mxu1  ;;  %v2340_v0 = vpop.f32.mrf.mxu3 }
 0x20d   : > { %3357 = vst [vmem:[%s5343_s17 + $0x338] sm:$0xff] %v5590_v58  ;;  %2262 = vmatmul.bf16.gmra.mxu2 %v5046_v2 }
 0x20e   : > { %3453 = vst [vmem:[%s5343_s17 + $0x638] sm:$0xff] %v2340_v0 }
 0x211   : > { %v1955_v7 = vpop.f32.mrf.mxu0 }
 0x212   : > { %3299 = vst [vmem:[%s5343_s17 + $0x168] sm:$0xff] %v1955_v7  ;;  %v3554_v9 = vadd.f32 %v3553_v63, %v1955_v7  ;;  %v3816_v10 = vmul.f32 %v1955_v7, %v1955_v7  ;;  %v2220_v63 = vpop.f32.mrf.mxu2 }
 0x213   : > { %3405 = vst [vmem:[%s5343_s17 + $0x4b8] sm:$0xff] %v2220_v63  ;;  %2142 = vmatmul.bf16.gmra.mxu1 %v5022_v13  ;;  %v5025_v63 = vld [vmem:[%s5326_s9 + $0x1f8] sm:$0xff] }
 0x214   : > { %v4071_v15 = vadd.f32 %v4070_v4, %v3816_v10  ;;  %v5070_v4 = vld [vmem:[%s5326_s9 + $0x360] sm:$0xff]  ;;  %v5599_v6 = vpop.f32.mrf.mxu1  ;;  %v2343_v12 = vpop.f32.mrf.mxu3 }
 0x215   : > { %2382 = vmatmul.bf16.gmra.mxu3 %v5070_v4  ;;  %3358 = vst [vmem:[%s5343_s17 + $0x340] sm:$0xff] %v5599_v6 }
 0x216   : > { %3454 = vst [vmem:[%s5343_s17 + $0x640] sm:$0xff] %v2343_v12 }
 0x219   : > { %v1958_v17 = vpop.f32.mrf.mxu0 }
 0x21a   : > { %3300 = vst [vmem:[%s5343_s17 + $0x170] sm:$0xff] %v1958_v17  ;;  %v3555_v20 = vadd.f32 %v3554_v9, %v1958_v17  ;;  %v3817_v21 = vmul.f32 %v1958_v17, %v1958_v17  ;;  %v2223_v10 = vpop.f32.mrf.mxu2 }
 0x21b   : > { %3406 = vst [vmem:[%s5343_s17 + $0x4c0] sm:$0xff] %v2223_v10 }
 0x21c   : > { %v4072_v24 = vadd.f32 %v4071_v15, %v3817_v21  ;;  %1997 = vmatmul.bf16.gmra.mxu0 %v4993_v16  ;;  %v5607_v16 = vpop.f32.mrf.mxu1  ;;  %v2345_v22 = vpop.f32.mrf.mxu3 }
 0x21d   : > { %3359 = vst [vmem:[%s5343_s17 + $0x348] sm:$0xff] %v5607_v16 }
 0x21e   : > { %3455 = vst [vmem:[%s5343_s17 + $0x648] sm:$0xff] %v2345_v22 }
 0x221   : > { %v1960_v28 = vpop.f32.mrf.mxu0 }
 0x222   : > { %3301 = vst [vmem:[%s5343_s17 + $0x178] sm:$0xff] %v1960_v28  ;;  %v3556_v30 = vadd.f32 %v3555_v20, %v1960_v28  ;;  %v3818_v31 = vmul.f32 %v1960_v28, %v1960_v28  ;;  %v2225_v21 = vpop.f32.mrf.mxu2 }
 0x223   : > { %3407 = vst [vmem:[%s5343_s17 + $0x4c8] sm:$0xff] %v2225_v21  ;;  %2147 = vmatmul.bf16.gmra.mxu1 %v5023_v32 }
 0x224   : > { %v4073_v36 = vadd.f32 %v4072_v24, %v3818_v31  ;;  %v5047_v24 = vld [vmem:[%s5326_s9 + $0x2a8] sm:$0xff]  ;;  %v5622_v28 = vpop.f32.mrf.mxu1  ;;  %v2348_v31 = vpop.f32.mrf.mxu3 }
 0x225   : > { %2267 = vmatmul.bf16.gmra.mxu2 %v5047_v24  ;;  %2387 = vmatmul.bf16.gmra.mxu3 %v5071_v25  ;;  %3360 = vst [vmem:[%s5343_s17 + $0x350] sm:$0xff] %v5622_v28  ;;  %v5051_v24 = vld [vmem:[%s5326_s9 + $0x2c8] sm:$0xff] }
 0x226   : > { %3456 = vst [vmem:[%s5343_s17 + $0x650] sm:$0xff] %v2348_v31  ;;  %v5075_v25 = vld [vmem:[%s5326_s9 + $0x388] sm:$0xff] }
 0x229   : > { %v1963_v37 = vpop.f32.mrf.mxu0 }
 0x22a   : > { %3302 = vst [vmem:[%s5343_s17 + $0x180] sm:$0xff] %v1963_v37  ;;  %v3557_v39 = vadd.f32 %v3556_v30, %v1963_v37  ;;  %v3819_v40 = vmul.f32 %v1963_v37, %v1963_v37  ;;  %v2228_v30 = vpop.f32.mrf.mxu2 }
 0x22b   : > { %3408 = vst [vmem:[%s5343_s17 + $0x4d0] sm:$0xff] %v2228_v30 }
 0x22c   : > { %v4074_v44 = vadd.f32 %v4073_v36, %v3819_v40  ;;  %v5633_v34 = vpop.f32.mrf.mxu1  ;;  %v2350_v37 = vpop.f32.mrf.mxu3  ;;  %v5072_v40 = vld [vmem:[%s5326_s9 + $0x370] sm:$0xff] }
 0x22d   : > { %3361 = vst [vmem:[%s5343_s17 + $0x358] sm:$0xff] %v5633_v34 }
 0x22e   : > { %3457 = vst [vmem:[%s5343_s17 + $0x658] sm:$0xff] %v2350_v37 }
 0x231   : > { %v1965_v47 = vpop.f32.mrf.mxu0 }
 0x232   : > { %3303 = vst [vmem:[%s5343_s17 + $0x188] sm:$0xff] %v1965_v47  ;;  %v3558_v49 = vadd.f32 %v3557_v39, %v1965_v47  ;;  %v3820_v50 = vmul.f32 %v1965_v47, %v1965_v47  ;;  %v2230_v36 = vpop.f32.mrf.mxu2  ;;  %v5048_v39 = vld [vmem:[%s5326_s9 + $0x2b0] sm:$0xff] }
 0x233   : > { %3409 = vst [vmem:[%s5343_s17 + $0x4d8] sm:$0xff] %v2230_v36  ;;  %2152 = vmatmul.bf16.gmra.mxu1 %v5024_v46 }
 0x234   : > { %v4075_v56 = vadd.f32 %v4074_v44, %v3820_v50  ;;  %v5645_v42 = vpop.f32.mrf.mxu1  ;;  %v2353_v45 = vpop.f32.mrf.mxu3 }
 0x235   : > { %2272 = vmatmul.bf16.gmra.mxu2 %v5048_v39  ;;  %2392 = vmatmul.bf16.gmra.mxu3 %v5072_v40  ;;  %3362 = vst [vmem:[%s5343_s17 + $0x360] sm:$0xff] %v5645_v42 }
 0x236   : > { %3458 = vst [vmem:[%s5343_s17 + $0x660] sm:$0xff] %v2353_v45 }
 0x239   : > { %v1968_v57 = vpop.f32.mrf.mxu0 }
 0x23a   : > { %3304 = vst [vmem:[%s5343_s17 + $0x190] sm:$0xff] %v1968_v57  ;;  %v3559_v60 = vadd.f32 %v3558_v49, %v1968_v57  ;;  %v3821_v61 = vmul.f32 %v1968_v57, %v1968_v57  ;;  %v2233_v44 = vpop.f32.mrf.mxu2 }
 0x23b   : > { %3410 = vst [vmem:[%s5343_s17 + $0x4e0] sm:$0xff] %v2233_v44 }
 0x23c   : > { %v4076_v1 = vadd.f32 %v4075_v56, %v3821_v61  ;;  %v5656_v49 = vpop.f32.mrf.mxu1  ;;  %v2355_v53 = vpop.f32.mrf.mxu3 }
 0x23d   : > { %3363 = vst [vmem:[%s5343_s17 + $0x368] sm:$0xff] %v5656_v49 }
 0x23e   : > { %3459 = vst [vmem:[%s5343_s17 + $0x668] sm:$0xff] %v2355_v53 }
 0x241   : > { %v1970_v5 = vpop.f32.mrf.mxu0 }
 0x242   : > { %3305 = vst [vmem:[%s5343_s17 + $0x198] sm:$0xff] %v1970_v5  ;;  %v3560_v7 = vadd.f32 %v3559_v60, %v1970_v5  ;;  %v3822_v9 = vmul.f32 %v1970_v5, %v1970_v5  ;;  %v2235_v50 = vpop.f32.mrf.mxu2  ;;  %v5050_v5 = vld [vmem:[%s5326_s9 + $0x2c0] sm:$0xff] }
 0x243   : > { %3411 = vst [vmem:[%s5343_s17 + $0x4e8] sm:$0xff] %v2235_v50  ;;  %2157 = vmatmul.bf16.gmra.mxu1 %v5025_v63 }
 0x244   : > { %v4077_v14 = vadd.f32 %v4076_v1, %v3822_v9  ;;  %v5668_v57 = vpop.f32.mrf.mxu1  ;;  %v2358_v61 = vpop.f32.mrf.mxu3 }
 0x245   : > { %2277 = vmatmul.bf16.gmra.mxu2 %v5049_v54  ;;  %2397 = vmatmul.bf16.gmra.mxu3 %v5073_v55  ;;  %3364 = vst [vmem:[%s5343_s17 + $0x370] sm:$0xff] %v5668_v57 }
 0x246   : > { %3460 = vst [vmem:[%s5343_s17 + $0x670] sm:$0xff] %v2358_v61 }
 0x249   : > { %v1973_v15 = vpop.f32.mrf.mxu0 }
 0x24a   : > { %3306 = vst [vmem:[%s5343_s17 + $0x1a0] sm:$0xff] %v1973_v15  ;;  %v5610_v17 = vadd.f32 %v3560_v7, %v1973_v15  ;;  %v3823_v20 = vmul.f32 %v1973_v15, %v1973_v15  ;;  %v2238_v60 = vpop.f32.mrf.mxu2  ;;  %v5074_v7 = vld [vmem:[%s5326_s9 + $0x380] sm:$0xff] }
 0x24b   : > { %3412 = vst [vmem:[%s5343_s17 + $0x4f0] sm:$0xff] %v2238_v60 }
 0x24c   : > { %v5614_v23 = vadd.f32 %v4077_v14, %v3823_v20  ;;  %v5677_v1 = vpop.f32.mrf.mxu1  ;;  %v2360_v4 = vpop.f32.mrf.mxu3 }
 0x24d   : > { %3365 = vst [vmem:[%s5343_s17 + $0x378] sm:$0xff] %v5677_v1 }
 0x24e   : > { %3461 = vst [vmem:[%s5343_s17 + $0x678] sm:$0xff] %v2360_v4 }
 0x251   : > { %v5620_v26 = vpop.f32.mrf.mxu0 }
 0x252   : > { %3307 = vst [vmem:[%s5343_s17 + $0x1a8] sm:$0xff] %v5620_v26  ;;  %v2240_v2 = vpop.f32.mrf.mxu2  ;;  %v3824_v22 = vmul.f32 %v5620_v26, %v5620_v26  ;;  %v3562_v30 = vadd.f32 %v5610_v17, %v5620_v26 }
 0x253   : > { %3413 = vst [vmem:[%s5343_s17 + $0x4f8] sm:$0xff] %v2240_v2 }
 0x254   : > { %v5687_v10 = vpop.f32.mrf.mxu1  ;;  %v2363_v13 = vpop.f32.mrf.mxu3  ;;  %v4079_v32 = vadd.f32 %v5614_v23, %v3824_v22  ;;  %v5076_v22 = vld [vmem:[%s5326_s9 + $0x390] sm:$0xff] }
 0x255   : > { %2282 = vmatmul.bf16.gmra.mxu2 %v5050_v5  ;;  %2402 = vmatmul.bf16.gmra.mxu3 %v5074_v7  ;;  %3366 = vst [vmem:[%s5343_s17 + $0x380] sm:$0xff] %v5687_v10 }
 0x256   : > { %3462 = vst [vmem:[%s5343_s17 + $0x680] sm:$0xff] %v2363_v13 }
 0x259   : > { %v5631_v33 = vpop.f32.mrf.mxu0 }
 0x25a   : > { %3308 = vst [vmem:[%s5343_s17 + $0x1b0] sm:$0xff] %v5631_v33  ;;  %v2243_v12 = vpop.f32.mrf.mxu2  ;;  %v3825_v31 = vmul.f32 %v5631_v33, %v5631_v33  ;;  %v3563_v36 = vadd.f32 %v3562_v30, %v5631_v33 }
 0x25b   : > { %3414 = vst [vmem:[%s5343_s17 + $0x500] sm:$0xff] %v2243_v12 }
 0x25c   : > { %v5694_v15 = vpop.f32.mrf.mxu1  ;;  %v2365_v21 = vpop.f32.mrf.mxu3  ;;  %v4080_v40 = vadd.f32 %v4079_v32, %v3825_v31 }
 0x25d   : > { %3367 = vst [vmem:[%s5343_s17 + $0x388] sm:$0xff] %v5694_v15 }
 0x25e   : > { %3463 = vst [vmem:[%s5343_s17 + $0x688] sm:$0xff] %v2365_v21 }
 0x261   : > { %v5643_v41 = vpop.f32.mrf.mxu0 }
 0x262   : > { %3309 = vst [vmem:[%s5343_s17 + $0x1b8] sm:$0xff] %v5643_v41  ;;  %v5696_v20 = vpop.f32.mrf.mxu2  ;;  %v3826_v37 = vmul.f32 %v5643_v41, %v5643_v41  ;;  %v3564_v44 = vadd.f32 %v3563_v36, %v5643_v41 }
 0x263   : > { %3415 = vst [vmem:[%s5343_s17 + $0x508] sm:$0xff] %v5696_v20 }
 0x264   : > { %v5719_v26 = vpop.f32.mrf.mxu1  ;;  %v2368_v23 = vpop.f32.mrf.mxu3  ;;  %v4081_v33 = vadd.f32 %v4080_v40, %v3826_v37 }
 0x265   : > { %2287 = vmatmul.bf16.gmra.mxu2 %v5051_v24  ;;  %2407 = vmatmul.bf16.gmra.mxu3 %v5075_v25  ;;  %3368 = vst [vmem:[%s5343_s17 + $0x390] sm:$0xff] %v5719_v26 }
 0x266   : > { %3464 = vst [vmem:[%s5343_s17 + $0x690] sm:$0xff] %v2368_v23 }
 0x269   : > { %v5654_v47 = vpop.f32.mrf.mxu0 }
 0x26a   : > { %3310 = vst [vmem:[%s5343_s17 + $0x1c0] sm:$0xff] %v5654_v47  ;;  %v3827_v17 = vmul.f32 %v5654_v47, %v5654_v47  ;;  %v5721_v45 = vpop.f32.mrf.mxu2  ;;  %v3565_v46 = vadd.f32 %v3564_v44, %v5654_v47 }
 0x26b   : > { %3416 = vst [vmem:[%s5343_s17 + $0x510] sm:$0xff] %v5721_v45 }
 0x26c   : > { %v4082_v41 = vadd.f32 %v4081_v33, %v3827_v17  ;;  %v5733_v5 = vpop.f32.mrf.mxu1  ;;  %v5146_v17 = vld [vmem:[%s5343_s17 + $0x200] sm:$0xff] }
 0x26d   : > { %3369 = vst [vmem:[%s5343_s17 + $0x398] sm:$0xff] %v5733_v5  ;;  %v3835_v23 = vmul.f32 %v5146_v17, %v5146_v17 }
 0x271   : > { %v5666_v56 = vpop.f32.mrf.mxu0 }
 0x272   : > { %3311 = vst [vmem:[%s5343_s17 + $0x1c8] sm:$0xff] %v5666_v56  ;;  %v3828_v50 = vmul.f32 %v5666_v56, %v5666_v56  ;;  %v3566_v53 = vadd.f32 %v3565_v46, %v5666_v56  ;;  %v5735_v7 = vpop.f32.mrf.mxu2  ;;  %v2370_v56 = vpop.f32.mrf.mxu3 }
 0x273   : > { %3417 = vst [vmem:[%s5343_s17 + $0x518] sm:$0xff] %v5735_v7 }
 0x274   : > { %v4083_v55 = vadd.f32 %v4082_v41, %v3828_v50  ;;  %3465 = vst [vmem:[%s5343_s17 + $0x698] sm:$0xff] %v2370_v56  ;;  %v5745_v40 = vpop.f32.mrf.mxu1  ;;  %v5147_v50 = vld [vmem:[%s5343_s17 + $0x208] sm:$0xff] }
 0x275   : > { %2412 = vmatmul.bf16.gmra.mxu3 %v5076_v22  ;;  %3370 = vst [vmem:[%s5343_s17 + $0x3a0] sm:$0xff] %v5745_v40  ;;  %v3836_v41 = vmul.f32 %v5147_v50, %v5147_v50 }
 0x279   : > { %v1988_v0 = vpop.f32.mrf.mxu0 }
 0x27a   : > { %3312 = vst [vmem:[%s5343_s17 + $0x1d0] sm:$0xff] %v1988_v0  ;;  %v3829_v54 = vmul.f32 %v1988_v0, %v1988_v0  ;;  %v3567_v60 = vadd.f32 %v3566_v53, %v1988_v0  ;;  %v5052_v0 = vld [vmem:[%s5326_s9 + $0x2d0] sm:$0xff]  ;;  %v5747_v44 = vpop.f32.mrf.mxu2 }
 0x27b   : > { %2292 = vmatmul.bf16.gmra.mxu2 %v5052_v0  ;;  %3418 = vst [vmem:[%s5343_s17 + $0x520] sm:$0xff] %v5747_v44  ;;  %v5150_v0 = vld [vmem:[%s5343_s17 + $0x220] sm:$0xff] }
 0x27c   : > { %v4084_v47 = vadd.f32 %v4083_v55, %v3829_v54  ;;  %v5148_v55 = vld [vmem:[%s5343_s17 + $0x210] sm:$0xff]  ;;  %v3839_v22 = vmul.f32 %v5150_v0, %v5150_v0 }
 0x281   : > { %v1990_v9 = vpop.f32.mrf.mxu0 }
 0x282   : > { %3313 = vst [vmem:[%s5343_s17 + $0x1d8] sm:$0xff] %v1990_v9  ;;  %v3830_v61 = vmul.f32 %v1990_v9, %v1990_v9  ;;  %v3568_v2 = vadd.f32 %v3567_v60, %v1990_v9  ;;  %v3837_v60 = vmul.f32 %v5148_v55, %v5148_v55 }
 0x284   : > { %v4085_v12 = vadd.f32 %v4084_v47, %v3830_v61  ;;  %v5149_v47 = vld [vmem:[%s5343_s17 + $0x218] sm:$0xff] }
 0x289   : > { %v1993_v14 = vpop.f32.mrf.mxu0 }
 0x28a   : > { %3314 = vst [vmem:[%s5343_s17 + $0x1e0] sm:$0xff] %v1993_v14  ;;  %v3831_v4 = vmul.f32 %v1993_v14, %v1993_v14  ;;  %v3569_v13 = vadd.f32 %v3568_v2, %v1993_v14  ;;  %v3838_v2 = vmul.f32 %v5149_v47, %v5149_v47 }
 0x28c   : > { %v4086_v9 = vadd.f32 %v4085_v12, %v3831_v4  ;;  %v5758_v12 = vpop.f32.mrf.mxu1 }
 0x28d   : > { %3371 = vst [vmem:[%s5343_s17 + $0x3a8] sm:$0xff] %v5758_v12 }
 0x291   : > { %v1995_v39 = vpop.f32.mrf.mxu0 }
 0x292   : > { %3315 = vst [vmem:[%s5343_s17 + $0x1e8] sm:$0xff] %v1995_v39  ;;  %v3832_v21 = vmul.f32 %v1995_v39, %v1995_v39  ;;  %v3570_v24 = vadd.f32 %v3569_v13, %v1995_v39  ;;  %v2373_v39 = vpop.f32.mrf.mxu3  ;;  %v5760_v13 = vpop.f32.mrf.mxu2 }
 0x293   : > { %3466 = vst [vmem:[%s5343_s17 + $0x6a0] sm:$0xff] %v2373_v39 }
 0x294   : > { %v4087_v30 = vadd.f32 %v4086_v9, %v3832_v21  ;;  %3419 = vst [vmem:[%s5343_s17 + $0x528] sm:$0xff] %v5760_v13 }
 0x299   : > { %v1998_v63 = vpop.f32.mrf.mxu0 }
 0x29a   : > { %3316 = vst [vmem:[%s5343_s17 + $0x1f0] sm:$0xff] %v1998_v63  ;;  %v3833_v25 = vmul.f32 %v1998_v63, %v1998_v63  ;;  %v3571_v31 = vadd.f32 %v3570_v24, %v1998_v63  ;;  %v2375_v21 = vpop.f32.mrf.mxu3 }
 0x29b   : > { %3467 = vst [vmem:[%s5343_s17 + $0x6a8] sm:$0xff] %v2375_v21 }
 0x29c   : > { %v4088_v14 = vadd.f32 %v4087_v30, %v3833_v25  ;;  %v5053_v25 = vld [vmem:[%s5326_s9 + $0x2d8] sm:$0xff] }
 0x29d   : > { %v5077_v30 = vld [vmem:[%s5326_s9 + $0x398] sm:$0xff]  ;;  %2297 = vmatmul.bf16.gmra.mxu2 %v5053_v25 }
 0x29e   : > { %2417 = vmatmul.bf16.gmra.mxu3 %v5077_v30  ;;  %v5157_v25 = vld [vmem:[%s5343_s17 + $0x258] sm:$0xff] }
 0x29f   : > { %v3846_v30 = vmul.f32 %v5157_v25, %v5157_v25 }
 0x2a1   : > { %v2000_v32 = vpop.f32.mrf.mxu0 }
 0x2a2   : > { %3317 = vst [vmem:[%s5343_s17 + $0x1f8] sm:$0xff] %v2000_v32  ;;  %v3572_v36 = vadd.f32 %v3571_v31, %v2000_v32  ;;  %v3834_v37 = vmul.f32 %v2000_v32, %v2000_v32  ;;  %v5151_v31 = vld [vmem:[%s5343_s17 + $0x228] sm:$0xff] }
 0x2a3   : > { %v3840_v32 = vmul.f32 %v5151_v31, %v5151_v31 }
 0x2a4   : > { %v3573_v33 = vadd.f32 %v5146_v17, %v3572_v36  ;;  %v4089_v46 = vadd.f32 %v4088_v14, %v3834_v37  ;;  %v5152_v37 = vld [vmem:[%s5343_s17 + $0x230] sm:$0xff] }
 0x2a5   : > { %v3841_v39 = vmul.f32 %v5152_v37, %v5152_v37 }
 0x2a6   : > { %v3574_v53 = vadd.f32 %v5147_v50, %v3573_v33  ;;  %v4090_v54 = vadd.f32 %v4089_v46, %v3835_v23  ;;  %v5153_v33 = vld [vmem:[%s5343_s17 + $0x238] sm:$0xff] }
 0x2a7   : > { %v3842_v46 = vmul.f32 %v5153_v33, %v5153_v33 }
 0x2a8   : > { %v3575_v61 = vadd.f32 %v5148_v55, %v3574_v53  ;;  %v4091_v63 = vadd.f32 %v4090_v54, %v3836_v41  ;;  %v5773_v53 = vpop.f32.mrf.mxu1  ;;  %v5775_v54 = vpop.f32.mrf.mxu2 }
 0x2a9   : > { %3372 = vst [vmem:[%s5343_s17 + $0x3b0] sm:$0xff] %v5773_v53  ;;  %v2378_v55 = vpop.f32.mrf.mxu3 }
 0x2aa   : > { %v3576_v4 = vadd.f32 %v5149_v47, %v3575_v61  ;;  %v4092_v56 = vadd.f32 %v4091_v63, %v3837_v60  ;;  %v5154_v60 = vld [vmem:[%s5343_s17 + $0x240] sm:$0xff]  ;;  %3420 = vst [vmem:[%s5343_s17 + $0x530] sm:$0xff] %v5775_v54 }
 0x2ab   : > { %v3843_v61 = vmul.f32 %v5154_v60, %v5154_v60  ;;  %3468 = vst [vmem:[%s5343_s17 + $0x6b0] sm:$0xff] %v2378_v55 }
 0x2ac   : > { %v3577_v9 = vadd.f32 %v5150_v0, %v3576_v4  ;;  %v4093_v24 = vadd.f32 %v4092_v56, %v3838_v2  ;;  %v5155_v2 = vld [vmem:[%s5343_s17 + $0x248] sm:$0xff]  ;;  %v5156_v0 = vld [vmem:[%s5343_s17 + $0x250] sm:$0xff] }
 0x2ad   : > { %v3844_v4 = vmul.f32 %v5155_v2, %v5155_v2 }
 0x2ae   : > { %v3578_v14 = vadd.f32 %v5151_v31, %v3577_v9  ;;  %v4094_v36 = vadd.f32 %v4093_v24, %v3839_v22  ;;  %v3845_v22 = vmul.f32 %v5156_v0, %v5156_v0 }
 0x2b0   : > { %v3579_v17 = vadd.f32 %v5152_v37, %v3578_v14  ;;  %v4095_v23 = vadd.f32 %v4094_v36, %v3840_v32  ;;  %v5786_v14 = vpop.f32.mrf.mxu1  ;;  %v5788_v36 = vpop.f32.mrf.mxu2 }
 0x2b1   : > { %3373 = vst [vmem:[%s5343_s17 + $0x3b8] sm:$0xff] %v5786_v14  ;;  %v2380_v37 = vpop.f32.mrf.mxu3 }
 0x2b2   : > { %v3580_v50 = vadd.f32 %v5153_v33, %v3579_v17  ;;  %v4096_v41 = vadd.f32 %v4095_v23, %v3841_v39  ;;  %v5158_v39 = vld [vmem:[%s5343_s17 + $0x260] sm:$0xff]  ;;  %3421 = vst [vmem:[%s5343_s17 + $0x538] sm:$0xff] %v5788_v36 }
 0x2b3   : > { %v3847_v17 = vmul.f32 %v5158_v39, %v5158_v39  ;;  %3469 = vst [vmem:[%s5343_s17 + $0x6b8] sm:$0xff] %v2380_v37 }
 0x2b4   : > { %v3581_v63 = vadd.f32 %v5154_v60, %v3580_v50  ;;  %v4097_v47 = vadd.f32 %v4096_v41, %v3842_v46  ;;  %v5054_v46 = vld [vmem:[%s5326_s9 + $0x2e0] sm:$0xff]  ;;  %v5159_v41 = vld [vmem:[%s5343_s17 + $0x268] sm:$0xff] }
 0x2b5   : > { %v5078_v50 = vld [vmem:[%s5326_s9 + $0x3a0] sm:$0xff]  ;;  %v3848_v55 = vmul.f32 %v5159_v41, %v5159_v41  ;;  %2302 = vmatmul.bf16.gmra.mxu2 %v5054_v46  ;;  %v5164_v46 = vld [vmem:[%s5343_s17 + $0x290] sm:$0xff] }
 0x2b6   : > { %v3582_v56 = vadd.f32 %v5155_v2, %v3581_v63  ;;  %v4098_v21 = vadd.f32 %v4097_v47, %v3843_v61  ;;  %2422 = vmatmul.bf16.gmra.mxu3 %v5078_v50  ;;  %v5160_v63 = vld [vmem:[%s5343_s17 + $0x270] sm:$0xff]  ;;  %v3853_v50 = vmul.f32 %v5164_v46, %v5164_v46 }
 0x2b7   : > { %v3849_v47 = vmul.f32 %v5160_v63, %v5160_v63 }
 0x2b8   : > { %v3583_v9 = vadd.f32 %v5156_v0, %v3582_v56  ;;  %v4099_v24 = vadd.f32 %v4098_v21, %v3844_v4  ;;  %v5161_v56 = vld [vmem:[%s5343_s17 + $0x278] sm:$0xff] }
 0x2b9   : > { %v3850_v21 = vmul.f32 %v5161_v56, %v5161_v56 }
 0x2ba   : > { %v3584_v31 = vadd.f32 %v5157_v25, %v3583_v9  ;;  %v4100_v32 = vadd.f32 %v4099_v24, %v3845_v22  ;;  %v5801_v9 = vpop.f32.mrf.mxu1  ;;  %v5803_v24 = vpop.f32.mrf.mxu2 }
 0x2bb   : > { %3374 = vst [vmem:[%s5343_s17 + $0x3c0] sm:$0xff] %v5801_v9  ;;  %v2383_v25 = vpop.f32.mrf.mxu3 }
 0x2bc   : > { %v3585_v23 = vadd.f32 %v5158_v39, %v3584_v31  ;;  %v4101_v33 = vadd.f32 %v4100_v32, %v3846_v30  ;;  %v5162_v30 = vld [vmem:[%s5343_s17 + $0x280] sm:$0xff]  ;;  %3422 = vst [vmem:[%s5343_s17 + $0x540] sm:$0xff] %v5803_v24  ;;  %v5163_v39 = vld [vmem:[%s5343_s17 + $0x288] sm:$0xff] }
 0x2bd   : > { %v3851_v31 = vmul.f32 %v5162_v30, %v5162_v30  ;;  %3470 = vst [vmem:[%s5343_s17 + $0x6c0] sm:$0xff] %v2383_v25 }
 0x2be   : > { %v3586_v60 = vadd.f32 %v5159_v41, %v3585_v23  ;;  %v4102_v61 = vadd.f32 %v4101_v33, %v3847_v17  ;;  %v3852_v17 = vmul.f32 %v5163_v39, %v5163_v39 }
 0x2c0   : > { %v3587_v2 = vadd.f32 %v5160_v63, %v3586_v60  ;;  %v4103_v4 = vadd.f32 %v4102_v61, %v3848_v55  ;;  %v5165_v60 = vld [vmem:[%s5343_s17 + $0x298] sm:$0xff] }
 0x2c1   : > { %v3854_v61 = vmul.f32 %v5165_v60, %v5165_v60 }
 0x2c2   : > { %v3588_v0 = vadd.f32 %v5161_v56, %v3587_v2  ;;  %v4104_v22 = vadd.f32 %v4103_v4, %v3849_v47  ;;  %v5814_v2 = vpop.f32.mrf.mxu1  ;;  %v5816_v4 = vpop.f32.mrf.mxu2 }
 0x2c3   : > { %3375 = vst [vmem:[%s5343_s17 + $0x3c8] sm:$0xff] %v5814_v2  ;;  %v2385_v56 = vpop.f32.mrf.mxu3 }
 0x2c4   : > { %v3589_v32 = vadd.f32 %v5162_v30, %v3588_v0  ;;  %v4105_v37 = vadd.f32 %v4104_v22, %v3850_v21  ;;  %v5166_v21 = vld [vmem:[%s5343_s17 + $0x2a0] sm:$0xff]  ;;  %3423 = vst [vmem:[%s5343_s17 + $0x548] sm:$0xff] %v5816_v4  ;;  %v5055_v30 = vld [vmem:[%s5326_s9 + $0x2e8] sm:$0xff] }
 0x2c5   : > { %v3855_v0 = vmul.f32 %v5166_v21, %v5166_v21  ;;  %3471 = vst [vmem:[%s5343_s17 + $0x6c8] sm:$0xff] %v2385_v56  ;;  %2307 = vmatmul.bf16.gmra.mxu2 %v5055_v30 }
 0x2c6   : > { %v3590_v23 = vadd.f32 %v5163_v39, %v3589_v32  ;;  %v4106_v33 = vadd.f32 %v4105_v37, %v3851_v31  ;;  %v5079_v31 = vld [vmem:[%s5326_s9 + $0x3a8] sm:$0xff] }
 0x2c7   : > { %v5167_v32 = vld [vmem:[%s5343_s17 + $0x2a8] sm:$0xff]  ;;  %2427 = vmatmul.bf16.gmra.mxu3 %v5079_v31 }
 0x2c8   : > { %v3591_v41 = vadd.f32 %v5164_v46, %v3590_v23  ;;  %v4107_v55 = vadd.f32 %v4106_v33, %v3852_v17  ;;  %v3856_v37 = vmul.f32 %v5167_v32, %v5167_v32  ;;  %v5168_v23 = vld [vmem:[%s5343_s17 + $0x2b0] sm:$0xff] }
 0x2c9   : > { %v3857_v33 = vmul.f32 %v5168_v23, %v5168_v23 }
 0x2ca   : > { %v3592_v63 = vadd.f32 %v5165_v60, %v3591_v41  ;;  %v4108_v47 = vadd.f32 %v4107_v55, %v3853_v50  ;;  %v5169_v41 = vld [vmem:[%s5343_s17 + $0x2b8] sm:$0xff] }
 0x2cb   : > { %v3858_v55 = vmul.f32 %v5169_v41, %v5169_v41  ;;  %v2388_v56 = vpop.f32.mrf.mxu3 }
 0x2cc   : > { %v3593_v22 = vadd.f32 %v5166_v21, %v3592_v63  ;;  %v4109_v25 = vadd.f32 %v4108_v47, %v3854_v61  ;;  %v5829_v63 = vpop.f32.mrf.mxu1  ;;  %v5831_v47 = vpop.f32.mrf.mxu2  ;;  %v3859_v21 = vmul.f32 %v5465_v51, %v5465_v51  ;;  %3472 = vst [vmem:[%s5343_s17 + $0x6d0] sm:$0xff] %v2388_v56 }
 0x2cd   : > { %3376 = vst [vmem:[%s5343_s17 + $0x3d0] sm:$0xff] %v5829_v63 }
 0x2ce   : > { %v3594_v39 = vadd.f32 %v5167_v32, %v3593_v22  ;;  %v4110_v17 = vadd.f32 %v4109_v25, %v3855_v0  ;;  %3424 = vst [vmem:[%s5343_s17 + $0x550] sm:$0xff] %v5831_v47  ;;  %v3860_v25 = vmul.f32 %v5473_v59, %v5473_v59  ;;  %v3861_v32 = vmul.f32 %v5481_v3, %v5481_v3 }
 0x2d0   : > { %v3595_v46 = vadd.f32 %v5168_v23, %v3594_v39  ;;  %v4111_v50 = vadd.f32 %v4110_v17, %v3856_v37 }
 0x2d2   : > { %v3596_v60 = vadd.f32 %v5169_v41, %v3595_v46  ;;  %v4112_v61 = vadd.f32 %v4111_v50, %v3857_v33  ;;  %v3863_v50 = vmul.f32 %v5497_v19, %v5497_v19 }
 0x2d4   : > { %v4113_v0 = vadd.f32 %v4112_v61, %v3858_v55  ;;  %v3597_v22 = vadd.f32 %v3596_v60, %v5465_v51  ;;  %v3862_v51 = vmul.f32 %v5489_v11, %v5489_v11  ;;  %v5850_v33 = vpop.f32.mrf.mxu1  ;;  %v5852_v46 = vpop.f32.mrf.mxu2  ;;  %v5056_v55 = vld [vmem:[%s5326_s9 + $0x2f0] sm:$0xff]  ;;  %v3864_v60 = vmul.f32 %v5505_v27, %v5505_v27 }
 0x2d5   : > { %3377 = vst [vmem:[%s5343_s17 + $0x3d8] sm:$0xff] %v5850_v33  ;;  %2312 = vmatmul.bf16.gmra.mxu2 %v5056_v55 }
 0x2d6   : > { %v3598_v30 = vadd.f32 %v3597_v22, %v5473_v59  ;;  %v4114_v31 = vadd.f32 %v4113_v0, %v3859_v21  ;;  %v5856_v59 = vpop.f32.mrf.mxu3  ;;  %3425 = vst [vmem:[%s5343_s17 + $0x558] sm:$0xff] %v5852_v46  ;;  %v3866_v22 = vmul.f32 %v5521_v43, %v5521_v43 }
 0x2d7   : > { %3473 = vst [vmem:[%s5343_s17 + $0x6d8] sm:$0xff] %v5856_v59 }
 0x2d8   : > { %v3599_v37 = vadd.f32 %v3598_v30, %v5481_v3  ;;  %v4115_v39 = vadd.f32 %v4114_v31, %v3860_v25 }
 0x2da   : > { %v3600_v17 = vadd.f32 %v3599_v37, %v5489_v11  ;;  %v4116_v23 = vadd.f32 %v4115_v39, %v3861_v32  ;;  %v5080_v11 = vld [vmem:[%s5326_s9 + $0x3b0] sm:$0xff]  ;;  %v3867_v37 = vmul.f32 %v5529_v52, %v5529_v52 }
 0x2db   : > { %2432 = vmatmul.bf16.gmra.mxu3 %v5080_v11 }
 0x2dc   : > { %v3601_v3 = vadd.f32 %v3600_v17, %v5497_v19  ;;  %v4117_v41 = vadd.f32 %v4116_v23, %v3862_v51  ;;  %v3865_v19 = vmul.f32 %v5513_v35, %v5513_v35  ;;  %v5876_v31 = vpop.f32.mrf.mxu1  ;;  %v3869_v23 = vmul.f32 %v5547_v8, %v5547_v8 }
 0x2dd   : > { %3378 = vst [vmem:[%s5343_s17 + $0x3e0] sm:$0xff] %v5876_v31 }
 0x2de   : > { %v3602_v61 = vadd.f32 %v3601_v3, %v5505_v27  ;;  %v4118_v56 = vadd.f32 %v4117_v41, %v3863_v50  ;;  %v5878_v27 = vpop.f32.mrf.mxu2  ;;  %v5882_v32 = vpop.f32.mrf.mxu3  ;;  %v3870_v3 = vmul.f32 %v5556_v18, %v5556_v18 }
 0x2df   : > { %3426 = vst [vmem:[%s5343_s17 + $0x560] sm:$0xff] %v5878_v27 }
 0x2e0   : > { %v3603_v21 = vadd.f32 %v3602_v61, %v5513_v35  ;;  %v4119_v0 = vadd.f32 %v4118_v56, %v3864_v60  ;;  %3474 = vst [vmem:[%s5343_s17 + $0x6e0] sm:$0xff] %v5882_v32  ;;  %v3871_v61 = vmul.f32 %v5565_v29, %v5565_v29 }
 0x2e2   : > { %v3604_v25 = vadd.f32 %v3603_v21, %v5521_v43  ;;  %v4120_v30 = vadd.f32 %v4119_v0, %v3865_v19  ;;  %v3868_v43 = vmul.f32 %v5538_v62, %v5538_v62  ;;  %v5057_v19 = vld [vmem:[%s5326_s9 + $0x2f8] sm:$0xff]  ;;  %v3872_v21 = vmul.f32 %v5573_v38, %v5573_v38 }
 0x2e4   : > { %v3605_v35 = vadd.f32 %v3604_v25, %v5529_v52  ;;  %v4121_v39 = vadd.f32 %v4120_v30, %v3866_v22  ;;  %v5900_v11 = vpop.f32.mrf.mxu1 }
 0x2e5   : > { %3379 = vst [vmem:[%s5343_s17 + $0x3e8] sm:$0xff] %v5900_v11  ;;  %2317 = vmatmul.bf16.gmra.mxu2 %v5057_v19 }
 0x2e6   : > { %v3606_v51 = vadd.f32 %v3605_v35, %v5538_v62  ;;  %v4122_v17 = vadd.f32 %v4121_v39, %v3867_v37  ;;  %v5902_v60 = vpop.f32.mrf.mxu2  ;;  %v5906_v62 = vpop.f32.mrf.mxu3  ;;  %v3874_v37 = vmul.f32 %v5590_v58, %v5590_v58 }
 0x2e7   : > { %3427 = vst [vmem:[%s5343_s17 + $0x568] sm:$0xff] %v5902_v60 }
 0x2e8   : > { %v3607_v52 = vadd.f32 %v3606_v51, %v5547_v8  ;;  %v4123_v50 = vadd.f32 %v4122_v17, %v3868_v43  ;;  %3475 = vst [vmem:[%s5343_s17 + $0x6e8] sm:$0xff] %v5906_v62  ;;  %v3875_v17 = vmul.f32 %v5599_v6, %v5599_v6 }
 0x2ea   : > { %v3608_v41 = vadd.f32 %v3607_v52, %v5556_v18  ;;  %v4124_v55 = vadd.f32 %v4123_v50, %v3869_v23  ;;  %v5081_v18 = vld [vmem:[%s5326_s9 + $0x3b8] sm:$0xff] }
 0x2eb   : > { %2437 = vmatmul.bf16.gmra.mxu3 %v5081_v18  ;;  %v3879_v18 = vmul.f32 %v5645_v42, %v5645_v42 }
 0x2ec   : > { %v3609_v8 = vadd.f32 %v3608_v41, %v5565_v29  ;;  %v4125_v56 = vadd.f32 %v4124_v55, %v3870_v3  ;;  %v3873_v29 = vmul.f32 %v5582_v48, %v5582_v48  ;;  %v5926_v43 = vpop.f32.mrf.mxu1  ;;  %v3877_v3 = vmul.f32 %v5622_v28, %v5622_v28 }
 0x2ed   : > { %3380 = vst [vmem:[%s5343_s17 + $0x3f0] sm:$0xff] %v5926_v43  ;;  %v3878_v55 = vmul.f32 %v5633_v34, %v5633_v34 }
 0x2ee   : > { %v3610_v0 = vadd.f32 %v3609_v8, %v5573_v38  ;;  %v4126_v22 = vadd.f32 %v4125_v56, %v3871_v61  ;;  %v5928_v38 = vpop.f32.mrf.mxu2  ;;  %v5932_v51 = vpop.f32.mrf.mxu3 }
 0x2ef   : > { %3428 = vst [vmem:[%s5343_s17 + $0x570] sm:$0xff] %v5928_v38 }
 0x2f0   : > { %v3611_v25 = vadd.f32 %v3610_v0, %v5582_v48  ;;  %v4127_v30 = vadd.f32 %v4126_v22, %v3872_v21  ;;  %3476 = vst [vmem:[%s5343_s17 + $0x6f0] sm:$0xff] %v5932_v51  ;;  %v5082_v0 = vld [vmem:[%s5326_s9 + $0x3c0] sm:$0xff] }
 0x2f2   : > { %v3612_v35 = vadd.f32 %v3611_v25, %v5590_v58  ;;  %v4128_v39 = vadd.f32 %v4127_v30, %v3873_v29  ;;  %v3876_v58 = vmul.f32 %v5607_v16, %v5607_v16  ;;  %v3881_v25 = vmul.f32 %v5668_v57, %v5668_v57 }
 0x2f4   : > { %v3613_v48 = vadd.f32 %v3612_v35, %v5599_v6  ;;  %v4129_v23 = vadd.f32 %v4128_v39, %v3874_v37  ;;  %v5950_v56 = vpop.f32.mrf.mxu1  ;;  %v3882_v37 = vmul.f32 %v5677_v1, %v5677_v1 }
 0x2f5   : > { %3381 = vst [vmem:[%s5343_s17 + $0x3f8] sm:$0xff] %v5950_v56 }
 0x2f6   : > { %v3614_v52 = vadd.f32 %v3613_v48, %v5607_v16  ;;  %v4130_v50 = vadd.f32 %v4129_v23, %v3875_v17  ;;  %v5952_v19 = vpop.f32.mrf.mxu2  ;;  %v5956_v16 = vpop.f32.mrf.mxu3  ;;  %v3883_v23 = vmul.f32 %v5687_v10, %v5687_v10 }
 0x2f7   : > { %3429 = vst [vmem:[%s5343_s17 + $0x578] sm:$0xff] %v5952_v19 }
 0x2f8   : > { %v3615_v41 = vadd.f32 %v3614_v52, %v5622_v28  ;;  %v4131_v6 = vadd.f32 %v4130_v50, %v3876_v58  ;;  %3477 = vst [vmem:[%s5343_s17 + $0x6f8] sm:$0xff] %v5956_v16  ;;  %v3884_v52 = vmul.f32 %v5694_v15, %v5694_v15 }
 0x2fa   : > { %v3616_v61 = vadd.f32 %v3615_v41, %v5633_v34  ;;  %v4132_v8 = vadd.f32 %v4131_v6, %v3877_v3  ;;  %v3880_v34 = vmul.f32 %v5656_v49, %v5656_v49  ;;  %v3885_v41 = vmul.f32 %v5719_v26, %v5719_v26 }
 0x2fb   : > { %2442 = vmatmul.bf16.gmra.mxu3 %v5082_v0  ;;  %v3888_v0 = vmul.f32 %v5758_v12, %v5758_v12 }
 0x2fc   : > { %v3617_v28 = vadd.f32 %v3616_v61, %v5645_v42  ;;  %v4133_v21 = vadd.f32 %v4132_v8, %v3878_v55  ;;  %v3886_v55 = vmul.f32 %v5733_v5, %v5733_v5 }
 0x2fe   : > { %v3618_v22 = vadd.f32 %v3617_v28, %v5656_v49  ;;  %v4134_v29 = vadd.f32 %v4133_v21, %v3879_v18  ;;  %v5975_v17 = vpop.f32.mrf.mxu2  ;;  %v5979_v49 = vpop.f32.mrf.mxu3  ;;  %v3887_v28 = vmul.f32 %v5745_v40, %v5745_v40 }
 0x2ff   : > { %3430 = vst [vmem:[%s5343_s17 + $0x580] sm:$0xff] %v5975_v17 }
 0x300   : > { %v3619_v42 = vadd.f32 %v3618_v22, %v5668_v57  ;;  %v4135_v30 = vadd.f32 %v4134_v29, %v3880_v34  ;;  %3478 = vst [vmem:[%s5343_s17 + $0x700] sm:$0xff] %v5979_v49  ;;  %v3889_v29 = vmul.f32 %v5773_v53, %v5773_v53 }
 0x302   : > { %v3620_v35 = vadd.f32 %v3619_v42, %v5677_v1  ;;  %v4136_v39 = vadd.f32 %v4135_v30, %v3881_v25  ;;  %v3890_v42 = vmul.f32 %v5786_v14, %v5786_v14 }
 0x304   : > { %v3621_v48 = vadd.f32 %v3620_v35, %v5687_v10  ;;  %v4137_v57 = vadd.f32 %v4136_v39, %v3882_v37  ;;  %v3891_v39 = vmul.f32 %v5801_v9, %v5801_v9 }
 0x306   : > { %v4138_v58 = vadd.f32 %v4137_v57, %v3883_v23  ;;  %v3622_v1 = vadd.f32 %v3621_v48, %v5694_v15  ;;  %v5995_v61 = vpop.f32.mrf.mxu2  ;;  %v5999_v8 = vpop.f32.mrf.mxu3  ;;  %v3892_v48 = vmul.f32 %v5814_v2, %v5814_v2 }
 0x307   : > { %3431 = vst [vmem:[%s5343_s17 + $0x588] sm:$0xff] %v5995_v61 }
 0x308   : > { %v4139_v50 = vadd.f32 %v4138_v58, %v3884_v52  ;;  %v3623_v3 = vadd.f32 %v3622_v1, %v5719_v26  ;;  %3479 = vst [vmem:[%s5343_s17 + $0x708] sm:$0xff] %v5999_v8  ;;  %v5083_v26 = vld [vmem:[%s5326_s9 + $0x3c8] sm:$0xff]  ;;  %v3893_v58 = vmul.f32 %v5829_v63, %v5829_v63 }
 0x30a   : > { %v4140_v6 = vadd.f32 %v4139_v50, %v3885_v41  ;;  %v3624_v10 = vadd.f32 %v3623_v3, %v5733_v5 }
 0x30b   : > { %2447 = vmatmul.bf16.gmra.mxu3 %v5083_v26 }
 0x30c   : > { %v4141_v18 = vadd.f32 %v4140_v6, %v3886_v55  ;;  %v3625_v15 = vadd.f32 %v3624_v10, %v5745_v40  ;;  %v3895_v6 = vmul.f32 %v5876_v31, %v5876_v31  ;;  %v3896_v55 = vmul.f32 %v5900_v11, %v5900_v11 }
 0x30e   : > { %v4142_v21 = vadd.f32 %v4141_v18, %v3887_v28  ;;  %v3626_v5 = vadd.f32 %v3625_v15, %v5758_v12  ;;  %v6016_v30 = vpop.f32.mrf.mxu2  ;;  %v6020_v37 = vpop.f32.mrf.mxu3  ;;  %v3897_v28 = vmul.f32 %v5926_v43, %v5926_v43 }
 0x30f   : > { %3432 = vst [vmem:[%s5343_s17 + $0x590] sm:$0xff] %v6016_v30 }
 0x310   : > { %v4143_v34 = vadd.f32 %v4142_v21, %v3888_v0  ;;  %v3627_v22 = vadd.f32 %v3626_v5, %v5773_v53  ;;  %3480 = vst [vmem:[%s5343_s17 + $0x710] sm:$0xff] %v6020_v37  ;;  %v3898_v21 = vmul.f32 %v5950_v56, %v5950_v56  ;;  %v5170_v0 = vld [vmem:[%s5343_s17 + $0x400] sm:$0xff] }
 0x312   : > { %v4144_v25 = vadd.f32 %v4143_v34, %v3889_v29  ;;  %v3628_v40 = vadd.f32 %v3627_v22, %v5786_v14  ;;  %v3899_v34 = vmul.f32 %v5170_v0, %v5170_v0 }
 0x314   : > { %v4145_v12 = vadd.f32 %v4144_v25, %v3890_v42  ;;  %v3629_v35 = vadd.f32 %v3628_v40, %v5801_v9  ;;  %v3894_v9 = vmul.f32 %v5850_v33, %v5850_v33 }
 0x316   : > { %v4146_v53 = vadd.f32 %v4145_v12, %v3891_v39  ;;  %v3630_v14 = vadd.f32 %v3629_v35, %v5814_v2  ;;  %v6036_v50 = vpop.f32.mrf.mxu2  ;;  %v6040_v3 = vpop.f32.mrf.mxu3 }
 0x317   : > { %3433 = vst [vmem:[%s5343_s17 + $0x598] sm:$0xff] %v6036_v50 }
 0x318   : > { %v4147_v23 = vadd.f32 %v4146_v53, %v3892_v48  ;;  %v3631_v57 = vadd.f32 %v3630_v14, %v5829_v63  ;;  %3481 = vst [vmem:[%s5343_s17 + $0x718] sm:$0xff] %v6040_v3  ;;  %v5084_v63 = vld [vmem:[%s5326_s9 + $0x3d0] sm:$0xff]  ;;  %v5173_v53 = vld [vmem:[%s5343_s17 + $0x418] sm:$0xff] }
 0x319   : > { %v3902_v14 = vmul.f32 %v5173_v53, %v5173_v53 }
 0x31a   : > { %v4148_v1 = vadd.f32 %v4147_v23, %v3893_v58  ;;  %v3632_v52 = vadd.f32 %v3631_v57, %v5850_v33 }
 0x31b   : > { %2452 = vmatmul.bf16.gmra.mxu3 %v5084_v63 }
 0x31c   : > { %v4149_v41 = vadd.f32 %v4148_v1, %v3894_v9  ;;  %v3633_v2 = vadd.f32 %v3632_v52, %v5876_v31  ;;  %v5174_v1 = vld [vmem:[%s5343_s17 + $0x420] sm:$0xff] }
 0x31d   : > { %v3903_v52 = vmul.f32 %v5174_v1, %v5174_v1 }
 0x31e   : > { %v4150_v10 = vadd.f32 %v4149_v41, %v3895_v6  ;;  %v3634_v33 = vadd.f32 %v3633_v2, %v5900_v11  ;;  %v6057_v5 = vpop.f32.mrf.mxu2  ;;  %v6061_v11 = vpop.f32.mrf.mxu3  ;;  %v5085_v2 = vld [vmem:[%s5326_s9 + $0x3d8] sm:$0xff]  ;;  %v5175_v6 = vld [vmem:[%s5343_s17 + $0x428] sm:$0xff] }
 0x31f   : > { %3434 = vst [vmem:[%s5343_s17 + $0x5a0] sm:$0xff] %v6057_v5  ;;  %v3904_v63 = vmul.f32 %v5175_v6, %v5175_v6 }
 0x320   : > { %v4151_v18 = vadd.f32 %v4150_v10, %v3896_v55  ;;  %v3635_v15 = vadd.f32 %v3634_v33, %v5926_v43  ;;  %3482 = vst [vmem:[%s5343_s17 + $0x720] sm:$0xff] %v6061_v11  ;;  %v5171_v43 = vld [vmem:[%s5343_s17 + $0x408] sm:$0xff]  ;;  %v5176_v55 = vld [vmem:[%s5343_s17 + $0x430] sm:$0xff] }
 0x321   : > { %v3900_v25 = vmul.f32 %v5171_v43, %v5171_v43 }
 0x322   : > { %v4152_v31 = vadd.f32 %v4151_v18, %v3897_v28  ;;  %v3636_v26 = vadd.f32 %v3635_v15, %v5950_v56  ;;  %v5172_v56 = vld [vmem:[%s5343_s17 + $0x410] sm:$0xff]  ;;  %v3905_v18 = vmul.f32 %v5176_v55, %v5176_v55 }
 0x323   : > { %v3901_v12 = vmul.f32 %v5172_v56, %v5172_v56 }
 0x324   : > { %v3637_v22 = vadd.f32 %v5170_v0, %v3636_v26  ;;  %v4153_v29 = vadd.f32 %v4152_v31, %v3898_v21  ;;  %v5177_v31 = vld [vmem:[%s5343_s17 + $0x438] sm:$0xff] }
 0x325   : > { %v3906_v26 = vmul.f32 %v5177_v31, %v5177_v31 }
 0x326   : > { %v3638_v40 = vadd.f32 %v5171_v43, %v3637_v22  ;;  %v4154_v42 = vadd.f32 %v4153_v29, %v3899_v34  ;;  %v6069_v57 = vpop.f32.mrf.mxu2  ;;  %v6073_v58 = vpop.f32.mrf.mxu3  ;;  %v5178_v29 = vld [vmem:[%s5343_s17 + $0x440] sm:$0xff] }
 0x327   : > { %3435 = vst [vmem:[%s5343_s17 + $0x5a8] sm:$0xff] %v6069_v57  ;;  %v3907_v43 = vmul.f32 %v5178_v29, %v5178_v29 }
 0x328   : > { %v3639_v35 = vadd.f32 %v5172_v56, %v3638_v40  ;;  %v4155_v39 = vadd.f32 %v4154_v42, %v3900_v25  ;;  %3483 = vst [vmem:[%s5343_s17 + $0x728] sm:$0xff] %v6073_v58  ;;  %v5179_v42 = vld [vmem:[%s5343_s17 + $0x448] sm:$0xff] }
 0x329   : > { %v3908_v56 = vmul.f32 %v5179_v42, %v5179_v42 }
 0x32a   : > { %v3640_v48 = vadd.f32 %v5173_v53, %v3639_v35  ;;  %v4156_v23 = vadd.f32 %v4155_v39, %v3901_v12  ;;  %v5180_v39 = vld [vmem:[%s5343_s17 + $0x450] sm:$0xff] }
 0x32b   : > { %2457 = vmatmul.bf16.gmra.mxu3 %v5085_v2  ;;  %v3909_v53 = vmul.f32 %v5180_v39, %v5180_v39 }
 0x32c   : > { %v3641_v9 = vadd.f32 %v5174_v1, %v3640_v48  ;;  %v4157_v41 = vadd.f32 %v4156_v23, %v3902_v14  ;;  %v5181_v23 = vld [vmem:[%s5343_s17 + $0x458] sm:$0xff] }
 0x32d   : > { %v3910_v1 = vmul.f32 %v5181_v23, %v5181_v23 }
 0x32e   : > { %v3642_v10 = vadd.f32 %v5175_v6, %v3641_v9  ;;  %v4158_v33 = vadd.f32 %v4157_v41, %v3903_v52  ;;  %v6082_v34 = vpop.f32.mrf.mxu2  ;;  %v6086_v22 = vpop.f32.mrf.mxu3  ;;  %v5182_v6 = vld [vmem:[%s5343_s17 + $0x460] sm:$0xff] }
 0x32f   : > { %3436 = vst [vmem:[%s5343_s17 + $0x5b0] sm:$0xff] %v6082_v34 }
 0x330   : > { %v3643_v15 = vadd.f32 %v5176_v55, %v3642_v10  ;;  %v4159_v28 = vadd.f32 %v4158_v33, %v3904_v63  ;;  %3484 = vst [vmem:[%s5343_s17 + $0x730] sm:$0xff] %v6086_v22  ;;  %v3911_v63 = vmul.f32 %v5182_v6, %v5182_v6  ;;  %v5086_v55 = vld [vmem:[%s5326_s9 + $0x3e0] sm:$0xff] }
 0x332   : > { %v3644_v21 = vadd.f32 %v5177_v31, %v3643_v15  ;;  %v4160_v0 = vadd.f32 %v4159_v28, %v3905_v18  ;;  %v5183_v18 = vld [vmem:[%s5343_s17 + $0x468] sm:$0xff] }
 0x333   : > { %v3912_v15 = vmul.f32 %v5183_v18, %v5183_v18 }
 0x334   : > { %v3645_v25 = vadd.f32 %v5178_v29, %v3644_v21  ;;  %v4161_v40 = vadd.f32 %v4160_v0, %v3906_v26  ;;  %v5184_v26 = vld [vmem:[%s5343_s17 + $0x470] sm:$0xff] }
 0x335   : > { %v3913_v21 = vmul.f32 %v5184_v26, %v5184_v26 }
 0x336   : > { %v3646_v12 = vadd.f32 %v5179_v42, %v3645_v25  ;;  %v4162_v35 = vadd.f32 %v4161_v40, %v3907_v43  ;;  %v6094_v41 = vpop.f32.mrf.mxu2  ;;  %v6098_v2 = vpop.f32.mrf.mxu3  ;;  %v5185_v43 = vld [vmem:[%s5343_s17 + $0x478] sm:$0xff] }
 0x337   : > { %3437 = vst [vmem:[%s5343_s17 + $0x5b8] sm:$0xff] %v6094_v41  ;;  %v3914_v25 = vmul.f32 %v5185_v43, %v5185_v43 }
 0x338   : > { %v3647_v14 = vadd.f32 %v5180_v39, %v3646_v12  ;;  %v4163_v48 = vadd.f32 %v4162_v35, %v3908_v56  ;;  %3485 = vst [vmem:[%s5343_s17 + $0x738] sm:$0xff] %v6098_v2  ;;  %v5186_v35 = vld [vmem:[%s5343_s17 + $0x480] sm:$0xff] }
 0x339   : > { %v3915_v39 = vmul.f32 %v5186_v35, %v5186_v35 }
 0x33a   : > { %v3648_v52 = vadd.f32 %v5181_v23, %v3647_v14  ;;  %v4164_v9 = vadd.f32 %v4163_v48, %v3909_v53  ;;  %v5187_v48 = vld [vmem:[%s5343_s17 + $0x488] sm:$0xff] }
 0x33b   : > { %2462 = vmatmul.bf16.gmra.mxu3 %v5086_v55  ;;  %v3916_v23 = vmul.f32 %v5187_v48, %v5187_v48 }
 0x33c   : > { %v3649_v10 = vadd.f32 %v5182_v6, %v3648_v52  ;;  %v4165_v33 = vadd.f32 %v4164_v9, %v3910_v1  ;;  %v5188_v9 = vld [vmem:[%s5343_s17 + $0x490] sm:$0xff] }
 0x33d   : > { %v3917_v6 = vmul.f32 %v5188_v9, %v5188_v9 }
 0x33e   : > { %v3650_v28 = vadd.f32 %v5183_v18, %v3649_v10  ;;  %v4166_v31 = vadd.f32 %v4165_v33, %v3911_v63  ;;  %v6107_v56 = vpop.f32.mrf.mxu2  ;;  %v6111_v12 = vpop.f32.mrf.mxu3  ;;  %v5189_v33 = vld [vmem:[%s5343_s17 + $0x498] sm:$0xff] }
 0x33f   : > { %3438 = vst [vmem:[%s5343_s17 + $0x5c0] sm:$0xff] %v6107_v56  ;;  %v3918_v55 = vmul.f32 %v5189_v33, %v5189_v33 }
 0x340   : > { %v3651_v0 = vadd.f32 %v5184_v26, %v3650_v28  ;;  %v4167_v29 = vadd.f32 %v4166_v31, %v3912_v15  ;;  %3486 = vst [vmem:[%s5343_s17 + $0x740] sm:$0xff] %v6111_v12  ;;  %v5190_v26 = vld [vmem:[%s5343_s17 + $0x4a0] sm:$0xff] }
 0x342   : > { %v3652_v40 = vadd.f32 %v5185_v43, %v3651_v0  ;;  %v4168_v42 = vadd.f32 %v4167_v29, %v3913_v21  ;;  %v3919_v21 = vmul.f32 %v5190_v26, %v5190_v26  ;;  %v5087_v43 = vld [vmem:[%s5326_s9 + $0x3e8] sm:$0xff] }
 0x344   : > { %v3653_v53 = vadd.f32 %v5186_v35, %v3652_v40  ;;  %v4169_v14 = vadd.f32 %v4168_v42, %v3914_v25  ;;  %v5191_v25 = vld [vmem:[%s5343_s17 + $0x4a8] sm:$0xff] }
 0x345   : > { %v3920_v40 = vmul.f32 %v5191_v25, %v5191_v25 }
 0x346   : > { %v3654_v1 = vadd.f32 %v5187_v48, %v3653_v53  ;;  %v4170_v52 = vadd.f32 %v4169_v14, %v3915_v39  ;;  %v6119_v28 = vpop.f32.mrf.mxu2  ;;  %v6123_v31 = vpop.f32.mrf.mxu3  ;;  %v5192_v39 = vld [vmem:[%s5343_s17 + $0x4b0] sm:$0xff] }
 0x347   : > { %3439 = vst [vmem:[%s5343_s17 + $0x5c8] sm:$0xff] %v6119_v28  ;;  %v3921_v53 = vmul.f32 %v5192_v39, %v5192_v39 }
 0x348   : > { %v3655_v63 = vadd.f32 %v5188_v9, %v3654_v1  ;;  %v4171_v10 = vadd.f32 %v4170_v52, %v3916_v23  ;;  %3487 = vst [vmem:[%s5343_s17 + $0x748] sm:$0xff] %v6123_v31  ;;  %v5193_v23 = vld [vmem:[%s5343_s17 + $0x4b8] sm:$0xff] }
 0x349   : > { %v3922_v1 = vmul.f32 %v5193_v23, %v5193_v23 }
 0x34a   : > { %v3656_v18 = vadd.f32 %v5189_v33, %v3655_v63  ;;  %v4172_v15 = vadd.f32 %v4171_v10, %v3917_v6  ;;  %v5194_v10 = vld [vmem:[%s5343_s17 + $0x4c0] sm:$0xff] }
 0x34b   : > { %2467 = vmatmul.bf16.gmra.mxu3 %v5087_v43  ;;  %v3923_v33 = vmul.f32 %v5194_v10, %v5194_v10 }
 0x34c   : > { %v3657_v0 = vadd.f32 %v5190_v26, %v3656_v18  ;;  %v4173_v29 = vadd.f32 %v4172_v15, %v3918_v55  ;;  %v5195_v15 = vld [vmem:[%s5343_s17 + $0x4c8] sm:$0xff] }
 0x34d   : > { %v3924_v26 = vmul.f32 %v5195_v15, %v5195_v15 }
 0x34e   : > { %v3658_v42 = vadd.f32 %v5191_v25, %v3657_v0  ;;  %v4174_v35 = vadd.f32 %v4173_v29, %v3919_v21  ;;  %v6132_v6 = vpop.f32.mrf.mxu2  ;;  %v6136_v63 = vpop.f32.mrf.mxu3  ;;  %v5196_v29 = vld [vmem:[%s5343_s17 + $0x4d0] sm:$0xff] }
 0x34f   : > { %3440 = vst [vmem:[%s5343_s17 + $0x5d0] sm:$0xff] %v6132_v6  ;;  %v3925_v43 = vmul.f32 %v5196_v29, %v5196_v29 }
 0x350   : > { %v3659_v14 = vadd.f32 %v5192_v39, %v3658_v42  ;;  %v4175_v48 = vadd.f32 %v4174_v35, %v3920_v40  ;;  %3488 = vst [vmem:[%s5343_s17 + $0x750] sm:$0xff] %v6136_v63  ;;  %v5197_v42 = vld [vmem:[%s5343_s17 + $0x4d8] sm:$0xff] }
 0x351   : > { %v3926_v35 = vmul.f32 %v5197_v42, %v5197_v42 }
 0x352   : > { %v3660_v52 = vadd.f32 %v5193_v23, %v3659_v14  ;;  %v4176_v9 = vadd.f32 %v4175_v48, %v3921_v53  ;;  %v5198_v23 = vld [vmem:[%s5343_s17 + $0x4e0] sm:$0xff] }
 0x354   : > { %v4177_v55 = vadd.f32 %v4176_v9, %v3922_v1  ;;  %v3661_v18 = vadd.f32 %v5194_v10, %v3660_v52  ;;  %v3927_v1 = vmul.f32 %v5198_v23, %v5198_v23  ;;  %v5088_v10 = vld [vmem:[%s5326_s9 + $0x3f0] sm:$0xff] }
 0x356   : > { %v3662_v21 = vadd.f32 %v5195_v15, %v3661_v18  ;;  %v4178_v0 = vadd.f32 %v4177_v55, %v3923_v33  ;;  %v6144_v14 = vpop.f32.mrf.mxu2  ;;  %v6148_v48 = vpop.f32.mrf.mxu3  ;;  %v5199_v33 = vld [vmem:[%s5343_s17 + $0x4e8] sm:$0xff] }
 0x357   : > { %3441 = vst [vmem:[%s5343_s17 + $0x5d8] sm:$0xff] %v6144_v14  ;;  %v3928_v55 = vmul.f32 %v5199_v33, %v5199_v33 }
 0x358   : > { %v3663_v25 = vadd.f32 %v5196_v29, %v3662_v21  ;;  %v4179_v40 = vadd.f32 %v4178_v0, %v3924_v26  ;;  %3489 = vst [vmem:[%s5343_s17 + $0x758] sm:$0xff] %v6148_v48  ;;  %v5200_v26 = vld [vmem:[%s5343_s17 + $0x4f0] sm:$0xff] }
 0x359   : > { %v3929_v21 = vmul.f32 %v5200_v26, %v5200_v26 }
 0x35a   : > { %v3664_v39 = vadd.f32 %v5197_v42, %v3663_v25  ;;  %v4180_v53 = vadd.f32 %v4179_v40, %v3925_v43  ;;  %v5201_v43 = vld [vmem:[%s5343_s17 + $0x4f8] sm:$0xff] }
 0x35b   : > { %2472 = vmatmul.bf16.gmra.mxu3 %v5088_v10  ;;  %v3930_v25 = vmul.f32 %v5201_v43, %v5201_v43 }
 0x35c   : > { %v3665_v52 = vadd.f32 %v5198_v23, %v3664_v39  ;;  %v4181_v9 = vadd.f32 %v4180_v53, %v3926_v35  ;;  %v5202_v53 = vld [vmem:[%s5343_s17 + $0x500] sm:$0xff] }
 0x35d   : > { %v3931_v23 = vmul.f32 %v5202_v53, %v5202_v53 }
 0x35e   : > { %v3666_v18 = vadd.f32 %v5199_v33, %v3665_v52  ;;  %v4182_v15 = vadd.f32 %v4181_v9, %v3927_v1  ;;  %v6157_v35 = vpop.f32.mrf.mxu2  ;;  %v6161_v39 = vpop.f32.mrf.mxu3  ;;  %v3932_v9 = vmul.f32 %v5696_v20, %v5696_v20 }
 0x35f   : > { %3442 = vst [vmem:[%s5343_s17 + $0x5e0] sm:$0xff] %v6157_v35 }
 0x360   : > { %v3667_v0 = vadd.f32 %v5200_v26, %v3666_v18  ;;  %v4183_v29 = vadd.f32 %v4182_v15, %v3928_v55  ;;  %3490 = vst [vmem:[%s5343_s17 + $0x760] sm:$0xff] %v6161_v39  ;;  %v3933_v55 = vmul.f32 %v5721_v45, %v5721_v45  ;;  %v3934_v26 = vmul.f32 %v5735_v7, %v5735_v7 }
 0x362   : > { %v3668_v40 = vadd.f32 %v5201_v43, %v3667_v0  ;;  %v4184_v42 = vadd.f32 %v4183_v29, %v3929_v21 }
 0x364   : > { %v3669_v1 = vadd.f32 %v5202_v53, %v3668_v40  ;;  %v4185_v52 = vadd.f32 %v4184_v42, %v3930_v25  ;;  %v5089_v40 = vld [vmem:[%s5326_s9 + $0x3f8] sm:$0xff] }
 0x366   : > { %v3670_v10 = vadd.f32 %v3669_v1, %v5696_v20  ;;  %v4186_v33 = vadd.f32 %v4185_v52, %v3931_v23  ;;  %v6175_v29 = vpop.f32.mrf.mxu2  ;;  %v6179_v43 = vpop.f32.mrf.mxu3  ;;  %v3935_v20 = vmul.f32 %v5747_v44, %v5747_v44  ;;  %v3937_v23 = vmul.f32 %v5775_v54, %v5775_v54 }
 0x367   : > { %3443 = vst [vmem:[%s5343_s17 + $0x5e8] sm:$0xff] %v6175_v29 }
 0x368   : > { %v3671_v18 = vadd.f32 %v3670_v10, %v5721_v45  ;;  %v4187_v15 = vadd.f32 %v4186_v33, %v3932_v9  ;;  %3491 = vst [vmem:[%s5343_s17 + $0x768] sm:$0xff] %v6179_v43 }
 0x36a   : > { %v3672_v21 = vadd.f32 %v3671_v18, %v5735_v7  ;;  %v4188_v0 = vadd.f32 %v4187_v15, %v3933_v55  ;;  %v3936_v7 = vmul.f32 %v5760_v13, %v5760_v13  ;;  %v3939_v55 = vmul.f32 %v5803_v24, %v5803_v24 }
 0x36b   : > { %2477 = vmatmul.bf16.gmra.mxu3 %v5089_v40 }
 0x36c   : > { %v3673_v25 = vadd.f32 %v3672_v21, %v5747_v44  ;;  %v4189_v45 = vadd.f32 %v4188_v0, %v3934_v26  ;;  %v3938_v44 = vmul.f32 %v5788_v36, %v5788_v36  ;;  %v3941_v21 = vmul.f32 %v5831_v47, %v5831_v47 }
 0x36e   : > { %v3674_v42 = vadd.f32 %v3673_v25, %v5760_v13  ;;  %v4190_v53 = vadd.f32 %v4189_v45, %v3935_v20  ;;  %v6196_v33 = vpop.f32.mrf.mxu2  ;;  %v6200_v13 = vpop.f32.mrf.mxu3  ;;  %v3942_v25 = vmul.f32 %v5852_v46, %v5852_v46 }
 0x36f   : > { %3444 = vst [vmem:[%s5343_s17 + $0x5f0] sm:$0xff] %v6196_v33 }
 0x370   : > { %v3675_v1 = vadd.f32 %v3674_v42, %v5775_v54  ;;  %v4191_v52 = vadd.f32 %v4190_v53, %v3936_v7  ;;  %3492 = vst [vmem:[%s5343_s17 + $0x770] sm:$0xff] %v6200_v13  ;;  %v3944_v53 = vmul.f32 %v5902_v60, %v5902_v60 }
 0x372   : > { %v3676_v9 = vadd.f32 %v3675_v1, %v5788_v36  ;;  %v4192_v10 = vadd.f32 %v4191_v52, %v3937_v23  ;;  %v3940_v36 = vmul.f32 %v5816_v4, %v5816_v4  ;;  %v3945_v1 = vmul.f32 %v5928_v38, %v5928_v38 }
 0x374   : > { %v3677_v18 = vadd.f32 %v3676_v9, %v5803_v24  ;;  %v4193_v54 = vadd.f32 %v4192_v10, %v3938_v44 }
 0x376   : > { %v3678_v15 = vadd.f32 %v3677_v18, %v5816_v4  ;;  %v4194_v26 = vadd.f32 %v4193_v54, %v3939_v55  ;;  %v6216_v40 = vpop.f32.mrf.mxu2  ;;  %v6220_v7 = vpop.f32.mrf.mxu3  ;;  %v3943_v4 = vmul.f32 %v5878_v27, %v5878_v27 }
 0x377   : > { %3445 = vst [vmem:[%s5343_s17 + $0x5f8] sm:$0xff] %v6216_v40 }
 0x378   : > { %v3679_v0 = vadd.f32 %v3678_v15, %v5831_v47  ;;  %v4195_v20 = vadd.f32 %v4194_v26, %v3940_v36  ;;  %3493 = vst [vmem:[%s5343_s17 + $0x778] sm:$0xff] %v6220_v7  ;;  %v3948_v15 = vmul.f32 %v5995_v61, %v5995_v61 }
 0x37a   : > { %v3680_v24 = vadd.f32 %v3679_v0, %v5852_v46  ;;  %v4196_v45 = vadd.f32 %v4195_v20, %v3941_v21  ;;  %v3949_v21 = vmul.f32 %v6016_v30, %v6016_v30 }
 0x37c   : > { %v3681_v42 = vadd.f32 %v3680_v24, %v5878_v27  ;;  %v4197_v47 = vadd.f32 %v4196_v45, %v3942_v25  ;;  %v3946_v27 = vmul.f32 %v5952_v19, %v5952_v19 }
 0x37e   : > { %v3682_v46 = vadd.f32 %v3681_v42, %v5902_v60  ;;  %v4198_v23 = vadd.f32 %v4197_v47, %v3943_v4  ;;  %v6236_v55 = vpop.f32.mrf.mxu3  ;;  %v3947_v60 = vmul.f32 %v5975_v17, %v5975_v17  ;;  %v3952_v42 = vmul.f32 %v6069_v57, %v6069_v57 }
 0x37f   : > { %3494 = vst [vmem:[%s5343_s17 + $0x780] sm:$0xff] %v6236_v55 }
 0x380   : > { %v3683_v52 = vadd.f32 %v3682_v46, %v5928_v38  ;;  %v4199_v44 = vadd.f32 %v4198_v23, %v3944_v53  ;;  %v3953_v53 = vmul.f32 %v6082_v34, %v6082_v34 }
 0x382   : > { %v3684_v9 = vadd.f32 %v3683_v52, %v5952_v19  ;;  %v4200_v10 = vadd.f32 %v4199_v44, %v3945_v1 }
 0x384   : > { %v4201_v18 = vadd.f32 %v4200_v10, %v3946_v27  ;;  %v3685_v54 = vadd.f32 %v3684_v9, %v5975_v17  ;;  %v3950_v17 = vmul.f32 %v6036_v50, %v6036_v50  ;;  %v3956_v27 = vmul.f32 %v6119_v28, %v6119_v28 }
 0x386   : > { %v4202_v36 = vadd.f32 %v4201_v18, %v3947_v60  ;;  %v3686_v38 = vadd.f32 %v3685_v54, %v5995_v61  ;;  %v6252_v25 = vpop.f32.mrf.mxu3  ;;  %v3951_v61 = vmul.f32 %v6057_v5, %v6057_v5  ;;  %v3957_v18 = vmul.f32 %v6132_v6, %v6132_v6 }
 0x387   : > { %3495 = vst [vmem:[%s5343_s17 + $0x788] sm:$0xff] %v6252_v25 }
 0x388   : > { %v4203_v26 = vadd.f32 %v4202_v36, %v3948_v15  ;;  %v3687_v19 = vadd.f32 %v3686_v38, %v6016_v30 }
 0x38a   : > { %v4204_v0 = vadd.f32 %v4203_v26, %v3949_v21  ;;  %v3688_v20 = vadd.f32 %v3687_v19, %v6036_v50  ;;  %v3960_v19 = vmul.f32 %v6175_v29, %v6175_v29 }
 0x38c   : > { %v4205_v24 = vadd.f32 %v4204_v0, %v3950_v17  ;;  %v3689_v45 = vadd.f32 %v3688_v20, %v6057_v5  ;;  %v3954_v5 = vmul.f32 %v6094_v41, %v6094_v41  ;;  %v3961_v0 = vmul.f32 %v6196_v33, %v6196_v33 }
 0x38d   : > { %v3962_v17 = vmul.f32 %v6216_v40, %v6216_v40 }
 0x38e   : > { %v4206_v4 = vadd.f32 %v4205_v24, %v3951_v61  ;;  %v3690_v30 = vadd.f32 %v3689_v45, %v6069_v57  ;;  %v6268_v1 = vpop.f32.mrf.mxu3  ;;  %v3955_v57 = vmul.f32 %v6107_v56, %v6107_v56  ;;  %v5203_v45 = vld [vmem:[%s5343_s17 + $0x600] sm:$0xff] }
 0x38f   : > { %3496 = vst [vmem:[%s5343_s17 + $0x790] sm:$0xff] %v6268_v1  ;;  %v3963_v61 = vmul.f32 %v5203_v45, %v5203_v45 }
 0x390   : > { %v4207_v47 = vadd.f32 %v4206_v4, %v3952_v42  ;;  %v3691_v50 = vadd.f32 %v3690_v30, %v6082_v34  ;;  %v5204_v30 = vld [vmem:[%s5343_s17 + $0x608] sm:$0xff] }
 0x391   : > { %v3964_v42 = vmul.f32 %v5204_v30, %v5204_v30 }
 0x392   : > { %v4208_v46 = vadd.f32 %v4207_v47, %v3953_v53  ;;  %v3692_v23 = vadd.f32 %v3691_v50, %v6094_v41  ;;  %v5205_v50 = vld [vmem:[%s5343_s17 + $0x610] sm:$0xff] }
 0x393   : > { %v3965_v53 = vmul.f32 %v5205_v50, %v5205_v50 }
 0x394   : > { %v4209_v52 = vadd.f32 %v4208_v46, %v3954_v5  ;;  %v3693_v44 = vadd.f32 %v3692_v23, %v6107_v56  ;;  %v3958_v56 = vmul.f32 %v6144_v14, %v6144_v14  ;;  %v5206_v23 = vld [vmem:[%s5343_s17 + $0x618] sm:$0xff] }
 0x395   : > { %v3966_v5 = vmul.f32 %v5206_v23, %v5206_v23 }
 0x396   : > { %v4210_v9 = vadd.f32 %v4209_v52, %v3955_v57  ;;  %v3694_v34 = vadd.f32 %v3693_v44, %v6119_v28  ;;  %v6284_v36 = vpop.f32.mrf.mxu3  ;;  %v3959_v28 = vmul.f32 %v6157_v35, %v6157_v35 }
 0x397   : > { %3497 = vst [vmem:[%s5343_s17 + $0x798] sm:$0xff] %v6284_v36 }
 0x398   : > { %v4211_v10 = vadd.f32 %v4210_v9, %v3956_v27  ;;  %v3695_v41 = vadd.f32 %v3694_v34, %v6132_v6  ;;  %v5207_v9 = vld [vmem:[%s5343_s17 + $0x620] sm:$0xff] }
 0x399   : > { %v3967_v34 = vmul.f32 %v5207_v9, %v5207_v9 }
 0x39a   : > { %v4212_v54 = vadd.f32 %v4211_v10, %v3957_v18  ;;  %v3696_v60 = vadd.f32 %v3695_v41, %v6144_v14  ;;  %v5208_v41 = vld [vmem:[%s5343_s17 + $0x628] sm:$0xff] }
 0x39b   : > { %v3968_v18 = vmul.f32 %v5208_v41, %v5208_v41 }
 0x39c   : > { %v4213_v38 = vadd.f32 %v4212_v54, %v3958_v56  ;;  %v3697_v15 = vadd.f32 %v3696_v60, %v6157_v35  ;;  %v5209_v56 = vld [vmem:[%s5343_s17 + $0x630] sm:$0xff] }
 0x39e   : > { %v4214_v6 = vadd.f32 %v4213_v38, %v3959_v28  ;;  %v3698_v26 = vadd.f32 %v3697_v15, %v6175_v29  ;;  %v6300_v24 = vpop.f32.mrf.mxu3  ;;  %v3969_v38 = vmul.f32 %v5209_v56, %v5209_v56 }
 0x39f   : > { %3498 = vst [vmem:[%s5343_s17 + $0x7a0] sm:$0xff] %v6300_v24 }
 0x3a0   : > { %v4215_v14 = vadd.f32 %v4214_v6, %v3960_v19  ;;  %v3699_v21 = vadd.f32 %v3698_v26, %v6196_v33  ;;  %v5210_v6 = vld [vmem:[%s5343_s17 + $0x638] sm:$0xff] }
 0x3a1   : > { %v3970_v26 = vmul.f32 %v5210_v6, %v5210_v6 }
 0x3a2   : > { %v4216_v20 = vadd.f32 %v4215_v14, %v3961_v0  ;;  %v3700_v35 = vadd.f32 %v3699_v21, %v6216_v40  ;;  %v5211_v0 = vld [vmem:[%s5343_s17 + $0x640] sm:$0xff] }
 0x3a4   : > { %v3701_v4 = vadd.f32 %v5203_v45, %v3700_v35  ;;  %v4217_v29 = vadd.f32 %v4216_v20, %v3962_v17  ;;  %v3971_v20 = vmul.f32 %v5211_v0, %v5211_v0  ;;  %v5212_v45 = vld [vmem:[%s5343_s17 + $0x648] sm:$0xff] }
 0x3a6   : > { %v3702_v33 = vadd.f32 %v5204_v30, %v3701_v4  ;;  %v4218_v47 = vadd.f32 %v4217_v29, %v3963_v61  ;;  %v6308_v57 = vpop.f32.mrf.mxu3  ;;  %v3972_v61 = vmul.f32 %v5212_v45, %v5212_v45  ;;  %v5213_v30 = vld [vmem:[%s5343_s17 + $0x650] sm:$0xff] }
 0x3a7   : > { %3499 = vst [vmem:[%s5343_s17 + $0x7a8] sm:$0xff] %v6308_v57 }
 0x3a8   : > { %v3703_v46 = vadd.f32 %v5205_v50, %v3702_v33  ;;  %v4219_v40 = vadd.f32 %v4218_v47, %v3964_v42  ;;  %v3973_v42 = vmul.f32 %v5213_v30, %v5213_v30  ;;  %v5214_v50 = vld [vmem:[%s5343_s17 + $0x658] sm:$0xff] }
 0x3aa   : > { %v3704_v52 = vadd.f32 %v5206_v23, %v3703_v46  ;;  %v4220_v44 = vadd.f32 %v4219_v40, %v3965_v53  ;;  %v3974_v53 = vmul.f32 %v5214_v50, %v5214_v50 }
 0x3ac   : > { %v3705_v27 = vadd.f32 %v5207_v9, %v3704_v52  ;;  %v4221_v10 = vadd.f32 %v4220_v44, %v3966_v5  ;;  %v5215_v5 = vld [vmem:[%s5343_s17 + $0x660] sm:$0xff] }
 0x3ad   : > { %v3975_v52 = vmul.f32 %v5215_v5, %v5215_v5 }
 0x3ae   : > { %v3706_v54 = vadd.f32 %v5208_v41, %v3705_v27  ;;  %v4222_v60 = vadd.f32 %v4221_v10, %v3967_v34  ;;  %v6316_v21 = vpop.f32.mrf.mxu3  ;;  %v5216_v34 = vld [vmem:[%s5343_s17 + $0x668] sm:$0xff] }
 0x3af   : > { %3500 = vst [vmem:[%s5343_s17 + $0x7b0] sm:$0xff] %v6316_v21  ;;  %v3976_v27 = vmul.f32 %v5216_v34, %v5216_v34 }
 0x3b0   : > { %v3707_v15 = vadd.f32 %v5209_v56, %v3706_v54  ;;  %v4223_v28 = vadd.f32 %v4222_v60, %v3968_v18  ;;  %v5217_v18 = vld [vmem:[%s5343_s17 + $0x670] sm:$0xff] }
 0x3b1   : > { %v3977_v54 = vmul.f32 %v5217_v18, %v5217_v18 }
 0x3b2   : > { %v3708_v19 = vadd.f32 %v5210_v6, %v3707_v15  ;;  %v4224_v14 = vadd.f32 %v4223_v28, %v3969_v38  ;;  %v5218_v38 = vld [vmem:[%s5343_s17 + $0x678] sm:$0xff] }
 0x3b3   : > { %v3978_v15 = vmul.f32 %v5218_v38, %v5218_v38 }
 0x3b4   : > { %v3709_v35 = vadd.f32 %v5211_v0, %v3708_v19  ;;  %v4225_v17 = vadd.f32 %v4224_v14, %v3970_v26  ;;  %v5219_v19 = vld [vmem:[%s5343_s17 + $0x680] sm:$0xff] }
 0x3b5   : > { %v3979_v14 = vmul.f32 %v5219_v19, %v5219_v19 }
 0x3b6   : > { %v3710_v4 = vadd.f32 %v5212_v45, %v3709_v35  ;;  %v4226_v29 = vadd.f32 %v4225_v17, %v3971_v20  ;;  %v6324_v23 = vpop.f32.mrf.mxu3  ;;  %v5220_v35 = vld [vmem:[%s5343_s17 + $0x688] sm:$0xff] }
 0x3b7   : > { %3501 = vst [vmem:[%s5343_s17 + $0x7b8] sm:$0xff] %v6324_v23  ;;  %v3980_v17 = vmul.f32 %v5220_v35, %v5220_v35 }
 0x3b8   : > { %v3711_v33 = vadd.f32 %v5213_v30, %v3710_v4  ;;  %v4227_v47 = vadd.f32 %v4226_v29, %v3972_v61  ;;  %v5221_v4 = vld [vmem:[%s5343_s17 + $0x690] sm:$0xff] }
 0x3b9   : > { %v3981_v29 = vmul.f32 %v5221_v4, %v5221_v4 }
 0x3ba   : > { %v3712_v46 = vadd.f32 %v5214_v50, %v3711_v33  ;;  %v4228_v40 = vadd.f32 %v4227_v47, %v3973_v42  ;;  %v5222_v33 = vld [vmem:[%s5343_s17 + $0x698] sm:$0xff] }
 0x3bb   : > { %v3982_v47 = vmul.f32 %v5222_v33, %v5222_v33 }
 0x3bc   : > { %v3713_v44 = vadd.f32 %v5215_v5, %v3712_v46  ;;  %v4229_v9 = vadd.f32 %v4228_v40, %v3974_v53  ;;  %v5223_v40 = vld [vmem:[%s5343_s17 + $0x6a0] sm:$0xff] }
 0x3bd   : > { %v3983_v5 = vmul.f32 %v5223_v40, %v5223_v40 }
 0x3be   : > { %v3714_v10 = vadd.f32 %v5216_v34, %v3713_v44  ;;  %v4230_v41 = vadd.f32 %v4229_v9, %v3975_v52  ;;  %v6332_v26 = vpop.f32.mrf.mxu3  ;;  %v5224_v9 = vld [vmem:[%s5343_s17 + $0x6a8] sm:$0xff] }
 0x3bf   : > { %3502 = vst [vmem:[%s5343_s17 + $0x7c0] sm:$0xff] %v6332_v26  ;;  %v3984_v34 = vmul.f32 %v5224_v9, %v5224_v9 }
 0x3c0   : > { %v3715_v60 = vadd.f32 %v5217_v18, %v3714_v10  ;;  %v4231_v56 = vadd.f32 %v4230_v41, %v3976_v27  ;;  %v5225_v41 = vld [vmem:[%s5343_s17 + $0x6b0] sm:$0xff] }
 0x3c1   : > { %v3985_v18 = vmul.f32 %v5225_v41, %v5225_v41 }
 0x3c2   : > { %v3716_v28 = vadd.f32 %v5218_v38, %v3715_v60  ;;  %v4232_v6 = vadd.f32 %v4231_v56, %v3977_v54  ;;  %v5226_v56 = vld [vmem:[%s5343_s17 + $0x6b8] sm:$0xff] }
 0x3c3   : > { %v3986_v38 = vmul.f32 %v5226_v56, %v5226_v56 }
 0x3c4   : > { %v3717_v0 = vadd.f32 %v5219_v19, %v3716_v28  ;;  %v4233_v20 = vadd.f32 %v4232_v6, %v3978_v15  ;;  %v5227_v19 = vld [vmem:[%s5343_s17 + $0x6c0] sm:$0xff] }
 0x3c6   : > { %v3718_v45 = vadd.f32 %v5220_v35, %v3717_v0  ;;  %v4234_v61 = vadd.f32 %v4233_v20, %v3979_v14  ;;  %v6340_v46 = vpop.f32.mrf.mxu3  ;;  %v3987_v14 = vmul.f32 %v5227_v19, %v5227_v19  ;;  %v5228_v35 = vld [vmem:[%s5343_s17 + $0x6c8] sm:$0xff] }
 0x3c7   : > { %3503 = vst [vmem:[%s5343_s17 + $0x7c8] sm:$0xff] %v6340_v46 }
 0x3c8   : > { %v3719_v30 = vadd.f32 %v5221_v4, %v3718_v45  ;;  %v4235_v42 = vadd.f32 %v4234_v61, %v3980_v17  ;;  %v3988_v17 = vmul.f32 %v5228_v35, %v5228_v35  ;;  %v5229_v4 = vld [vmem:[%s5343_s17 + $0x6d0] sm:$0xff] }
 0x3ca   : > { %v3720_v50 = vadd.f32 %v5222_v33, %v3719_v30  ;;  %v4236_v53 = vadd.f32 %v4235_v42, %v3981_v29  ;;  %v3989_v29 = vmul.f32 %v5229_v4, %v5229_v4  ;;  %v3990_v33 = vmul.f32 %v5856_v59, %v5856_v59 }
 0x3cc   : > { %v3721_v52 = vadd.f32 %v5223_v40, %v3720_v50  ;;  %v4237_v44 = vadd.f32 %v4236_v53, %v3982_v47  ;;  %v5230_v47 = vld [vmem:[%s5343_s17 + $0x6d8] sm:$0xff] }
 0x3ce   : > { %v3722_v27 = vadd.f32 %v5224_v9, %v3721_v52  ;;  %v4238_v10 = vadd.f32 %v4237_v44, %v3983_v5  ;;  %v6348_v6 = vpop.f32.mrf.mxu3  ;;  %v3991_v5 = vmul.f32 %v5882_v32, %v5882_v32  ;;  %v3992_v9 = vmul.f32 %v5906_v62, %v5906_v62 }
 0x3cf   : > { %3504 = vst [vmem:[%s5343_s17 + $0x7d0] sm:$0xff] %v6348_v6 }
 0x3d0   : > { %v3723_v54 = vadd.f32 %v5225_v41, %v3722_v27  ;;  %v4239_v60 = vadd.f32 %v4238_v10, %v3984_v34  ;;  %v3993_v27 = vmul.f32 %v5932_v51, %v5932_v51 }
 0x3d2   : > { %v3724_v15 = vadd.f32 %v5226_v56, %v3723_v54  ;;  %v4240_v28 = vadd.f32 %v4239_v60, %v3985_v18  ;;  %v3994_v18 = vmul.f32 %v5956_v16, %v5956_v16  ;;  %v3995_v56 = vmul.f32 %v5979_v49, %v5979_v49 }
 0x3d4   : > { %v4241_v0 = vadd.f32 %v4240_v28, %v3986_v38  ;;  %v3725_v20 = vadd.f32 %v5227_v19, %v3724_v15 }
 0x3d6   : > { %v3726_v45 = vadd.f32 %v5228_v35, %v3725_v20  ;;  %v4242_v61 = vadd.f32 %v4241_v0, %v3987_v14  ;;  %v6358_v40 = vpop.f32.mrf.mxu3  ;;  %v3998_v0 = vmul.f32 %v6040_v3, %v6040_v3 }
 0x3d7   : > { %3505 = vst [vmem:[%s5343_s17 + $0x7d8] sm:$0xff] %v6358_v40 }
 0x3d8   : > { %v3727_v30 = vadd.f32 %v5229_v4, %v3726_v45  ;;  %v4243_v42 = vadd.f32 %v4242_v61, %v3988_v17  ;;  %v3999_v17 = vmul.f32 %v6061_v11, %v6061_v11 }
 0x3da   : > { %v3728_v50 = vadd.f32 %v5230_v47, %v3727_v30  ;;  %v4244_v53 = vadd.f32 %v4243_v42, %v3989_v29  ;;  %v4002_v42 = vmul.f32 %v6098_v2, %v6098_v2 }
 0x3dc   : > { %v3729_v52 = vadd.f32 %v3728_v50, %v5882_v32  ;;  %v4245_v44 = vadd.f32 %v4244_v53, %v3990_v33  ;;  %v4003_v50 = vmul.f32 %v6111_v12, %v6111_v12 }
 0x3de   : > { %v3730_v34 = vadd.f32 %v3729_v52, %v5906_v62  ;;  %v4246_v59 = vadd.f32 %v4245_v44, %v3991_v5  ;;  %v6374_v60 = vpop.f32.mrf.mxu3 }
 0x3df   : > { %3506 = vst [vmem:[%s5343_s17 + $0x7e0] sm:$0xff] %v6374_v60 }
 0x3e0   : > { %v3731_v10 = vadd.f32 %v3730_v34, %v5932_v51  ;;  %v4247_v41 = vadd.f32 %v4246_v59, %v3992_v9  ;;  %v3996_v51 = vmul.f32 %v5999_v8, %v5999_v8  ;;  %v4006_v34 = vmul.f32 %v6148_v48, %v6148_v48 }
 0x3e2   : > { %v3732_v32 = vadd.f32 %v3731_v10, %v5956_v16  ;;  %v4248_v54 = vadd.f32 %v4247_v41, %v3993_v27  ;;  %v3997_v16 = vmul.f32 %v6020_v37, %v6020_v37  ;;  %v4007_v10 = vmul.f32 %v6161_v39, %v6161_v39 }
 0x3e4   : > { %v3733_v62 = vadd.f32 %v3732_v32, %v5979_v49  ;;  %v4249_v38 = vadd.f32 %v4248_v54, %v3994_v18  ;;  %v4008_v18 = vmul.f32 %v6179_v43, %v6179_v43  ;;  %v4009_v54 = vmul.f32 %v6200_v13, %v6200_v13 }
 0x3e6   : > { %v3734_v15 = vadd.f32 %v3733_v62, %v5999_v8  ;;  %v4250_v28 = vadd.f32 %v4249_v38, %v3995_v56  ;;  %v6390_v35 = vpop.f32.mrf.mxu3  ;;  %v4010_v38 = vmul.f32 %v6220_v7, %v6220_v7 }
 0x3e7   : > { %3507 = vst [vmem:[%s5343_s17 + $0x7e8] sm:$0xff] %v6390_v35 }
 0x3e8   : > { %v3735_v19 = vadd.f32 %v3734_v15, %v6020_v37  ;;  %v4251_v14 = vadd.f32 %v4250_v28, %v3996_v51  ;;  %v4000_v37 = vmul.f32 %v6073_v58, %v6073_v58  ;;  %v4011_v28 = vmul.f32 %v6236_v55, %v6236_v55 }
 0x3ea   : > { %v3736_v49 = vadd.f32 %v3735_v19, %v6040_v3  ;;  %v4252_v20 = vadd.f32 %v4251_v14, %v3997_v16  ;;  %v4001_v3 = vmul.f32 %v6086_v22, %v6086_v22  ;;  %v4012_v19 = vmul.f32 %v6252_v25, %v6252_v25 }
 0x3ec   : > { %v3737_v8 = vadd.f32 %v3736_v49, %v6061_v11  ;;  %v4253_v45 = vadd.f32 %v4252_v20, %v3998_v0  ;;  %v4013_v0 = vmul.f32 %v6268_v1, %v6268_v1  ;;  %v4014_v20 = vmul.f32 %v6284_v36, %v6284_v36 }
 0x3ee   : > { %v3738_v61 = vadd.f32 %v3737_v8, %v6073_v58  ;;  %v4254_v4 = vadd.f32 %v4253_v45, %v3999_v17  ;;  %v6406_v47 = vpop.f32.mrf.mxu3  ;;  %v4015_v8 = vmul.f32 %v6300_v24, %v6300_v24 }
 0x3ef   : > { %3508 = vst [vmem:[%s5343_s17 + $0x7f0] sm:$0xff] %v6406_v47 }
 0x3f0   : > { %v3739_v29 = vadd.f32 %v3738_v61, %v6086_v22  ;;  %v4255_v30 = vadd.f32 %v4254_v4, %v4000_v37  ;;  %v4004_v22 = vmul.f32 %v6123_v31, %v6123_v31  ;;  %v4016_v37 = vmul.f32 %v6308_v57, %v6308_v57 }
 0x3f1   : > { %v4017_v4 = vmul.f32 %v6316_v21, %v6316_v21 }
 0x3f2   : > { %v3740_v11 = vadd.f32 %v3739_v29, %v6098_v2  ;;  %v4256_v33 = vadd.f32 %v4255_v30, %v4001_v3  ;;  %v4005_v2 = vmul.f32 %v6136_v63, %v6136_v63  ;;  %v4018_v29 = vmul.f32 %v6324_v23, %v6324_v23 }
 0x3f4   : > { %v3741_v58 = vadd.f32 %v3740_v11, %v6111_v12  ;;  %v4257_v53 = vadd.f32 %v4256_v33, %v4002_v42  ;;  %v4019_v42 = vmul.f32 %v6332_v26, %v6332_v26  ;;  %v4020_v33 = vmul.f32 %v6340_v46, %v6340_v46 }
 0x3f6   : > { %v3742_v5 = vadd.f32 %v3741_v58, %v6123_v31  ;;  %v4258_v52 = vadd.f32 %v4257_v53, %v4003_v50  ;;  %v2480_v27 = vpop.f32.mrf.mxu3  ;;  %v4021_v58 = vmul.f32 %v6348_v6, %v6348_v6 }
 0x3f7   : > { %3509 = vst [vmem:[%s5343_s17 + $0x7f8] sm:$0xff] %v2480_v27 }
 0x3f8   : > { %v3743_v44 = vadd.f32 %v3742_v5, %v6136_v63  ;;  %v4259_v9 = vadd.f32 %v4258_v52, %v4004_v22  ;;  %v4022_v22 = vmul.f32 %v6358_v40, %v6358_v40  ;;  %v4023_v52 = vmul.f32 %v6374_v60, %v6374_v60 }
 0x3fa   : > { %v3744_v12 = vadd.f32 %v3743_v44, %v6148_v48  ;;  %v4260_v59 = vadd.f32 %v4259_v9, %v4005_v2 }
 0x3fc   : > { %v3745_v41 = vadd.f32 %v3744_v12, %v6161_v39  ;;  %v4261_v31 = vadd.f32 %v4260_v59, %v4006_v34  ;;  %v4025_v34 = vmul.f32 %v6406_v47, %v6406_v47  ;;  %v4026_v59 = vmul.f32 %v2480_v27, %v2480_v27 }
 0x3fe   : > { %v3746_v63 = vadd.f32 %v3745_v41, %v6179_v43  ;;  %v4262_v32 = vadd.f32 %v4261_v31, %v4007_v10 }
 0x400   : > { %v3747_v48 = vadd.f32 %v3746_v63, %v6200_v13  ;;  %v4263_v56 = vadd.f32 %v4262_v32, %v4008_v18 }
 0x402   : > { %v3748_v62 = vadd.f32 %v3747_v48, %v6220_v7  ;;  %v4264_v39 = vadd.f32 %v4263_v56, %v4009_v54 }
 0x404   : > { %v4265_v51 = vadd.f32 %v4264_v39, %v4010_v38  ;;  %v3749_v15 = vadd.f32 %v3748_v62, %v6236_v55 }
 0x406   : > { %v4266_v43 = vadd.f32 %v4265_v51, %v4011_v28  ;;  %v3750_v16 = vadd.f32 %v3749_v15, %v6252_v25 }
 0x408   : > { %v4267_v13 = vadd.f32 %v4266_v43, %v4012_v19  ;;  %v3751_v14 = vadd.f32 %v3750_v16, %v6268_v1 }
 0x40a   : > { %v4268_v7 = vadd.f32 %v4267_v13, %v4013_v0  ;;  %v3752_v49 = vadd.f32 %v3751_v14, %v6284_v36 }
 0x40c   : > { %v4269_v17 = vadd.f32 %v4268_v7, %v4014_v20  ;;  %v3753_v55 = vadd.f32 %v3752_v49, %v6300_v24 }
 0x40e   : > { %v4270_v45 = vadd.f32 %v4269_v17, %v4015_v8  ;;  %v3754_v25 = vadd.f32 %v3753_v55, %v6308_v57 }
 0x410   : > { %v4271_v61 = vadd.f32 %v4270_v45, %v4016_v37  ;;  %v3755_v1 = vadd.f32 %v3754_v25, %v6316_v21 }
 0x412   : > { %v4272_v3 = vadd.f32 %v4271_v61, %v4017_v4  ;;  %v3756_v36 = vadd.f32 %v3755_v1, %v6324_v23 }
 0x414   : > { %v4273_v30 = vadd.f32 %v4272_v3, %v4018_v29  ;;  %v3757_v24 = vadd.f32 %v3756_v36, %v6332_v26 }
 0x416   : > { %v4274_v11 = vadd.f32 %v4273_v30, %v4019_v42  ;;  %v3758_v57 = vadd.f32 %v3757_v24, %v6340_v46 }
 0x418   : > { %v4275_v50 = vadd.f32 %v4274_v11, %v4020_v33  ;;  %v3759_v21 = vadd.f32 %v3758_v57, %v6348_v6  ;;  %v4024_v6 = vmul.f32 %v6390_v35, %v6390_v35 }
 0x41a   : > { %v4276_v53 = vadd.f32 %v4275_v50, %v4021_v58  ;;  %v3760_v23 = vadd.f32 %v3759_v21, %v6358_v40 }
 0x41c   : > { %v4277_v26 = vadd.f32 %v4276_v53, %v4022_v22  ;;  %v3761_v5 = vadd.f32 %v3760_v23, %v6374_v60 }
 0x41e   : > { %v4278_v46 = vadd.f32 %v4277_v26, %v4023_v52  ;;  %v3762_v2 = vadd.f32 %v3761_v5, %v6390_v35 }
 0x420   : > { %v4279_v44 = vadd.f32 %v4278_v46, %v4024_v6  ;;  %v3763_v9 = vadd.f32 %v3762_v2, %v6406_v47 }
 0x422   : > { %v4280_v40 = vadd.f32 %v4279_v44, %v4025_v34  ;;  %v3764_v12 = vadd.f32 %v3763_v9, %v2480_v27 }
 0x424   : > { %v3765_v10 = vrot.slane %v3764_v12, 4  ;;  %v4281_v41 = vadd.f32 %v4280_v40, %v4026_v59 }
 0x426   : > { %v3766_v60 = vadd.f32 %v3765_v10, %v3764_v12  ;;  %v4282_v31 = vrot.slane %v4281_v41, 4 }
 0x428   : > { %v3767_v18 = vrot.slane %v3766_v60, 2  ;;  %v4283_v63 = vadd.f32 %v4282_v31, %v4281_v41 }
 0x42a   : > { %v3768_v32 = vadd.f32 %v3767_v18, %v3766_v60  ;;  %v4284_v54 = vrot.slane %v4283_v63, 2 }
 0x42c   : > { %v3769_v35 = vrot.slane %v3768_v32, 1  ;;  %v4285_v48 = vadd.f32 %v4284_v54, %v4283_v63 }
 0x42e   : > { %v4286_v56 = vrot.slane %v4285_v48, 1  ;;  %v3770_v47 = vadd.f32 %v3769_v35, %v3768_v32 }
 0x430   : > { %v4287_v27 = vadd.f32 %v4286_v56, %v4285_v48 }
 0x432   : > { %v4289_v62 = vsel %vm4288_vm0, %v3770_v47, %v4287_v27 }
 0x433   : > { %4290 = vst [vmem:[%s229_s21] sm:$0x3] %v4289_v62 }
 0x434 PF: > { %s14_s14 = sadd.s32 1, %s5253_s14   ;;  %s6498_s12 = smov %s5249_s13 }
 0x435   : > { %p11_p6 = scmp.ge.s32.totalorder %s14_s14, 4   ;;  %s6499_s13 = smov %s6501_s15 }
 0x437   :  { %13 = sbr.rel (!%p11_p6) target bundleno = 2 (0x2), region = 81 }

</bundles_post_ra>
